<compile_context>
chip_gen: v6e
topology: v6e:2x2x1
jax: 0.10.0
libtpu: 0.0.40
codegen_flags: <defaults>
</compile_context>

<pallas_src>
import jax
import jax.numpy as jnp
from jax import lax
from jax.experimental import pallas as pl
from jax.experimental.pallas import tpu as pltpu

WIN = 7          # skimage default win_size
K1 = 0.01        # skimage default
K2 = 0.03        # skimage default
_DR_EPS = 1e-12  # guard against data_range == 0 (constant prediction)


def _custom_loss_kernel(pred_ref, gt_ref, out_ref):
    # X = gt, Y = pred  (matches ssim(depth_gt_np, depth_pred_np, ...)).
    x = gt_ref[...].astype(jnp.float32)
    y = pred_ref[...].astype(jnp.float32)
    H, W = x.shape
    oh = H - (WIN - 1)   # number of valid window rows
    ow = W - (WIN - 1)   # number of valid window cols

    # ---- elementwise reductions share the single load of x / y ----
    diff = y - x
    mse = jnp.sum(diff * diff) * (1.0 / (H * W))           # MSELoss, mean reduction
    data_range = jnp.maximum(jnp.max(y) - jnp.min(y), _DR_EPS)
    c1 = (K1 * data_range) ** 2
    c2 = (K2 * data_range) ** 2

    # ---- fused 7x7 box sums of (x, y, x*x, y*y, x*y) ----
    # Separable filter: row (sublane) pass then column (lane) pass, both done
    # with full-(H, W) circular rolls on the XLU.  For every valid position
    # (i < oh, j < ow) no wraparound occurs, so values there are exact; the
    # wrapped border is masked out of the final mean below.
    sx, sy = x, y
    sxx, syy, sxy = x * x, y * y, x * y
    for dy in range(1, WIN):
        rx = pltpu.roll(x, H - dy, axis=0)   # rx[i, j] == x[(i + dy) % H, j]
        ry = pltpu.roll(y, H - dy, axis=0)
        sx = sx + rx
        sy = sy + ry
        sxx = sxx + rx * rx
        syy = syy + ry * ry
        sxy = sxy + rx * ry

    ox, oy = sx, sy
    oxx, oyy, oxy = sxx, syy, sxy
    for dx in range(1, WIN):
        ox = ox + pltpu.roll(sx, W - dx, axis=1)
        oy = oy + pltpu.roll(sy, W - dx, axis=1)
        oxx = oxx + pltpu.roll(sxx, W - dx, axis=1)
        oyy = oyy + pltpu.roll(syy, W - dx, axis=1)
        oxy = oxy + pltpu.roll(sxy, W - dx, axis=1)

    np_ = float(WIN * WIN)
    inv_np = 1.0 / np_
    cov_norm = np_ / (np_ - 1.0)             # unbiased sample covariance
    ux = ox * inv_np
    uy = oy * inv_np
    uxx = oxx * inv_np
    uyy = oyy * inv_np
    uxy = oxy * inv_np

    vx = cov_norm * (uxx - ux * ux)
    vy = cov_norm * (uyy - uy * uy)
    vxy = cov_norm * (uxy - ux * uy)

    a1 = 2.0 * ux * uy + c1
    a2 = 2.0 * vxy + c2
    b1 = ux * ux + uy * uy + c1
    b2 = vx + vy + c2
    s_map = (a1 * a2) / (b1 * b2)

    # ---- mean over the valid (fully interior) windows only ----
    rows = lax.broadcasted_iota(jnp.int32, (H, W), 0)
    cols = lax.broadcasted_iota(jnp.int32, (H, W), 1)
    valid = (rows < oh) & (cols < ow)
    mssim = jnp.sum(jnp.where(valid, s_map, 0.0)) * (1.0 / (oh * ow))

    out_ref[0, 0] = mse * jnp.exp(1.0 - mssim)


def custom_loss(depth_pred, depth_gt):
    """total_loss = MSE(pred, gt) * exp(1 - SSIM(gt, pred))."""
    assert depth_pred.shape == depth_gt.shape
    H, W = depth_pred.shape
    assert H >= WIN and W >= WIN, "spatial dims must be >= win_size (7)"

    # ~16 full-size f32 temporaries live at peak; give 2x headroom while
    # staying under the smallest target's physical VMEM (v7x: 64 MiB / TC).
    vmem_bytes = int(min(100 * 1024 * 1024,
                         max(32 * 1024 * 1024, 2 * 16 * H * W * 4)))

    # TODO(synk): for depth maps beyond ~1-2k per side, switch to a halo
    # row-tiled grid (TILE_H + 6 input rows per step, scalar-prefetched
    # data_range, per-tile partial sums combined at the last grid step,
    # "parallel" row axis for the 2 TCs on v7x) so the working set stays
    # within the scoped-VMEM limit.
    out = pl.pallas_call(
        _custom_loss_kernel,
        out_shape=jax.ShapeDtypeStruct((1, 1), jnp.float32),
        in_specs=[
            pl.BlockSpec(memory_space=pltpu.VMEM),
            pl.BlockSpec(memory_space=pltpu.VMEM),
        ],
        out_specs=pl.BlockSpec(memory_space=pltpu.SMEM),
        compiler_params=pltpu.CompilerParams(vmem_limit_bytes=vmem_bytes),
    )(depth_pred, depth_gt)
    return out[0, 0]


def _reference(depth_pred, depth_gt):
    # Pure-JAX reference mirroring skimage.structural_similarity defaults,
    # implemented with explicit valid-window slicing (independent of the
    # roll-based kernel formulation).
    x = depth_gt.astype(jnp.float32)
    y = depth_pred.astype(jnp.float32)
    H, W = x.shape
    mse = jnp.mean((y - x) ** 2)
    dr = jnp.max(y) - jnp.min(y)
    c1, c2 = (K1 * dr) ** 2, (K2 * dr) ** 2
    np_ = WIN * WIN
    cov_norm = np_ / (np_ - 1.0)
    oh, ow = H - WIN + 1, W - WIN + 1

    def box_mean(a):
        acc = jnp.zeros((oh, ow), jnp.float32)
        for dy in range(WIN):
            for dx in range(WIN):
                acc = acc + a[dy:dy + oh, dx:dx + ow]
        return acc / np_

    ux, uy = box_mean(x), box_mean(y)
    uxx, uyy, uxy = box_mean(x * x), box_mean(y * y), box_mean(x * y)
    vx = cov_norm * (uxx - ux * ux)
    vy = cov_norm * (uyy - uy * uy)
    vxy = cov_norm * (uxy - ux * uy)
    s = ((2 * ux * uy + c1) * (2 * vxy + c2)) / ((ux**2 + uy**2 + c1) * (vx + vy + c2))
    return mse * jnp.exp(1.0 - jnp.mean(s))


if __name__ == "__main__":
    key = jax.random.PRNGKey(0)
    k1, k2 = jax.random.split(key)
    H, W = 64, 128   # small, lane/sublane-aligned depth map
    depth_gt = jax.random.uniform(k1, (H, W), jnp.float32, minval=0.5, maxval=10.0)
    depth_pred = depth_gt + 0.1 * jax.random.normal(k2, (H, W), jnp.float32)

    loss = jax.block_until_ready(custom_loss(depth_pred, depth_gt))
    ref = jax.block_until_ready(_reference(depth_pred, depth_gt))

    assert jnp.isfinite(loss), "non-finite loss"
    assert jnp.allclose(loss, ref, rtol=1e-3, atol=1e-5), (loss, ref)
    print("KERNEL_OK")
</pallas_src>

<mosaic_0001>
module attributes {stable_mosaic.version = 11 : i64} {
  func.func @_custom_loss_kernel(%arg0: memref<64x128xf32, #tpu.memory_space<vmem>>, %arg1: memref<64x128xf32, #tpu.memory_space<vmem>>, %arg2: memref<1x1xf32, #tpu.memory_space<smem>>) attributes {dimension_semantics = [], scalar_prefetch = 0 : i64, scratch_operands = 0 : i64, tpu.core_type = #tpu.core_type<tc>} {
    %c0 = arith.constant 0 : index
    %c0_0 = arith.constant 0 : index
    %0 = vector.load %arg1[%c0, %c0_0] : memref<64x128xf32, #tpu.memory_space<vmem>>, vector<64x128xf32>
    %c0_1 = arith.constant 0 : index
    %c0_2 = arith.constant 0 : index
    %1 = vector.load %arg0[%c0_1, %c0_2] : memref<64x128xf32, #tpu.memory_space<vmem>>, vector<64x128xf32>
    %2 = arith.subf %1, %0 : vector<64x128xf32>
    %3 = arith.mulf %2, %2 : vector<64x128xf32>
    %4 = vector.shape_cast %3 : vector<64x128xf32> to vector<1x64x128xf32>
    %cst = arith.constant dense<0.000000e+00> : vector<1xf32>
    %5 = vector.multi_reduction <add>, %4, %cst [1, 2] : vector<1x64x128xf32> to vector<1xf32>
    %6 = vector.shape_cast %5 : vector<1xf32> to vector<1x1x1xf32>
    %7 = vector.extract %6[0, 0, 0] : f32 from vector<1x1x1xf32>
    %cst_3 = arith.constant 1.22070313E-4 : f32
    %8 = arith.mulf %7, %cst_3 : f32
    %9 = vector.shape_cast %1 : vector<64x128xf32> to vector<1x64x128xf32>
    %cst_4 = arith.constant dense<0xFF800000> : vector<1xf32>
    %10 = vector.multi_reduction <maximumf>, %9, %cst_4 [1, 2] : vector<1x64x128xf32> to vector<1xf32>
    %11 = vector.shape_cast %10 : vector<1xf32> to vector<1x1x1xf32>
    %12 = vector.extract %11[0, 0, 0] : f32 from vector<1x1x1xf32>
    %13 = vector.shape_cast %1 : vector<64x128xf32> to vector<1x64x128xf32>
    %cst_5 = arith.constant dense<0x7F800000> : vector<1xf32>
    %14 = vector.multi_reduction <minimumf>, %13, %cst_5 [1, 2] : vector<1x64x128xf32> to vector<1xf32>
    %15 = vector.shape_cast %14 : vector<1xf32> to vector<1x1x1xf32>
    %16 = vector.extract %15[0, 0, 0] : f32 from vector<1x1x1xf32>
    %17 = arith.subf %12, %16 : f32
    %cst_6 = arith.constant 9.99999996E-13 : f32
    %18 = arith.maximumf %17, %cst_6 : f32
    %cst_7 = arith.constant 0.00999999977 : f32
    %19 = arith.mulf %cst_7, %18 : f32
    %20 = arith.mulf %19, %19 : f32
    %cst_8 = arith.constant 3.000000e-02 : f32
    %21 = arith.mulf %cst_8, %18 : f32
    %22 = arith.mulf %21, %21 : f32
    %23 = arith.mulf %0, %0 : vector<64x128xf32>
    %24 = arith.mulf %1, %1 : vector<64x128xf32>
    %25 = arith.mulf %0, %1 : vector<64x128xf32>
    %c63_i32 = arith.constant 63 : i32
    %26 = tpu.dynamic_rotate %0 by %c63_i32 dim 0 : vector<64x128xf32>, i32 -> vector<64x128xf32>
    %c63_i32_9 = arith.constant 63 : i32
    %27 = tpu.dynamic_rotate %1 by %c63_i32_9 dim 0 : vector<64x128xf32>, i32 -> vector<64x128xf32>
    %28 = arith.addf %0, %26 : vector<64x128xf32>
    %29 = arith.addf %1, %27 : vector<64x128xf32>
    %30 = arith.mulf %26, %26 : vector<64x128xf32>
    %31 = arith.addf %23, %30 : vector<64x128xf32>
    %32 = arith.mulf %27, %27 : vector<64x128xf32>
    %33 = arith.addf %24, %32 : vector<64x128xf32>
    %34 = arith.mulf %26, %27 : vector<64x128xf32>
    %35 = arith.addf %25, %34 : vector<64x128xf32>
    %c62_i32 = arith.constant 62 : i32
    %36 = tpu.dynamic_rotate %0 by %c62_i32 dim 0 : vector<64x128xf32>, i32 -> vector<64x128xf32>
    %c62_i32_10 = arith.constant 62 : i32
    %37 = tpu.dynamic_rotate %1 by %c62_i32_10 dim 0 : vector<64x128xf32>, i32 -> vector<64x128xf32>
    %38 = arith.addf %28, %36 : vector<64x128xf32>
    %39 = arith.addf %29, %37 : vector<64x128xf32>
    %40 = arith.mulf %36, %36 : vector<64x128xf32>
    %41 = arith.addf %31, %40 : vector<64x128xf32>
    %42 = arith.mulf %37, %37 : vector<64x128xf32>
    %43 = arith.addf %33, %42 : vector<64x128xf32>
    %44 = arith.mulf %36, %37 : vector<64x128xf32>
    %45 = arith.addf %35, %44 : vector<64x128xf32>
    %c61_i32 = arith.constant 61 : i32
    %46 = tpu.dynamic_rotate %0 by %c61_i32 dim 0 : vector<64x128xf32>, i32 -> vector<64x128xf32>
    %c61_i32_11 = arith.constant 61 : i32
    %47 = tpu.dynamic_rotate %1 by %c61_i32_11 dim 0 : vector<64x128xf32>, i32 -> vector<64x128xf32>
    %48 = arith.addf %38, %46 : vector<64x128xf32>
    %49 = arith.addf %39, %47 : vector<64x128xf32>
    %50 = arith.mulf %46, %46 : vector<64x128xf32>
    %51 = arith.addf %41, %50 : vector<64x128xf32>
    %52 = arith.mulf %47, %47 : vector<64x128xf32>
    %53 = arith.addf %43, %52 : vector<64x128xf32>
    %54 = arith.mulf %46, %47 : vector<64x128xf32>
    %55 = arith.addf %45, %54 : vector<64x128xf32>
    %c60_i32 = arith.constant 60 : i32
    %56 = tpu.dynamic_rotate %0 by %c60_i32 dim 0 : vector<64x128xf32>, i32 -> vector<64x128xf32>
    %c60_i32_12 = arith.constant 60 : i32
    %57 = tpu.dynamic_rotate %1 by %c60_i32_12 dim 0 : vector<64x128xf32>, i32 -> vector<64x128xf32>
    %58 = arith.addf %48, %56 : vector<64x128xf32>
    %59 = arith.addf %49, %57 : vector<64x128xf32>
    %60 = arith.mulf %56, %56 : vector<64x128xf32>
    %61 = arith.addf %51, %60 : vector<64x128xf32>
    %62 = arith.mulf %57, %57 : vector<64x128xf32>
    %63 = arith.addf %53, %62 : vector<64x128xf32>
    %64 = arith.mulf %56, %57 : vector<64x128xf32>
    %65 = arith.addf %55, %64 : vector<64x128xf32>
    %c59_i32 = arith.constant 59 : i32
    %66 = tpu.dynamic_rotate %0 by %c59_i32 dim 0 : vector<64x128xf32>, i32 -> vector<64x128xf32>
    %c59_i32_13 = arith.constant 59 : i32
    %67 = tpu.dynamic_rotate %1 by %c59_i32_13 dim 0 : vector<64x128xf32>, i32 -> vector<64x128xf32>
    %68 = arith.addf %58, %66 : vector<64x128xf32>
    %69 = arith.addf %59, %67 : vector<64x128xf32>
    %70 = arith.mulf %66, %66 : vector<64x128xf32>
    %71 = arith.addf %61, %70 : vector<64x128xf32>
    %72 = arith.mulf %67, %67 : vector<64x128xf32>
    %73 = arith.addf %63, %72 : vector<64x128xf32>
    %74 = arith.mulf %66, %67 : vector<64x128xf32>
    %75 = arith.addf %65, %74 : vector<64x128xf32>
    %c58_i32 = arith.constant 58 : i32
    %76 = tpu.dynamic_rotate %0 by %c58_i32 dim 0 : vector<64x128xf32>, i32 -> vector<64x128xf32>
    %c58_i32_14 = arith.constant 58 : i32
    %77 = tpu.dynamic_rotate %1 by %c58_i32_14 dim 0 : vector<64x128xf32>, i32 -> vector<64x128xf32>
    %78 = arith.addf %68, %76 : vector<64x128xf32>
    %79 = arith.addf %69, %77 : vector<64x128xf32>
    %80 = arith.mulf %76, %76 : vector<64x128xf32>
    %81 = arith.addf %71, %80 : vector<64x128xf32>
    %82 = arith.mulf %77, %77 : vector<64x128xf32>
    %83 = arith.addf %73, %82 : vector<64x128xf32>
    %84 = arith.mulf %76, %77 : vector<64x128xf32>
    %85 = arith.addf %75, %84 : vector<64x128xf32>
    %c127_i32 = arith.constant 127 : i32
    %86 = tpu.dynamic_rotate %78 by %c127_i32 dim 1 : vector<64x128xf32>, i32 -> vector<64x128xf32>
    %87 = arith.addf %78, %86 : vector<64x128xf32>
    %c127_i32_15 = arith.constant 127 : i32
    %88 = tpu.dynamic_rotate %79 by %c127_i32_15 dim 1 : vector<64x128xf32>, i32 -> vector<64x128xf32>
    %89 = arith.addf %79, %88 : vector<64x128xf32>
    %c127_i32_16 = arith.constant 127 : i32
    %90 = tpu.dynamic_rotate %81 by %c127_i32_16 dim 1 : vector<64x128xf32>, i32 -> vector<64x128xf32>
    %91 = arith.addf %81, %90 : vector<64x128xf32>
    %c127_i32_17 = arith.constant 127 : i32
    %92 = tpu.dynamic_rotate %83 by %c127_i32_17 dim 1 : vector<64x128xf32>, i32 -> vector<64x128xf32>
    %93 = arith.addf %83, %92 : vector<64x128xf32>
    %c127_i32_18 = arith.constant 127 : i32
    %94 = tpu.dynamic_rotate %85 by %c127_i32_18 dim 1 : vector<64x128xf32>, i32 -> vector<64x128xf32>
    %95 = arith.addf %85, %94 : vector<64x128xf32>
    %c126_i32 = arith.constant 126 : i32
    %96 = tpu.dynamic_rotate %78 by %c126_i32 dim 1 : vector<64x128xf32>, i32 -> vector<64x128xf32>
    %97 = arith.addf %87, %96 : vector<64x128xf32>
    %c126_i32_19 = arith.constant 126 : i32
    %98 = tpu.dynamic_rotate %79 by %c126_i32_19 dim 1 : vector<64x128xf32>, i32 -> vector<64x128xf32>
    %99 = arith.addf %89, %98 : vector<64x128xf32>
    %c126_i32_20 = arith.constant 126 : i32
    %100 = tpu.dynamic_rotate %81 by %c126_i32_20 dim 1 : vector<64x128xf32>, i32 -> vector<64x128xf32>
    %101 = arith.addf %91, %100 : vector<64x128xf32>
    %c126_i32_21 = arith.constant 126 : i32
    %102 = tpu.dynamic_rotate %83 by %c126_i32_21 dim 1 : vector<64x128xf32>, i32 -> vector<64x128xf32>
    %103 = arith.addf %93, %102 : vector<64x128xf32>
    %c126_i32_22 = arith.constant 126 : i32
    %104 = tpu.dynamic_rotate %85 by %c126_i32_22 dim 1 : vector<64x128xf32>, i32 -> vector<64x128xf32>
    %105 = arith.addf %95, %104 : vector<64x128xf32>
    %c125_i32 = arith.constant 125 : i32
    %106 = tpu.dynamic_rotate %78 by %c125_i32 dim 1 : vector<64x128xf32>, i32 -> vector<64x128xf32>
    %107 = arith.addf %97, %106 : vector<64x128xf32>
    %c125_i32_23 = arith.constant 125 : i32
    %108 = tpu.dynamic_rotate %79 by %c125_i32_23 dim 1 : vector<64x128xf32>, i32 -> vector<64x128xf32>
    %109 = arith.addf %99, %108 : vector<64x128xf32>
    %c125_i32_24 = arith.constant 125 : i32
    %110 = tpu.dynamic_rotate %81 by %c125_i32_24 dim 1 : vector<64x128xf32>, i32 -> vector<64x128xf32>
    %111 = arith.addf %101, %110 : vector<64x128xf32>
    %c125_i32_25 = arith.constant 125 : i32
    %112 = tpu.dynamic_rotate %83 by %c125_i32_25 dim 1 : vector<64x128xf32>, i32 -> vector<64x128xf32>
    %113 = arith.addf %103, %112 : vector<64x128xf32>
    %c125_i32_26 = arith.constant 125 : i32
    %114 = tpu.dynamic_rotate %85 by %c125_i32_26 dim 1 : vector<64x128xf32>, i32 -> vector<64x128xf32>
    %115 = arith.addf %105, %114 : vector<64x128xf32>
    %c124_i32 = arith.constant 124 : i32
    %116 = tpu.dynamic_rotate %78 by %c124_i32 dim 1 : vector<64x128xf32>, i32 -> vector<64x128xf32>
    %117 = arith.addf %107, %116 : vector<64x128xf32>
    %c124_i32_27 = arith.constant 124 : i32
    %118 = tpu.dynamic_rotate %79 by %c124_i32_27 dim 1 : vector<64x128xf32>, i32 -> vector<64x128xf32>
    %119 = arith.addf %109, %118 : vector<64x128xf32>
    %c124_i32_28 = arith.constant 124 : i32
    %120 = tpu.dynamic_rotate %81 by %c124_i32_28 dim 1 : vector<64x128xf32>, i32 -> vector<64x128xf32>
    %121 = arith.addf %111, %120 : vector<64x128xf32>
    %c124_i32_29 = arith.constant 124 : i32
    %122 = tpu.dynamic_rotate %83 by %c124_i32_29 dim 1 : vector<64x128xf32>, i32 -> vector<64x128xf32>
    %123 = arith.addf %113, %122 : vector<64x128xf32>
    %c124_i32_30 = arith.constant 124 : i32
    %124 = tpu.dynamic_rotate %85 by %c124_i32_30 dim 1 : vector<64x128xf32>, i32 -> vector<64x128xf32>
    %125 = arith.addf %115, %124 : vector<64x128xf32>
    %c123_i32 = arith.constant 123 : i32
    %126 = tpu.dynamic_rotate %78 by %c123_i32 dim 1 : vector<64x128xf32>, i32 -> vector<64x128xf32>
    %127 = arith.addf %117, %126 : vector<64x128xf32>
    %c123_i32_31 = arith.constant 123 : i32
    %128 = tpu.dynamic_rotate %79 by %c123_i32_31 dim 1 : vector<64x128xf32>, i32 -> vector<64x128xf32>
    %129 = arith.addf %119, %128 : vector<64x128xf32>
    %c123_i32_32 = arith.constant 123 : i32
    %130 = tpu.dynamic_rotate %81 by %c123_i32_32 dim 1 : vector<64x128xf32>, i32 -> vector<64x128xf32>
    %131 = arith.addf %121, %130 : vector<64x128xf32>
    %c123_i32_33 = arith.constant 123 : i32
    %132 = tpu.dynamic_rotate %83 by %c123_i32_33 dim 1 : vector<64x128xf32>, i32 -> vector<64x128xf32>
    %133 = arith.addf %123, %132 : vector<64x128xf32>
    %c123_i32_34 = arith.constant 123 : i32
    %134 = tpu.dynamic_rotate %85 by %c123_i32_34 dim 1 : vector<64x128xf32>, i32 -> vector<64x128xf32>
    %135 = arith.addf %125, %134 : vector<64x128xf32>
    %c122_i32 = arith.constant 122 : i32
    %136 = tpu.dynamic_rotate %78 by %c122_i32 dim 1 : vector<64x128xf32>, i32 -> vector<64x128xf32>
    %137 = arith.addf %127, %136 : vector<64x128xf32>
    %c122_i32_35 = arith.constant 122 : i32
    %138 = tpu.dynamic_rotate %79 by %c122_i32_35 dim 1 : vector<64x128xf32>, i32 -> vector<64x128xf32>
    %139 = arith.addf %129, %138 : vector<64x128xf32>
    %c122_i32_36 = arith.constant 122 : i32
    %140 = tpu.dynamic_rotate %81 by %c122_i32_36 dim 1 : vector<64x128xf32>, i32 -> vector<64x128xf32>
    %141 = arith.addf %131, %140 : vector<64x128xf32>
    %c122_i32_37 = arith.constant 122 : i32
    %142 = tpu.dynamic_rotate %83 by %c122_i32_37 dim 1 : vector<64x128xf32>, i32 -> vector<64x128xf32>
    %143 = arith.addf %133, %142 : vector<64x128xf32>
    %c122_i32_38 = arith.constant 122 : i32
    %144 = tpu.dynamic_rotate %85 by %c122_i32_38 dim 1 : vector<64x128xf32>, i32 -> vector<64x128xf32>
    %145 = arith.addf %135, %144 : vector<64x128xf32>
    %cst_39 = arith.constant 0.0204081628 : f32
    %146 = vector.broadcast %cst_39 : f32 to vector<64x128xf32>
    %147 = arith.mulf %137, %146 : vector<64x128xf32>
    %cst_40 = arith.constant 0.0204081628 : f32
    %148 = vector.broadcast %cst_40 : f32 to vector<64x128xf32>
    %149 = arith.mulf %139, %148 : vector<64x128xf32>
    %cst_41 = arith.constant 0.0204081628 : f32
    %150 = vector.broadcast %cst_41 : f32 to vector<64x128xf32>
    %151 = arith.mulf %141, %150 : vector<64x128xf32>
    %cst_42 = arith.constant 0.0204081628 : f32
    %152 = vector.broadcast %cst_42 : f32 to vector<64x128xf32>
    %153 = arith.mulf %143, %152 : vector<64x128xf32>
    %cst_43 = arith.constant 0.0204081628 : f32
    %154 = vector.broadcast %cst_43 : f32 to vector<64x128xf32>
    %155 = arith.mulf %145, %154 : vector<64x128xf32>
    %156 = arith.mulf %147, %147 : vector<64x128xf32>
    %157 = arith.subf %151, %156 : vector<64x128xf32>
    %cst_44 = arith.constant 1.02083337 : f32
    %158 = vector.broadcast %cst_44 : f32 to vector<64x128xf32>
    %159 = arith.mulf %158, %157 : vector<64x128xf32>
    %160 = arith.mulf %149, %149 : vector<64x128xf32>
    %161 = arith.subf %153, %160 : vector<64x128xf32>
    %cst_45 = arith.constant 1.02083337 : f32
    %162 = vector.broadcast %cst_45 : f32 to vector<64x128xf32>
    %163 = arith.mulf %162, %161 : vector<64x128xf32>
    %164 = arith.mulf %147, %149 : vector<64x128xf32>
    %165 = arith.subf %155, %164 : vector<64x128xf32>
    %cst_46 = arith.constant 1.02083337 : f32
    %166 = vector.broadcast %cst_46 : f32 to vector<64x128xf32>
    %167 = arith.mulf %166, %165 : vector<64x128xf32>
    %cst_47 = arith.constant 2.000000e+00 : f32
    %168 = vector.broadcast %cst_47 : f32 to vector<64x128xf32>
    %169 = arith.mulf %168, %147 : vector<64x128xf32>
    %170 = arith.mulf %169, %149 : vector<64x128xf32>
    %171 = vector.broadcast %20 : f32 to vector<64x128xf32>
    %172 = arith.addf %170, %171 : vector<64x128xf32>
    %cst_48 = arith.constant 2.000000e+00 : f32
    %173 = vector.broadcast %cst_48 : f32 to vector<64x128xf32>
    %174 = arith.mulf %173, %167 : vector<64x128xf32>
    %175 = vector.broadcast %22 : f32 to vector<64x128xf32>
    %176 = arith.addf %174, %175 : vector<64x128xf32>
    %177 = arith.mulf %147, %147 : vector<64x128xf32>
    %178 = arith.mulf %149, %149 : vector<64x128xf32>
    %179 = arith.addf %177, %178 : vector<64x128xf32>
    %180 = vector.broadcast %20 : f32 to vector<64x128xf32>
    %181 = arith.addf %179, %180 : vector<64x128xf32>
    %182 = arith.addf %159, %163 : vector<64x128xf32>
    %183 = vector.broadcast %22 : f32 to vector<64x128xf32>
    %184 = arith.addf %182, %183 : vector<64x128xf32>
    %185 = arith.mulf %172, %176 : vector<64x128xf32>
    %186 = arith.mulf %181, %184 : vector<64x128xf32>
    %187 = arith.divf %185, %186 : vector<64x128xf32>
    %188 = tpu.iota {dimensions = array<i32: 0>} : vector<64x128xi32>
    %189 = tpu.iota {dimensions = array<i32: 1>} : vector<64x128xi32>
    %c58_i32_49 = arith.constant 58 : i32
    %190 = vector.broadcast %c58_i32_49 : i32 to vector<64x128xi32>
    %191 = arith.cmpi slt, %188, %190 : vector<64x128xi32>
    %c122_i32_50 = arith.constant 122 : i32
    %192 = vector.broadcast %c122_i32_50 : i32 to vector<64x128xi32>
    %193 = arith.cmpi slt, %189, %192 : vector<64x128xi32>
    %194 = arith.andi %191, %193 : vector<64x128xi1>
    %cst_51 = arith.constant 0.000000e+00 : f32
    %195 = vector.broadcast %cst_51 : f32 to vector<64x128xf32>
    %196 = arith.select %194, %187, %195 : vector<64x128xi1>, vector<64x128xf32>
    %197 = vector.shape_cast %196 : vector<64x128xf32> to vector<1x64x128xf32>
    %cst_52 = arith.constant dense<0.000000e+00> : vector<1xf32>
    %198 = vector.multi_reduction <add>, %197, %cst_52 [1, 2] : vector<1x64x128xf32> to vector<1xf32>
    %199 = vector.shape_cast %198 : vector<1xf32> to vector<1x1x1xf32>
    %200 = vector.extract %199[0, 0, 0] : f32 from vector<1x1x1xf32>
    %cst_53 = arith.constant 1.41322787E-4 : f32
    %201 = arith.mulf %200, %cst_53 : f32
    %cst_54 = arith.constant 1.000000e+00 : f32
    %202 = arith.subf %cst_54, %201 : f32
    %203 = math.exp %202 : f32
    %204 = arith.mulf %8, %203 : f32
    %c0_55 = arith.constant 0 : index
    %c0_56 = arith.constant 0 : index
    %205 = memref.load %arg2[%c0_55, %c0_56] : memref<1x1xf32, #tpu.memory_space<smem>>
    memref.store %204, %arg2[%c0_55, %c0_56] : memref<1x1xf32, #tpu.memory_space<smem>>
    return
  }
}

</mosaic_0001>

<bundles_post_ra>
// kernel: tpu_custom_call.1
= control target key start
LH: loop header
LB: loop body
LE: loop exit
PB: predicated region body
PF: predicated region fallthrough
CT: control target
= control target key end

     0   :  { %7 = vsyncpa [#allocation3], 0  ;;  %s4591_s0 = inlined_call_operand.hbm [shape: f32[64,128], index: 0, kind: input, shape index: {}]   ;;  %s4592_s1 = inlined_call_operand.hbm [shape: f32[64,128], index: 1, kind: input, shape index: {}]   ;;  %s4593_s2 = inlined_call_operand.hbm [shape: f32[1,1], index: 2, kind: output, shape index: {}]  }
   0x1   :  { %8 = vsyncpa [#allocation6], 0 }
   0x2   :  { %9 = vsyncpa [#allocation4], 0  ;;  %s1849_s9 = smov [#allocation2]  }
   0x3   :  { %s15_s10 = sshll.u32 %s1849_s9, 4  ;;  %s16_s10 = int_to_ptr.vmem [resolvable:$true] %s15_s10 }
   0x4   :  { %s1803_s11 = scalar_lea.vmem %s16_s10, 1024  ;;  %p1808_p1 = scmp.lt.s32.totalorder %s16_s10, %s16_s10 }
   0x5   :  { %p1804_p0 = scmp.ne.s32.totalorder %s16_s10, %s1803_s11  ;;  %p1809_p2 = scmp.lt.s32.totalorder %s1803_s11, %s1803_s11 }
   0x7   :  { %p1810_p3 = por %p1809_p2, %p1808_p1 }
   0x9   :  { %p1811_p4 = pnand %p1810_p3, %p1804_p0 }
   0xb   :  { %1814 = shalt.err (!%p1811_p4)
}
   0xc   :  { %s1850_s12 = smov 128   ;;  %s1851_s13 = smov 8  }
   0xd   :  { %21 = dma.hbm_to_vmem [thread:$0]  %s4591_s0, 1024, %s16_s10, [#allocation3], %s1850_s12, %s1850_s12, %s1851_s13  }
   0xe   :  { %s1852_s16 = smov [#allocation5]  }
   0xf   :  { %s27_s17 = sshll.u32 %s1852_s16, 4  ;;  %s28_s17 = int_to_ptr.vmem [resolvable:$true] %s27_s17 }
  0x10   :  { %s1823_s18 = scalar_lea.vmem %s28_s17, 1024  ;;  %p1828_p6 = scmp.lt.s32.totalorder %s28_s17, %s28_s17 }
  0x11   :  { %p1824_p5 = scmp.ne.s32.totalorder %s28_s17, %s1823_s18  ;;  %p1829_p7 = scmp.lt.s32.totalorder %s1823_s18, %s1823_s18 }
  0x13   :  { %p1830_p8 = por %p1829_p7, %p1828_p6 }
  0x15   :  { %p1831_p9 = pnand %p1830_p8, %p1824_p5 }
  0x17   :  { %1834 = shalt.err (!%p1831_p9)
}
  0x18   :  { %33 = dma.hbm_to_vmem [thread:$0]  %s4592_s1, 1024, %s28_s17, [#allocation6], %s1850_s12, %s1850_s12, %s1851_s13  }
  0x19   :  { %1843 = dma.done.wait [#allocation3], 1024  }
  0x1a   :  { %1844 = vsyncadd [#allocation3], 4294966272 }
  0x1b   :  { %1845 = dma.done.wait [#allocation6], 1024  }
  0x1c   :  { %1846 = vsyncadd [#allocation6], 4294966272  ;;  %v4594_v0 = vlaneseq  ;;  %v1888_v2 = vld [vmem:[#allocation2] sm:$0xff]  ;;  %v1890_v3 = vld [vmem:[#allocation2 + $0x8] sm:$0xff]  ;;  %s1853_s0 = smov 127   ;;  %s1854_s1 = smov 126  }
  0x1d   :  { %4846 = vst [vmem:[#allocation12_spill] sm:$0xff] %v1890_v3  ;;  %v1892_v4 = vld [vmem:[#allocation2 + $0x10] sm:$0xff]  ;;  %v1897_v5 = vld [vmem:[#allocation2 + $0x18] sm:$0xff]  ;;  %v1899_v6 = vld [vmem:[#allocation2 + $0x20] sm:$0xff]  ;;  %s1855_s21 = smov 125   ;;  %s1856_s22 = smov 124  }
  0x1e   :  { %v1883_v1 = vshrl.u32 %v4594_v0, 7  ;;  %4847 = vst [vmem:[#allocation13_spill] sm:$0xff] %v1892_v4  ;;  %4848 = vst [vmem:[#allocation14_spill] sm:$0xff] %v1897_v5  ;;  %v1901_v7 = vld [vmem:[#allocation2 + $0x28] sm:$0xff]  ;;  %v1906_v11 = vld [vmem:[#allocation2 + $0x30] sm:$0xff]  ;;  %v105_v13 = vmin.f32 %v1888_v2, %v1899_v6  ;;  %v89_v15 = vmax.f32 %v1888_v2, %v1899_v6  ;;  %s1857_s23 = smov 123  }
  0x1f   :  { %4849 = vst [vmem:[#allocation15_spill] sm:$0xff] %v1901_v7  ;;  %v1908_v12 = vld [vmem:[#allocation2 + $0x38] sm:$0xff]  ;;  %v106_v14 = vmin.f32 %v1890_v3, %v1901_v7  ;;  %v90_v16 = vmax.f32 %v1890_v3, %v1901_v7  ;;  %v1918_v17 = vld [vmem:[#allocation5 + $0x8] sm:$0xff]  ;;  %v107_v18 = vmin.f32 %v1892_v4, %v1906_v11  ;;  %v91_v20 = vmax.f32 %v1892_v4, %v1906_v11  ;;  %v1928_v22 = vld [vmem:[#allocation5 + $0x10] sm:$0xff]  ;;  %s1858_s24 = smov 122   ;;  %s1860_s13 = smov [#allocation7]  }
  0x20   :  { %4845 = vst [vmem:[#allocation11_spill] sm:$0xff] %v1883_v1  ;;  %vm161_vm0 = vcmp.lt.s32.totalorder %v1883_v1, 7  ;;  %vm258_vm1 = vcmp.lt.s32.totalorder %v1883_v1, 6  ;;  %vm355_vm2 = vcmp.lt.s32.totalorder %v1883_v1, 5  ;;  %vm452_vm3 = vcmp.lt.s32.totalorder %v1883_v1, 4  ;;  %4850 = vst [vmem:[#allocation16_spill] sm:$0xff] %v1908_v12 }
  0x21   :  { %vm549_vm4 = vcmp.lt.s32.totalorder %v1883_v1, 3  ;;  %vm646_vm5 = vcmp.lt.s32.totalorder %v1883_v1, 2  ;;  %4851 = vst [vmem:[#allocation17_spill] sm:$0xff] %v1918_v17  ;;  %v108_v19 = vmin.f32 %v1897_v5, %v1908_v12  ;;  %v92_v21 = vmax.f32 %v1897_v5, %v1908_v12  ;;  %4852 = vst [vmem:[#allocation18_spill] sm:$0xff] %v1928_v22  ;;  %v1941_v35 = vld [vmem:[#allocation5] sm:$0xff]  ;;  %v1970_v52 = vld [vmem:[#allocation5 + $0x18] sm:$0xff] }
  0x22   :  { %v109_v23 = vmin.f32 %v105_v13, %v106_v14  ;;  %v93_v24 = vmax.f32 %v89_v15, %v90_v16  ;;  %v152_v25 = vrot.slane %v1918_v17, 1  ;;  %v153_v26 = vrot.slane %v1928_v22, 1  ;;  %4858 = vst [vmem:[#allocation24_spill] sm:$0xff] %v1970_v52  ;;  %s1859_s29 = smov 1e-12  }
  0x23   :  { %v110_v27 = vmin.f32 %v107_v18, %v108_v19  ;;  %v94_v28 = vmax.f32 %v91_v20, %v92_v21  ;;  %v251_v29 = vrot.slane %v1918_v17, 2  ;;  %v252_v30 = vrot.slane %v1928_v22, 2 }
  0x24   :  { %v1936_v31 = vsel %vm161_vm0, %v152_v25, %v153_v26  ;;  %v348_v32 = vrot.slane %v1918_v17, 3  ;;  %v349_v33 = vrot.slane %v1928_v22, 3  ;;  %v445_v34 = vrot.slane %v1918_v17, 4 }
  0x25   :  { %4853 = vst [vmem:[#allocation19_spill] sm:$0xff] %v1936_v31  ;;  %v111_v36 = vmin.f32 %v109_v23, %v110_v27  ;;  %v95_v37 = vmax.f32 %v93_v24, %v94_v28  ;;  %v187_v38 = vadd.f32 %v1936_v31, %v1918_v17  ;;  %v1947_v39 = vsel %vm258_vm1, %v251_v29, %v252_v30  ;;  %v2029_v24 = vld [vmem:[#allocation5 + $0x20] sm:$0xff] }
  0x26   :  { %4854 = vst [vmem:[#allocation20_spill] sm:$0xff] %v1947_v39  ;;  %v1951_v40 = vsel %vm355_vm2, %v348_v32, %v349_v33  ;;  %v446_v41 = vrot.slane %v1928_v22, 4  ;;  %v542_v42 = vrot.slane %v1918_v17, 5  ;;  %v543_v43 = vrot.slane %v1928_v22, 5  ;;  %4862 = vst [vmem:[#allocation28_spill] sm:$0xff] %v2029_v24 }
  0x27   :  { %4855 = vst [vmem:[#allocation21_spill] sm:$0xff] %v1951_v40  ;;  %112 = vmin.xlane.f32.xlu1 %v111_v36  ;;  %96 = vmax.xlane.f32.xlu0 %v95_v37  ;;  %v284_v44 = vadd.f32 %v1947_v39, %v187_v38  ;;  %v639_v45 = vrot.slane %v1918_v17, 6  ;;  %v640_v46 = vrot.slane %v1928_v22, 6  ;;  %v4600_v47 = vrot.slane %v1941_v35, 1 }
  0x28   :  { %v1962_v48 = vsel %vm452_vm3, %v445_v34, %v446_v41  ;;  %v1966_v49 = vsel %vm549_vm4, %v542_v42, %v543_v43  ;;  %v4599_v50 = vrot.slane %v1941_v35, 2  ;;  %v4598_v51 = vrot.slane %v1941_v35, 3 }
  0x29   :  { %4856 = vst [vmem:[#allocation22_spill] sm:$0xff] %v1962_v48  ;;  %4857 = vst [vmem:[#allocation23_spill] sm:$0xff] %v1966_v49  ;;  %v381_v53 = vadd.f32 %v1951_v40, %v284_v44  ;;  %v1975_v54 = vsel %vm646_vm5, %v639_v45, %v640_v46  ;;  %v1981_v55 = vsel %vm161_vm0, %v4600_v47, %v152_v25  ;;  %v4597_v56 = vrot.slane %v1941_v35, 4 }
  0x2a   :  { %4859 = vst [vmem:[#allocation25_spill] sm:$0xff] %v1975_v54  ;;  %v186_v57 = vadd.f32 %v1981_v55, %v1941_v35  ;;  %v1990_v58 = vsel %vm258_vm1, %v4599_v50, %v251_v29  ;;  %v1996_v59 = vsel %vm355_vm2, %v4598_v51, %v348_v32  ;;  %v4596_v60 = vrot.slane %v1941_v35, 5 }
  0x2b   :  { %v478_v61 = vadd.f32 %v1962_v48, %v381_v53  ;;  %v2004_v62 = vsel %vm452_vm3, %v4597_v56, %v445_v34  ;;  %v4595_v63 = vrot.slane %v1941_v35, 6  ;;  %v154_v13 = vrot.slane %v1970_v52, 1  ;;  %v2065_v53 = vld [vmem:[#allocation5 + $0x28] sm:$0xff]  ;;  %v2115_v56 = vld [vmem:[#allocation5 + $0x38] sm:$0xff] }
  0x2c   :  { %4860 = vst [vmem:[#allocation26_spill] sm:$0xff] %v2004_v62  ;;  %v283_v14 = vadd.f32 %v1990_v58, %v186_v57  ;;  %v2013_v15 = vsel %vm549_vm4, %v4596_v60, %v542_v42  ;;  %v253_v16 = vrot.slane %v1970_v52, 2  ;;  %v350_v18 = vrot.slane %v1970_v52, 3  ;;  %4867 = vst [vmem:[#allocation33_spill] sm:$0xff] %v2065_v53 }
  0x2d   :  { %v575_v19 = vadd.f32 %v1966_v49, %v478_v61  ;;  %v2022_v20 = vsel %vm646_vm5, %v4595_v63, %v639_v45  ;;  %v2026_v21 = vsel %vm161_vm0, %v153_v26, %v154_v13  ;;  %v447_v23 = vrot.slane %v1970_v52, 4  ;;  %4876 = vst [vmem:[#allocation42_spill] sm:$0xff] %v2115_v56 }
  0x2e   :  { %4861 = vst [vmem:[#allocation27_spill] sm:$0xff] %v2026_v21  ;;  %v380_v25 = vadd.f32 %v1996_v59, %v283_v14  ;;  %v188_v27 = vadd.f32 %v2026_v21, %v1928_v22  ;;  %v2036_v28 = vsel %vm258_vm1, %v252_v30, %v253_v16  ;;  %v2040_v29 = vsel %vm355_vm2, %v349_v33, %v350_v18 }
  0x2f   :  { %4863 = vst [vmem:[#allocation29_spill] sm:$0xff] %v2036_v28  ;;  %4864 = vst [vmem:[#allocation30_spill] sm:$0xff] %v2040_v29  ;;  %v2043_v26 = vadd.f32 %v1975_v54, %v575_v19  ;;  %v2047_v32 = vsel %vm452_vm3, %v446_v41, %v447_v23  ;;  %v544_v34 = vrot.slane %v1970_v52, 5  ;;  %v641_v36 = vrot.slane %v1970_v52, 6 }
  0x30   :  { %v477_v37 = vadd.f32 %v2004_v62, %v380_v25  ;;  %v285_v30 = vadd.f32 %v2036_v28, %v188_v27  ;;  %v155_v38 = vrot.slane %v2029_v24, 1  ;;  %v254_v33 = vrot.slane %v2029_v24, 2 }
  0x31   :  { %4865 = vst [vmem:[#allocation31_spill] sm:$0xff] %v2043_v26  ;;  %v2057_v42 = vsel %vm549_vm4, %v543_v43, %v544_v34  ;;  %v2061_v41 = vsel %vm646_vm5, %v640_v46, %v641_v36  ;;  %v351_v44 = vrot.slane %v2029_v24, 3  ;;  %v448_v45 = vrot.slane %v2029_v24, 4 }
  0x32   :  { %4866 = vst [vmem:[#allocation32_spill] sm:$0xff] %v2061_v41  ;;  %v574_v57 = vadd.f32 %v2013_v15, %v477_v37  ;;  %v382_v61 = vadd.f32 %v2040_v29, %v285_v30  ;;  %v2071_v14 = vsel %vm161_vm0, %v154_v13, %v155_v38  ;;  %v2075_v43 = vsel %vm258_vm1, %v253_v16, %v254_v33 }
  0x33   :  { %4868 = vst [vmem:[#allocation34_spill] sm:$0xff] %v2071_v14  ;;  %4869 = vst [vmem:[#allocation35_spill] sm:$0xff] %v2075_v43  ;;  %v189_v46 = vadd.f32 %v2071_v14, %v1970_v52  ;;  %v2081_v19 = vsel %vm355_vm2, %v350_v18, %v351_v44  ;;  %v2085_v25 = vsel %vm452_vm3, %v447_v23, %v448_v45  ;;  %v545_v27 = vrot.slane %v2029_v24, 5 }
  0x34   :  { %4870 = vst [vmem:[#allocation36_spill] sm:$0xff] %v2081_v19  ;;  %4871 = vst [vmem:[#allocation37_spill] sm:$0xff] %v2085_v25  ;;  %v2089_v13 = vadd.f32 %v2022_v20, %v574_v57  ;;  %v479_v37 = vadd.f32 %v2047_v32, %v382_v61  ;;  %v642_v16 = vrot.slane %v2029_v24, 6  ;;  %v4603_v30 = vrot.slane %v2065_v53, 1 }
  0x35   :  { %v286_v0 = vadd.f32 %v2075_v43, %v189_v46  ;;  %v2097_v18 = vsel %vm549_vm4, %v544_v34, %v545_v27  ;;  %v4602_v23 = vrot.slane %v2065_v53, 2  ;;  %v4601_v63 = vrot.slane %v2065_v53, 3  ;;  %v2113_v34 = vld [vmem:[#allocation5 + $0x30] sm:$0xff] }
  0x36   :  { %4872 = vst [vmem:[#allocation38_spill] sm:$0xff] %v2089_v13  ;;  %4873 = vst [vmem:[#allocation39_spill] sm:$0xff] %v2097_v18  ;;  %v576_v60 = vadd.f32 %v2057_v42, %v479_v37  ;;  %v2104_v57 = vsel %vm646_vm5, %v641_v36, %v642_v16  ;;  %v2110_v61 = vsel %vm161_vm0, %v155_v38, %v4603_v30  ;;  %v4604_v46 = vrot.slane %v2065_v53, 4 }
  0x37   :  { %4874 = vst [vmem:[#allocation40_spill] sm:$0xff] %v2104_v57  ;;  %4875 = vst [vmem:[#allocation41_spill] sm:$0xff] %v2110_v61  ;;  %v383_v51 = vadd.f32 %v2081_v19, %v286_v0  ;;  %v190_v37 = vadd.f32 %v2110_v61, %v2029_v24  ;;  %v2124_v36 = vsel %vm258_vm1, %v254_v33, %v4602_v23  ;;  %v4605_v33 = vrot.slane %v2065_v53, 5 }
  0x38   :  { %4877 = vst [vmem:[#allocation43_spill] sm:$0xff] %v2124_v36  ;;  %v2130_v38 = vsel %vm355_vm2, %v351_v44, %v4601_v63  ;;  %735 = vrot.lane.b32.xlu1 %v2089_v13, %s1853_s0  ;;  %v2135_v0 = vadd.f32 %v2061_v41, %v576_v60  ;;  %v2141_v50 = vsel %vm452_vm3, %v448_v45, %v4604_v46  ;;  %v4607_v47 = vrot.slane %v2065_v53, 6 }
  0x39   :  { %4878 = vst [vmem:[#allocation44_spill] sm:$0xff] %v2130_v38  ;;  %v480_v44 = vadd.f32 %v2085_v25, %v383_v51  ;;  %v287_v63 = vadd.f32 %v2124_v36, %v190_v37  ;;  %v4608_v23 = vrot.slane %v2113_v34, 1  ;;  %v4606_v30 = vrot.slane %v2115_v56, 1 }
  0x3a   :  { %4879 = vst [vmem:[#allocation45_spill] sm:$0xff] %v2135_v0  ;;  %v2153_v60 = vsel %vm549_vm4, %v545_v27, %v4605_v33  ;;  %v2159_v45 = vsel %vm646_vm5, %v642_v16, %v4607_v47  ;;  %v4610_v51 = vrot.slane %v2113_v34, 2  ;;  %v4609_v37 = vrot.slane %v2115_v56, 2 }
  0x3b   :  { %4880 = vst [vmem:[#allocation46_spill] sm:$0xff] %v2159_v45  ;;  %v577_v46 = vadd.f32 %v2097_v18, %v480_v44  ;;  %v384_v10 = vadd.f32 %v2130_v38, %v287_v63  ;;  %v2171_v27 = vsel %vm161_vm0, %v4608_v23, %v4606_v30  ;;  %v4615_v44 = vrot.slane %v2115_v56, 3 }
  0x3c   :  { %4881 = vst [vmem:[#allocation47_spill] sm:$0xff] %v2171_v27  ;;  %739 = vrot.lane.b32.xlu1 %v2135_v0, %s1853_s0  ;;  %v192_v16 = vadd.f32 %v2171_v27, %v2113_v34  ;;  %v2184_v63 = vsel %vm258_vm1, %v4610_v51, %v4609_v37  ;;  %v4616_v8 = vrot.slane %v2115_v56, 4  ;;  %v4884_v37 = vrot.slane %v2113_v34, 3 }
  0x3d   :  { %4882 = vst [vmem:[#allocation48_spill] sm:$0xff] %v2184_v63  ;;  %737 = vrot.lane.b32.xlu0 %v2043_v26, %s1853_s0  ;;  %v2191_v47 = vadd.f32 %v2104_v57, %v577_v46  ;;  %v481_v23 = vadd.f32 %v2141_v50, %v384_v10  ;;  %v4621_v30 = vrot.slane %v2115_v56, 5  ;;  %v4886_v9 = vrot.slane %v2113_v34, 4 }
  0x3e   :  { %v289_v33 = vadd.f32 %v2184_v63, %v192_v16  ;;  %v2203_v51 = vsel %vm355_vm2, %v4884_v37, %v4615_v44  ;;  %v4888_v0 = vrot.slane %v1890_v3, 1  ;;  %v4889_v37 = vrot.slane %v1888_v2, 1 }
  0x3f   :  { %4883 = vst [vmem:[#allocation49_spill] sm:$0xff] %v2191_v47  ;;  %4885 = vst [vmem:[#allocation50_spill] sm:$0xff] %v2203_v51  ;;  %v578_v10 = vadd.f32 %v2153_v60, %v481_v23  ;;  %v2214_v16 = vsel %vm452_vm3, %v4886_v9, %v4616_v8  ;;  %v4890_v9 = vrot.slane %v2113_v34, 5  ;;  %v4632_v26 = vrot.slane %v1890_v3, 2 }
  0x40   :  { %4887 = vst [vmem:[#allocation51_spill] sm:$0xff] %v2214_v16  ;;  %v2223_v44 = vsel %vm161_vm0, %v4889_v37, %v4888_v0  ;;  %741 = vrot.lane.b32.xlu1 %v2191_v47, %s1853_s0  ;;  %v386_v23 = vadd.f32 %v2203_v51, %v289_v33  ;;  %v4893_v37 = vrot.slane %v2115_v56, 6  ;;  %v4894_v33 = vrot.slane %v2113_v34, 6 }
  0x41   :  { %v2234_v8 = vsel %vm549_vm4, %v4890_v9, %v4621_v30  ;;  %v194_v46 = vadd.f32 %v2223_v44, %v1888_v2  ;;  %v2240_v0 = vadd.f32 %v2159_v45, %v578_v10  ;;  %v4630_v13 = vrot.slane %v1888_v2, 3 }
  0x42   :  { %4891 = vst [vmem:[#allocation52_spill] sm:$0xff] %v2234_v8  ;;  %v2248_v47 = vsel %vm646_vm5, %v4894_v33, %v4893_v37  ;;  %v4631_v9 = vrot.slane %v1890_v3, 3  ;;  %v483_v30 = vadd.f32 %v2214_v16, %v386_v23  ;;  %v4896_v57 = vrot.slane %v1888_v2, 2 }
  0x43   :  { %4892 = vst [vmem:[#allocation53_spill] sm:$0xff] %v2240_v0  ;;  %4895 = vst [vmem:[#allocation54_spill] sm:$0xff] %v2248_v47  ;;  %v4637_v18 = vrot.slane %v1888_v2, 4  ;;  %v4638_v25 = vrot.slane %v1890_v3, 4  ;;  %v4639_v33 = vrot.slane %v1888_v2, 5  ;;  %v4640_v19 = vrot.slane %v1890_v3, 5 }
  0x44   :  { %v2259_v10 = vsel %vm258_vm1, %v4896_v57, %v4632_v26  ;;  %v2270_v23 = vsel %vm355_vm2, %v4630_v13, %v4631_v9  ;;  %743 = vrot.lane.b32.xlu1 %v2240_v0, %s1853_s0  ;;  %v580_v57 = vadd.f32 %v2234_v8, %v483_v30  ;;  %v4645_v13 = vrot.slane %v1888_v2, 6 }
  0x45   :  { %v291_v37 = vadd.f32 %v2259_v10, %v194_v46  ;;  %v2283_v46 = vsel %vm452_vm3, %v4637_v18, %v4638_v25  ;;  %v4647_v9 = vrot.slane %v1890_v3, 6  ;;  %v2294_v30 = vsel %vm549_vm4, %v4639_v33, %v4640_v19 }
  0x46   :  { %4897 = vst [vmem:[#allocation55_spill] sm:$0xff] %v2294_v30  ;;  %v4648_v0 = vrot.slane %v1892_v4, 1  ;;  %v4646_v43 = vrot.slane %v1897_v5, 1  ;;  %v2299_v18 = vadd.f32 %v2248_v47, %v580_v57  ;;  %v4656_v25 = vrot.slane %v1892_v4, 2 }
  0x47   :  { %v388_v26 = vadd.f32 %v2270_v23, %v291_v37  ;;  %v2307_v37 = vsel %vm646_vm5, %v4645_v13, %v4647_v9  ;;  %v4655_v33 = vrot.slane %v1897_v5, 2  ;;  %v4660_v14 = vrot.slane %v1892_v4, 3 }
  0x48   :  { %4898 = vst [vmem:[#allocation56_spill] sm:$0xff] %v2299_v18  ;;  %4899 = vst [vmem:[#allocation57_spill] sm:$0xff] %v2307_v37  ;;  %v2318_v57 = vsel %vm161_vm0, %v4648_v0, %v4646_v43  ;;  %v4659_v54 = vrot.slane %v1897_v5, 3  ;;  %747 = vrot.lane.b32.xlu1 %v2299_v18, %s1853_s0  ;;  %v4662_v43 = vrot.slane %v1892_v4, 4  ;;  %v4661_v9 = vrot.slane %v1897_v5, 4 }
  0x49   :  { %v485_v19 = vadd.f32 %v2283_v46, %v388_v26  ;;  %4900 = vst [vmem:[#allocation58_spill] sm:$0xff] %v2318_v57  ;;  %v196_v13 = vadd.f32 %v2318_v57, %v1892_v4  ;;  %v2332_v26 = vsel %vm258_vm1, %v4656_v25, %v4655_v33  ;;  %v4664_v49 = vrot.slane %v1892_v4, 5 }
  0x4a   :  { %4901 = vst [vmem:[#allocation59_spill] sm:$0xff] %v2332_v26  ;;  %v2343_v18 = vsel %vm355_vm2, %v4660_v14, %v4659_v54  ;;  %v4663_v48 = vrot.slane %v1897_v5, 5  ;;  %v4670_v25 = vrot.slane %v1892_v4, 6  ;;  %v4669_v40 = vrot.slane %v1897_v5, 6 }
  0x4b   :  { %v582_v0 = vadd.f32 %v2294_v30, %v485_v19  ;;  %4902 = vst [vmem:[#allocation60_spill] sm:$0xff] %v2343_v18  ;;  %v293_v33 = vadd.f32 %v2332_v26, %v196_v13  ;;  %v2354_v19 = vsel %vm452_vm3, %v4662_v43, %v4661_v9  ;;  %v56_v14 = vsub.f32 %v1888_v2, %v1941_v35 }
  0x4c   :  { %v2367_v13 = vsel %vm549_vm4, %v4664_v49, %v4663_v48  ;;  %v57_v9 = vsub.f32 %v1890_v3, %v1918_v17  ;;  %v58_v48 = vsub.f32 %v1892_v4, %v1928_v22  ;;  %v59_v49 = vsub.f32 %v1897_v5, %v1970_v52 }
  0x4d   :  { %v2359_v54 = vadd.f32 %v2307_v37, %v582_v0  ;;  %v390_v43 = vadd.f32 %v2343_v18, %v293_v33  ;;  %v2380_v0 = vsel %vm646_vm5, %v4670_v25, %v4669_v40  ;;  %v60_v33 = vsub.f32 %v1899_v6, %v2029_v24 }
  0x4e   :  { %v61_v39 = vsub.f32 %v1901_v7, %v2065_v53  ;;  %v62_v31 = vsub.f32 %v1906_v11, %v2113_v34  ;;  %v63_v40 = vsub.f32 %v1908_v12, %v2115_v56  ;;  %v64_v17 = vmul.f32 %v56_v14, %v56_v14 }
  0x4f   :  { %4903 = vst [vmem:[#allocation61_spill] sm:$0xff] %v2359_v54  ;;  %759 = vrot.lane.b32.xlu1 %v2359_v54, %s1853_s0  ;;  %v487_v25 = vadd.f32 %v2354_v19, %v390_v43  ;;  %v65_v3 = vmul.f32 %v57_v9, %v57_v9  ;;  %v66_v52 = vmul.f32 %v58_v48, %v58_v48  ;;  %v4710_v30 = vrot.slane %v1899_v6, 1 }
  0x50   :  { %v67_v5 = vmul.f32 %v59_v49, %v59_v49  ;;  %v68_v18 = vmul.f32 %v60_v33, %v60_v33  ;;  %v69_v54 = vmul.f32 %v61_v39, %v61_v39  ;;  %v70_v26 = vmul.f32 %v62_v31, %v62_v31 }
  0x51   :  { %v584_v37 = vadd.f32 %v2367_v13, %v487_v25  ;;  %v71_v57 = vmul.f32 %v63_v40, %v63_v40  ;;  %v72_v4 = vadd.f32 %v65_v3, %v64_v17  ;;  %v4699_v47 = vrot.slane %v1901_v7, 1 }
  0x52   :  { %v4707_v53 = vrot.slane %v1899_v6, 2  ;;  %v4697_v56 = vrot.slane %v1901_v7, 2  ;;  %v4702_v14 = vrot.slane %v1899_v6, 3  ;;  %v4698_v31 = vrot.slane %v1901_v7, 3 }
  0x53   :  { %v2404_v48 = vadd.f32 %v2380_v0, %v584_v37  ;;  %v73_v49 = vadd.f32 %v72_v4, %v66_v52  ;;  %v4701_v39 = vrot.slane %v1899_v6, 4  ;;  %v2414_v3 = vsel %vm161_vm0, %v4710_v30, %v4699_v47 }
  0x54   :  { %v2422_v17 = vsel %vm258_vm1, %v4707_v53, %v4697_v56  ;;  %v4700_v4 = vrot.slane %v1901_v7, 4  ;;  %v4704_v40 = vrot.slane %v1899_v6, 5  ;;  %v198_v43 = vadd.f32 %v2414_v3, %v1899_v6 }
  0x55   :  { %4904 = vst [vmem:[#allocation62_spill] sm:$0xff] %v2404_v48  ;;  %763 = vrot.lane.b32.xlu1 %v2404_v48, %s1853_s0  ;;  %v74_v52 = vadd.f32 %v73_v49, %v67_v5  ;;  %v2436_v25 = vsel %vm355_vm2, %v4702_v14, %v4698_v31  ;;  %v4703_v9 = vrot.slane %v1901_v7, 5  ;;  %v4706_v37 = vrot.slane %v1899_v6, 6 }
  0x56   :  { %v2445_v5 = vsel %vm452_vm3, %v4701_v39, %v4700_v4  ;;  %v4705_v33 = vrot.slane %v1901_v7, 6  ;;  %v4709_v49 = vrot.slane %v1906_v11, 1  ;;  %v295_v31 = vadd.f32 %v2422_v17, %v198_v43 }
  0x57   :  { %v75_v56 = vadd.f32 %v74_v52, %v68_v18  ;;  %v2457_v47 = vsel %vm549_vm4, %v4704_v40, %v4703_v9  ;;  %v4708_v4 = vrot.slane %v1908_v12, 1  ;;  %v4712_v18 = vrot.slane %v1906_v11, 2 }
  0x58   :  { %v2466_v39 = vsel %vm646_vm5, %v4706_v37, %v4705_v33  ;;  %v4711_v52 = vrot.slane %v1908_v12, 2  ;;  %v4714_v43 = vrot.slane %v1906_v11, 3  ;;  %v392_v9 = vadd.f32 %v2436_v25, %v295_v31 }
  0x59   :  { %v76_v14 = vadd.f32 %v75_v56, %v69_v54  ;;  %v2478_v40 = vsel %vm161_vm0, %v4709_v49, %v4708_v4  ;;  %v4713_v33 = vrot.slane %v1908_v12, 3  ;;  %v4718_v56 = vrot.slane %v1906_v11, 4 }
  0x5a   :  { %v200_v37 = vadd.f32 %v2478_v40, %v1906_v11  ;;  %v2489_v54 = vsel %vm258_vm1, %v4712_v18, %v4711_v52  ;;  %v4717_v31 = vrot.slane %v1908_v12, 4  ;;  %v489_v4 = vadd.f32 %v2445_v5, %v392_v9 }
  0x5b   :  { %v77_v53 = vadd.f32 %v76_v14, %v70_v26  ;;  %v2500_v49 = vsel %vm355_vm2, %v4714_v43, %v4713_v33  ;;  %v4721_v14 = vrot.slane %v1908_v12, 5  ;;  %v4723_v9 = vrot.slane %v1906_v11, 6 }
  0x5c   :  { %v297_v52 = vadd.f32 %v2489_v54, %v200_v37  ;;  %v2510_v26 = vsel %vm452_vm3, %v4718_v56, %v4717_v31  ;;  %v586_v33 = vadd.f32 %v2457_v47, %v489_v4  ;;  %v4722_v43 = vrot.slane %v1908_v12, 6 }
  0x5d   :  { %v78_v18 = vadd.f32 %v77_v53, %v71_v57  ;;  %v127_v37 = vmul.f32 %v1941_v35, %v1941_v35  ;;  %v202_v48 = vmul.f32 %v1981_v55, %v1981_v55  ;;  %v299_v31 = vmul.f32 %v1990_v58, %v1990_v58 }
  0x5e   :  { %v394_v30 = vadd.f32 %v2500_v49, %v297_v52  ;;  %v2524_v56 = vadd.f32 %v2466_v39, %v586_v33  ;;  %v4906_v53 = vrot.slane %v1906_v11, 5  ;;  %v135_v4 = vmul.f32 %v1888_v2, %v1888_v2 }
  0x5f   :  { %79 = vadd.xlane.f32.xlu0 %v78_v18  ;;  %v2543_v33 = vsel %vm646_vm5, %v4723_v9, %v4722_v43  ;;  %v210_v18 = vadd.f32 %v202_v48, %v127_v37  ;;  %v396_v7 = vmul.f32 %v1996_v59, %v1996_v59  ;;  %v301_v43 = vmul.f32 %v2036_v28, %v2036_v28 }
  0x60   :  { %4905 = vst [vmem:[#allocation63_spill] sm:$0xff] %v2524_v56  ;;  %v2532_v57 = vsel %vm549_vm4, %v4906_v53, %v4721_v14  ;;  %v491_v52 = vadd.f32 %v2510_v26, %v394_v30  ;;  %767 = vrot.lane.b32.xlu1 %v2524_v56, %s1853_s0  ;;  %v493_v53 = vmul.f32 %v2004_v62, %v2004_v62 }
  0x61   :  { %v129_v30 = vmul.f32 %v1928_v22, %v1928_v22  ;;  %v204_v14 = vmul.f32 %v2026_v21, %v2026_v21  ;;  %v307_v37 = vadd.f32 %v299_v31, %v210_v18  ;;  %v590_v9 = vmul.f32 %v2013_v15, %v2013_v15 }
  0x62   :  { %v588_v48 = vadd.f32 %v2532_v57, %v491_v52  ;;  %v687_v56 = vmul.f32 %v2022_v20, %v2022_v20  ;;  %v398_v62 = vmul.f32 %v2040_v29, %v2040_v29  ;;  %v131_v22 = vmul.f32 %v2029_v24, %v2029_v24 }
  0x63   :  { %v212_v12 = vadd.f32 %v204_v14, %v129_v30  ;;  %v206_v21 = vmul.f32 %v2110_v61, %v2110_v61  ;;  %v404_v31 = vadd.f32 %v396_v7, %v307_v37  ;;  %v495_v52 = vmul.f32 %v2047_v32, %v2047_v32 }
  0x64   :  { %v2569_v28 = vadd.f32 %v2543_v33, %v588_v48  ;;  %v303_v18 = vmul.f32 %v2124_v36, %v2124_v36  ;;  %v592_v30 = vmul.f32 %v2057_v42, %v2057_v42  ;;  %v400_v24 = vmul.f32 %v2130_v38, %v2130_v38 }
  0x65   :  { %v309_v14 = vadd.f32 %v301_v43, %v212_v12  ;;  %v214_v29 = vadd.f32 %v206_v21, %v131_v22  ;;  %v501_v48 = vadd.f32 %v493_v53, %v404_v31  ;;  %v689_v7 = vmul.f32 %v2061_v41, %v2061_v41 }
  0x66   :  { %4907 = vst [vmem:[#allocation64_spill] sm:$0xff] %v2569_v28  ;;  %771 = vrot.lane.b32.xlu1 %v2569_v28, %s1853_s0  ;;  %v133_v37 = vmul.f32 %v2113_v34, %v2113_v34  ;;  %v208_v12 = vmul.f32 %v2171_v27, %v2171_v27  ;;  %v497_v22 = vmul.f32 %v2141_v50, %v2141_v50 }
  0x67   :  { %v406_v43 = vadd.f32 %v398_v62, %v309_v14  ;;  %v311_v36 = vadd.f32 %v303_v18, %v214_v29  ;;  %v305_v21 = vmul.f32 %v2184_v63, %v2184_v63  ;;  %v598_v38 = vadd.f32 %v590_v9, %v501_v48 }
  0x68   :  { %v594_v53 = vmul.f32 %v2153_v60, %v2153_v60  ;;  %v216_v31 = vadd.f32 %v208_v12, %v133_v37  ;;  %v402_v28 = vmul.f32 %v2203_v51, %v2203_v51  ;;  %v691_v62 = vmul.f32 %v2159_v45, %v2159_v45 }
  0x69   :  { %v503_v61 = vadd.f32 %v495_v52, %v406_v43  ;;  %v408_v41 = vadd.f32 %v400_v24, %v311_v36  ;;  %v218_v29 = vmul.f32 %v2223_v44, %v2223_v44  ;;  %v2599_v18 = vadd.f32 %v687_v56, %v598_v38  ;;  %v4910_v43 = vld [vmem:[#allocation33_spill] sm:$0xff] }
  0x6a   :  { %v313_v14 = vadd.f32 %v305_v21, %v216_v31  ;;  %v499_v9 = vmul.f32 %v2214_v16, %v2214_v16  ;;  %v315_v48 = vmul.f32 %v2259_v10, %v2259_v10  ;;  %v412_v24 = vmul.f32 %v2270_v23, %v2270_v23  ;;  %v4914_v31 = vld [vmem:[#allocation54_spill] sm:$0xff] }
  0x6b   :  { %4908 = vst [vmem:[#allocation65_spill] sm:$0xff] %v2599_v18  ;;  %v600_v37 = vadd.f32 %v592_v30, %v503_v61  ;;  %v505_v12 = vadd.f32 %v497_v22, %v408_v41  ;;  %v226_v51 = vadd.f32 %v218_v29, %v135_v4  ;;  %783 = vrot.lane.b32.xlu1 %v2599_v18, %s1853_s0  ;;  %v4909_v52 = vrot.slane %v2113_v34, 1 }
  0x6c   :  { %v410_v36 = vadd.f32 %v402_v28, %v313_v14  ;;  %v596_v38 = vmul.f32 %v2234_v8, %v2234_v8  ;;  %v509_v56 = vmul.f32 %v2283_v46, %v2283_v46  ;;  %v4911_v21 = vrot.slane %v4910_v43, 1 }
  0x6d   :  { %v2621_v61 = vadd.f32 %v689_v7, %v600_v37  ;;  %v602_v4 = vadd.f32 %v594_v53, %v505_v12  ;;  %v323_v30 = vadd.f32 %v315_v48, %v226_v51  ;;  %v693_v29 = vmul.f32 %v4914_v31, %v4914_v31  ;;  %v4921_v48 = vld [vmem:[#allocation55_spill] sm:$0xff] }
  0x6e   :  { %v2619_v41 = vsel %vm161_vm0, %v4911_v21, %v4909_v52  ;;  %v507_v22 = vadd.f32 %v499_v9, %v410_v36  ;;  %v4915_v14 = vrot.slane %v2113_v34, 2  ;;  %v4916_v18 = vrot.slane %v4910_v43, 2 }
  0x6f   :  { %4912 = vst [vmem:[#allocation66_spill] sm:$0xff] %v2619_v41  ;;  %4913 = vst [vmem:[#allocation67_spill] sm:$0xff] %v2621_v61  ;;  %v191_v28 = vadd.f32 %v2619_v41, %v4910_v43  ;;  %v4918_v7 = vrot.slane %v2113_v34, 3  ;;  %v4919_v53 = vrot.slane %v4910_v43, 3  ;;  %v420_v9 = vadd.f32 %v412_v24, %v323_v30  ;;  %787 = vrot.lane.b32.xlu1 %v2621_v61, %s1853_s0  ;;  %v4926_v24 = vld [vmem:[#allocation13_spill] sm:$0xff] }
  0x70   :  { %v2633_v8 = vsel %vm258_vm1, %v4916_v18, %v4915_v14  ;;  %v606_v37 = vmul.f32 %v4921_v48, %v4921_v48  ;;  %v4922_v36 = vrot.slane %v2113_v34, 4  ;;  %v4923_v52 = vrot.slane %v4910_v43, 4 }
  0x71   :  { %4917 = vst [vmem:[#allocation68_spill] sm:$0xff] %v2633_v8  ;;  %v2641_v51 = vsel %vm355_vm2, %v4919_v53, %v4918_v7  ;;  %v288_v12 = vadd.f32 %v2633_v8, %v191_v28  ;;  %v2656_v21 = vadd.f32 %v691_v62, %v602_v4  ;;  %v604_v14 = vadd.f32 %v596_v38, %v507_v22  ;;  %v4927_v7 = vld [vmem:[#allocation58_spill] sm:$0xff]  ;;  %v4928_v8 = vld [vmem:[#allocation57_spill] sm:$0xff] }
  0x72   :  { %4920 = vst [vmem:[#allocation69_spill] sm:$0xff] %v2641_v51  ;;  %v2652_v18 = vsel %vm452_vm3, %v4923_v52, %v4922_v36  ;;  %v137_v30 = vmul.f32 %v4926_v24, %v4926_v24  ;;  %v220_v28 = vmul.f32 %v4927_v7, %v4927_v7  ;;  %v517_v53 = vadd.f32 %v509_v56, %v420_v9  ;;  %v4929_v36 = vld [vmem:[#allocation59_spill] sm:$0xff] }
  0x73   :  { %4924 = vst [vmem:[#allocation55_spill] sm:$0xff] %v2652_v18  ;;  %4925 = vst [vmem:[#allocation70_spill] sm:$0xff] %v2656_v21  ;;  %v703_v41 = vmul.f32 %v4928_v8, %v4928_v8  ;;  %v385_v31 = vadd.f32 %v2641_v51, %v288_v12  ;;  %v317_v52 = vmul.f32 %v4929_v36, %v4929_v36  ;;  %v4930_v61 = vrot.slane %v2113_v34, 5  ;;  %v4936_v12 = vld [vmem:[#allocation60_spill] sm:$0xff] }
  0x74   :  { %v4931_v62 = vrot.slane %v4910_v43, 5  ;;  %v4933_v4 = vrot.slane %v2113_v34, 6  ;;  %v4934_v56 = vrot.slane %v4910_v43, 6  ;;  %v228_v9 = vadd.f32 %v220_v28, %v137_v30  ;;  %791 = vrot.lane.b32.xlu1 %v2656_v21, %s1853_s0 }
  0x75   :  { %v414_v51 = vmul.f32 %v4936_v12, %v4936_v12  ;;  %v2685_v16 = vadd.f32 %v693_v29, %v604_v14  ;;  %v614_v63 = vadd.f32 %v606_v37, %v517_v53  ;;  %v482_v27 = vadd.f32 %v2652_v18, %v385_v31 }
  0x76   :  { %v2673_v38 = vsel %vm549_vm4, %v4931_v62, %v4930_v61  ;;  %v2681_v22 = vsel %vm646_vm5, %v4934_v56, %v4933_v4  ;;  %v4938_v61 = vrot.slane %v1941_v35, 1  ;;  %v4939_v62 = vld [vmem:[#allocation42_spill] sm:$0xff]  ;;  %v325_v30 = vadd.f32 %v317_v52, %v228_v9 }
  0x77   :  { %4932 = vst [vmem:[#allocation13_spill] sm:$0xff] %v2673_v38  ;;  %4935 = vst [vmem:[#allocation58_spill] sm:$0xff] %v2681_v22  ;;  %v4940_v45 = vrot.slane %v4939_v62, 1  ;;  %v511_v28 = vmul.f32 %v2354_v19, %v2354_v19  ;;  %v4942_v31 = vrot.slane %v1941_v35, 2  ;;  %v4943_v37 = vrot.slane %v4939_v62, 2 }
  0x78   :  { %4937 = vst [vmem:[#allocation57_spill] sm:$0xff] %v2685_v16  ;;  %v608_v53 = vmul.f32 %v2367_v13, %v2367_v13  ;;  %v705_v52 = vmul.f32 %v2380_v0, %v2380_v0  ;;  %v4945_v4 = vrot.slane %v1941_v35, 3  ;;  %v4946_v56 = vrot.slane %v4939_v62, 3  ;;  %795 = vrot.lane.b32.xlu1 %v2685_v16, %s1853_s0  ;;  %v4960_v16 = vld [vmem:[#allocation12_spill] sm:$0xff] }
  0x79   :  { %v2694_v43 = vsel %vm161_vm0, %v4940_v45, %v4938_v61  ;;  %v2708_v14 = vsel %vm258_vm1, %v4943_v37, %v4942_v31  ;;  %v579_v45 = vadd.f32 %v2673_v38, %v482_v27  ;;  %v2723_v61 = vadd.f32 %v703_v41, %v614_v63 }
  0x7a   :  { %4941 = vst [vmem:[#allocation59_spill] sm:$0xff] %v2694_v43  ;;  %v193_v29 = vadd.f32 %v2694_v43, %v4939_v62  ;;  %4944 = vst [vmem:[#allocation60_spill] sm:$0xff] %v2708_v14  ;;  %v2721_v9 = vsel %vm355_vm2, %v4946_v56, %v4945_v4  ;;  %v422_v31 = vadd.f32 %v414_v51, %v325_v30  ;;  %v4950_v38 = vrot.slane %v1941_v35, 4 }
  0x7b   :  { %4947 = vst [vmem:[#allocation71_spill] sm:$0xff] %v2721_v9  ;;  %4948 = vst [vmem:[#allocation72_spill] sm:$0xff] %v2723_v61  ;;  %v139_v27 = vmul.f32 %v1899_v6, %v1899_v6  ;;  %v2729_v21 = vadd.f32 %v2681_v22, %v579_v45  ;;  %v4951_v43 = vrot.slane %v4939_v62, 4  ;;  %v222_v63 = vmul.f32 %v2414_v3, %v2414_v3 }
  0x7c   :  { %v290_v37 = vadd.f32 %v2708_v14, %v193_v29  ;;  %v319_v41 = vmul.f32 %v2422_v17, %v2422_v17  ;;  %v519_v51 = vadd.f32 %v511_v28, %v422_v31  ;;  %v4953_v29 = vrot.slane %v1941_v35, 5  ;;  %807 = vrot.lane.b32.xlu1 %v2723_v61, %s1853_s0 }
  0x7d   :  { %4949 = vst [vmem:[#allocation73_spill] sm:$0xff] %v2729_v21  ;;  %v2737_v18 = vsel %vm452_vm3, %v4951_v43, %v4950_v38  ;;  %v4954_v45 = vrot.slane %v4939_v62, 5  ;;  %v4956_v38 = vrot.slane %v1941_v35, 6  ;;  %v4957_v4 = vrot.slane %v4939_v62, 6  ;;  %745 = vrot.lane.b32.xlu0 %v2729_v21, %s1853_s0 }
  0x7e   :  { %4952 = vst [vmem:[#allocation74_spill] sm:$0xff] %v2737_v18  ;;  %v387_v30 = vadd.f32 %v2721_v9, %v290_v37  ;;  %v230_v28 = vadd.f32 %v222_v63, %v139_v27  ;;  %v416_v31 = vmul.f32 %v2436_v25, %v2436_v25  ;;  %v4959_v37 = vrot.slane %v4926_v24, 1 }
  0x7f   :  { %v2752_v43 = vsel %vm549_vm4, %v4954_v45, %v4953_v29  ;;  %v2760_v56 = vsel %vm646_vm5, %v4957_v4, %v4956_v38  ;;  %v4961_v29 = vrot.slane %v4960_v16, 1  ;;  %v4963_v9 = vrot.slane %v4926_v24, 2 }
  0x80   :  { %4955 = vst [vmem:[#allocation75_spill] sm:$0xff] %v2752_v43  ;;  %4958 = vst [vmem:[#allocation76_spill] sm:$0xff] %v2760_v56  ;;  %v4964_v38 = vrot.slane %v4960_v16, 2  ;;  %v616_v27 = vadd.f32 %v608_v53, %v519_v51  ;;  %v484_v63 = vadd.f32 %v2737_v18, %v387_v30  ;;  %v513_v21 = vmul.f32 %v2445_v5, %v2445_v5 }
  0x81   :  { %v2772_v45 = vsel %vm161_vm0, %v4961_v29, %v4959_v37  ;;  %v327_v14 = vadd.f32 %v319_v41, %v230_v28  ;;  %v610_v37 = vmul.f32 %v2457_v47, %v2457_v47  ;;  %v707_v29 = vmul.f32 %v2466_v39, %v2466_v39 }
  0x82   :  { %4962 = vst [vmem:[#allocation12_spill] sm:$0xff] %v2772_v45  ;;  %v2780_v4 = vsel %vm258_vm1, %v4964_v38, %v4963_v9  ;;  %v195_v22 = vadd.f32 %v2772_v45, %v4960_v16  ;;  %v4966_v62 = vrot.slane %v4926_v24, 3  ;;  %v4967_v9 = vrot.slane %v4960_v16, 3 }
  0x83   :  { %4965 = vst [vmem:[#allocation77_spill] sm:$0xff] %v2780_v4  ;;  %v2801_v51 = vadd.f32 %v705_v52, %v616_v27  ;;  %v581_v41 = vadd.f32 %v2752_v43, %v484_v63  ;;  %v141_v28 = vmul.f32 %v1906_v11, %v1906_v11  ;;  %v424_v38 = vadd.f32 %v416_v31, %v327_v14  ;;  %v4978_v43 = vld [vmem:[#allocation14_spill] sm:$0xff] }
  0x84   :  { %v2797_v53 = vsel %vm355_vm2, %v4967_v9, %v4966_v62  ;;  %v292_v30 = vadd.f32 %v2780_v4, %v195_v22  ;;  %v4970_v18 = vrot.slane %v4926_v24, 4  ;;  %v4971_v45 = vrot.slane %v4960_v16, 4 }
  0x85   :  { %4968 = vst [vmem:[#allocation78_spill] sm:$0xff] %v2797_v53  ;;  %4969 = vst [vmem:[#allocation79_spill] sm:$0xff] %v2801_v51  ;;  %v224_v52 = vmul.f32 %v2478_v40, %v2478_v40  ;;  %v321_v27 = vmul.f32 %v2489_v54, %v2489_v54  ;;  %v2820_v22 = vadd.f32 %v2760_v56, %v581_v41  ;;  %v4973_v14 = vrot.slane %v4926_v24, 5 }
  0x86   :  { %v2813_v62 = vsel %vm452_vm3, %v4971_v45, %v4970_v18  ;;  %v389_v63 = vadd.f32 %v2797_v53, %v292_v30  ;;  %v4974_v31 = vrot.slane %v4960_v16, 5  ;;  %v4975_v18 = vrot.slane %v4926_v24, 6  ;;  %811 = vrot.lane.b32.xlu1 %v2801_v51, %s1853_s0 }
  0x87   :  { %4972 = vst [vmem:[#allocation80_spill] sm:$0xff] %v2820_v22  ;;  %v4976_v45 = vrot.slane %v4960_v16, 6  ;;  %v521_v41 = vadd.f32 %v513_v21, %v424_v38  ;;  %v232_v56 = vadd.f32 %v224_v52, %v141_v28  ;;  %v418_v30 = vmul.f32 %v2500_v49, %v2500_v49  ;;  %749 = vrot.lane.b32.xlu0 %v2820_v22, %s1853_s0 }
  0x88   :  { %v2829_v9 = vsel %vm549_vm4, %v4974_v31, %v4973_v14  ;;  %v4977_v53 = vrot.slane %v1899_v6, 1  ;;  %v4979_v4 = vrot.slane %v4978_v43, 1  ;;  %v486_v16 = vadd.f32 %v2813_v62, %v389_v63 }
  0x89   :  { %v2837_v61 = vsel %vm646_vm5, %v4976_v45, %v4975_v18  ;;  %v4980_v28 = vrot.slane %v1899_v6, 2  ;;  %v4981_v38 = vrot.slane %v4978_v43, 2  ;;  %v515_v31 = vmul.f32 %v2510_v26, %v2510_v26 }
  0x8a   :  { %v2847_v14 = vsel %vm161_vm0, %v4979_v4, %v4977_v53  ;;  %v618_v4 = vadd.f32 %v610_v37, %v521_v41  ;;  %v329_v53 = vadd.f32 %v321_v27, %v232_v56  ;;  %v4983_v18 = vrot.slane %v1899_v6, 3 }
  0x8b   :  { %v197_v21 = vadd.f32 %v2847_v14, %v4978_v43  ;;  %v2862_v52 = vsel %vm258_vm1, %v4981_v38, %v4980_v28  ;;  %v4984_v63 = vrot.slane %v4978_v43, 3  ;;  %v583_v22 = vadd.f32 %v2829_v9, %v486_v16 }
  0x8c   :  { %4982 = vst [vmem:[#allocation14_spill] sm:$0xff] %v2862_v52  ;;  %v612_v51 = vmul.f32 %v2532_v57, %v2532_v57  ;;  %v4985_v56 = vrot.slane %v1899_v6, 4  ;;  %v4986_v37 = vrot.slane %v4978_v43, 4  ;;  %v2886_v41 = vadd.f32 %v707_v29, %v618_v4 }
  0x8d   :  { %v2872_v45 = vsel %vm355_vm2, %v4984_v63, %v4983_v18  ;;  %v294_v28 = vadd.f32 %v2862_v52, %v197_v21  ;;  %v426_v38 = vadd.f32 %v418_v30, %v329_v53  ;;  %v143_v18 = vmul.f32 %v1888_v2, %v1941_v35 }
  0x8e   :  { %v2884_v27 = vsel %vm452_vm3, %v4986_v37, %v4985_v56  ;;  %4987 = vst [vmem:[#allocation81_spill] sm:$0xff] %v2886_v41  ;;  %v234_v16 = vmul.f32 %v2223_v44, %v1981_v55  ;;  %v2893_v63 = vadd.f32 %v2837_v61, %v583_v22  ;;  %v709_v21 = vmul.f32 %v2543_v33, %v2543_v33 }
  0x8f   :  { %v391_v52 = vadd.f32 %v2872_v45, %v294_v28  ;;  %v331_v56 = vmul.f32 %v2259_v10, %v1990_v58  ;;  %815 = vrot.lane.b32.xlu1 %v2886_v41, %s1853_s0  ;;  %v523_v29 = vadd.f32 %v515_v31, %v426_v38  ;;  %v4989_v35 = vrot.slane %v1899_v6, 5  ;;  %v4994_v28 = vld [vmem:[#allocation15_spill] sm:$0xff]  ;;  %v5071_v41 = vld [vmem:[#allocation77_spill] sm:$0xff] }
  0x90   :  { %4988 = vst [vmem:[#allocation82_spill] sm:$0xff] %v2893_v63  ;;  %v4990_v30 = vrot.slane %v4978_v43, 5  ;;  %v242_v44 = vadd.f32 %v234_v16, %v143_v18  ;;  %v428_v22 = vmul.f32 %v2270_v23, %v1996_v59  ;;  %761 = vrot.lane.b32.xlu0 %v2893_v63, %s1853_s0  ;;  %v4991_v10 = vrot.slane %v1899_v6, 6  ;;  %v4998_v16 = vld [vmem:[#allocation26_spill] sm:$0xff]  ;;  %v3167_v63 = vld [vmem:[#allocation2 + $0x8] sm:$0xff] }
  0x91   :  { %v488_v58 = vadd.f32 %v2884_v27, %v391_v52  ;;  %v4992_v4 = vrot.slane %v4978_v43, 6  ;;  %v4993_v31 = vrot.slane %v1906_v11, 1  ;;  %v4995_v37 = vrot.slane %v4994_v28, 1 }
  0x92   :  { %v2908_v55 = vsel %vm549_vm4, %v4990_v30, %v4989_v35  ;;  %v4996_v23 = vrot.slane %v1906_v11, 2  ;;  %v4997_v52 = vrot.slane %v4994_v28, 2  ;;  %v620_v43 = vadd.f32 %v612_v51, %v523_v29 }
  0x93   :  { %v2921_v53 = vsel %vm646_vm5, %v4992_v4, %v4991_v10  ;;  %v2929_v59 = vsel %vm161_vm0, %v4995_v37, %v4993_v31  ;;  %v339_v18 = vadd.f32 %v331_v56, %v242_v44  ;;  %v525_v35 = vmul.f32 %v2283_v46, %v4998_v16  ;;  %v5002_v44 = vld [vmem:[#allocation18_spill] sm:$0xff] }
  0x94   :  { %v2937_v38 = vsel %vm258_vm1, %v4997_v52, %v4996_v23  ;;  %v199_v30 = vadd.f32 %v2929_v59, %v4994_v28  ;;  %v585_v10 = vadd.f32 %v2908_v55, %v488_v58  ;;  %v622_v4 = vmul.f32 %v4921_v48, %v2013_v15  ;;  %v5006_v52 = vld [vmem:[#allocation27_spill] sm:$0xff] }
  0x95   :  { %v719_v31 = vmul.f32 %v4928_v8, %v2022_v20  ;;  %v4999_v37 = vrot.slane %v1906_v11, 3  ;;  %v5000_v23 = vrot.slane %v4994_v28, 3  ;;  %v2956_v46 = vadd.f32 %v709_v21, %v620_v43 }
  0x96   :  { %v436_v56 = vadd.f32 %v428_v22, %v339_v18  ;;  %v296_v29 = vadd.f32 %v2937_v38, %v199_v30  ;;  %v145_v58 = vmul.f32 %v4926_v24, %v5002_v44  ;;  %v2962_v15 = vadd.f32 %v2921_v53, %v585_v10  ;;  %v5007_v22 = vld [vmem:[#allocation29_spill] sm:$0xff]  ;;  %v5014_v44 = vld [vmem:[#allocation16_spill] sm:$0xff] }
  0x97   :  { %v2954_v51 = vsel %vm355_vm2, %v5000_v23, %v4999_v37  ;;  %5001 = vst [vmem:[#allocation15_spill] sm:$0xff] %v2956_v46  ;;  %v5004_v8 = vrot.slane %v1906_v11, 4  ;;  %v5005_v20 = vrot.slane %v4994_v28, 4  ;;  %v236_v21 = vmul.f32 %v4927_v7, %v5006_v52  ;;  %819 = vrot.lane.b32.xlu1 %v2956_v46, %s1853_s0  ;;  %v5012_v23 = vld [vmem:[#allocation30_spill] sm:$0xff] }
  0x98   :  { %5003 = vst [vmem:[#allocation26_spill] sm:$0xff] %v2962_v15  ;;  %v333_v43 = vmul.f32 %v4929_v36, %v5007_v22  ;;  %v533_v24 = vadd.f32 %v525_v35, %v436_v56  ;;  %v393_v18 = vadd.f32 %v2954_v51, %v296_v29  ;;  %v5008_v16 = vrot.slane %v1906_v11, 5  ;;  %765 = vrot.lane.b32.xlu0 %v2962_v15, %s1853_s0 }
  0x99   :  { %v2970_v48 = vsel %vm452_vm3, %v5005_v20, %v5004_v8  ;;  %v5009_v30 = vrot.slane %v4994_v28, 5  ;;  %v5010_v37 = vrot.slane %v1906_v11, 6  ;;  %v5011_v7 = vrot.slane %v4994_v28, 6 }
  0x9a   :  { %v244_v35 = vadd.f32 %v236_v21, %v145_v58  ;;  %v430_v56 = vmul.f32 %v4936_v12, %v5012_v23  ;;  %v5013_v29 = vrot.slane %v1888_v2, 1  ;;  %v5015_v8 = vrot.slane %v5014_v44, 1 }
  0x9b   :  { %v2985_v10 = vsel %vm549_vm4, %v5009_v30, %v5008_v16  ;;  %v2993_v36 = vsel %vm646_vm5, %v5011_v7, %v5010_v37  ;;  %v5016_v28 = vrot.slane %v1888_v2, 2  ;;  %v5017_v52 = vrot.slane %v5014_v44, 2  ;;  %v5018_v7 = vld [vmem:[#allocation32_spill] sm:$0xff] }
  0x9c   :  { %v3005_v20 = vsel %vm161_vm0, %v5015_v8, %v5013_v29  ;;  %v630_v58 = vadd.f32 %v622_v4, %v533_v24  ;;  %v490_v21 = vadd.f32 %v2970_v48, %v393_v18  ;;  %v527_v12 = vmul.f32 %v2354_v19, %v2047_v32 }
  0x9d   :  { %v3013_v22 = vsel %vm258_vm1, %v5017_v52, %v5016_v28  ;;  %v201_v16 = vadd.f32 %v3005_v20, %v5014_v44  ;;  %v341_v30 = vadd.f32 %v333_v43, %v244_v35  ;;  %v624_v37 = vmul.f32 %v2367_v13, %v2057_v42  ;;  %v5022_v43 = vld [vmem:[#allocation28_spill] sm:$0xff]  ;;  %v5025_v28 = vld [vmem:[#allocation41_spill] sm:$0xff]  ;;  %v5026_v52 = vld [vmem:[#allocation43_spill] sm:$0xff] }
  0x9e   :  { %v721_v23 = vmul.f32 %v2380_v0, %v5018_v7  ;;  %v5019_v29 = vrot.slane %v1888_v2, 3  ;;  %v5020_v8 = vrot.slane %v5014_v44, 3  ;;  %v3032_v24 = vadd.f32 %v719_v31, %v630_v58 }
  0x9f   :  { %v587_v32 = vadd.f32 %v2985_v10, %v490_v21  ;;  %v298_v19 = vadd.f32 %v3013_v22, %v201_v16  ;;  %v147_v42 = vmul.f32 %v1899_v6, %v5022_v43  ;;  %v438_v13 = vadd.f32 %v430_v56, %v341_v30  ;;  %v5033_v43 = vld [vmem:[#allocation17_spill] sm:$0xff] }
  0xa0   :  { %v3030_v4 = vsel %vm355_vm2, %v5020_v8, %v5019_v29  ;;  %5021 = vst [vmem:[#allocation18_spill] sm:$0xff] %v3032_v24  ;;  %v5023_v0 = vrot.slane %v1888_v2, 4  ;;  %v5024_v18 = vrot.slane %v5014_v44, 4  ;;  %v238_v31 = vmul.f32 %v2414_v3, %v5025_v28  ;;  %831 = vrot.lane.b32.xlu1 %v3032_v24, %s1853_s0  ;;  %v5067_v24 = vld [vmem:[#allocation58_spill] sm:$0xff] }
  0xa1   :  { %v335_v58 = vmul.f32 %v2422_v17, %v5026_v52  ;;  %v3053_v6 = vadd.f32 %v2993_v36, %v587_v32  ;;  %v395_v56 = vadd.f32 %v3030_v4, %v298_v19  ;;  %v5028_v21 = vrot.slane %v1888_v2, 5  ;;  %v5032_v32 = vld [vmem:[#allocation44_spill] sm:$0xff] }
  0xa2   :  { %v3044_v35 = vsel %vm452_vm3, %v5024_v18, %v5023_v0  ;;  %v5029_v16 = vrot.slane %v5014_v44, 5  ;;  %v5030_v3 = vrot.slane %v1888_v2, 6  ;;  %v5031_v17 = vrot.slane %v5014_v44, 6  ;;  %v5034_v44 = vld [vmem:[#allocation19_spill] sm:$0xff]  ;;  %v5035_v52 = vld [vmem:[#allocation20_spill] sm:$0xff] }
  0xa3   :  { %5027 = vst [vmem:[#allocation27_spill] sm:$0xff] %v3053_v6  ;;  %v535_v29 = vadd.f32 %v527_v12, %v438_v13  ;;  %v246_v8 = vadd.f32 %v238_v31, %v147_v42  ;;  %v432_v19 = vmul.f32 %v2436_v25, %v5032_v32  ;;  %v128_v0 = vmul.f32 %v5033_v43, %v5033_v43  ;;  %v5036_v31 = vld [vmem:[#allocation46_spill] sm:$0xff] }
  0xa4   :  { %v3062_v30 = vsel %vm549_vm4, %v5029_v16, %v5028_v21  ;;  %v3070_v7 = vsel %vm646_vm5, %v5031_v17, %v5030_v3  ;;  %769 = vrot.lane.b32.xlu0 %v3053_v6, %s1853_s0  ;;  %v492_v18 = vadd.f32 %v3044_v35, %v395_v56  ;;  %v529_v2 = vmul.f32 %v2445_v5, %v2141_v50  ;;  %v5037_v3 = vld [vmem:[#allocation21_spill] sm:$0xff] }
  0xa5   :  { %v203_v28 = vmul.f32 %v5034_v44, %v5034_v44  ;;  %v300_v12 = vmul.f32 %v5035_v52, %v5035_v52  ;;  %v632_v42 = vadd.f32 %v624_v37, %v535_v29  ;;  %v343_v13 = vadd.f32 %v335_v58, %v246_v8  ;;  %v5039_v37 = vld [vmem:[#allocation47_spill] sm:$0xff]  ;;  %v5040_v29 = vld [vmem:[#allocation48_spill] sm:$0xff]  ;;  %v5042_v8 = vld [vmem:[#allocation22_spill] sm:$0xff] }
  0xa6   :  { %v626_v25 = vmul.f32 %v2457_v47, %v2153_v60  ;;  %v723_v21 = vmul.f32 %v2466_v39, %v5036_v31  ;;  %v589_v16 = vadd.f32 %v3062_v30, %v492_v18  ;;  %v397_v50 = vmul.f32 %v5037_v3, %v5037_v3  ;;  %v5054_v6 = vld [vmem:[#allocation33_spill] sm:$0xff] }
  0xa7   :  { %v211_v56 = vadd.f32 %v203_v28, %v128_v0  ;;  %v149_v5 = vmul.f32 %v1906_v11, %v2113_v34  ;;  %v3094_v17 = vadd.f32 %v721_v23, %v632_v42  ;;  %v440_v32 = vadd.f32 %v432_v19, %v343_v13  ;;  %v5043_v0 = vld [vmem:[#allocation23_spill] sm:$0xff]  ;;  %v5044_v34 = vld [vmem:[#allocation25_spill] sm:$0xff]  ;;  %v5045_v19 = vld [vmem:[#allocation50_spill] sm:$0xff] }
  0xa8   :  { %v240_v58 = vmul.f32 %v2478_v40, %v5039_v37  ;;  %v337_v47 = vmul.f32 %v2489_v54, %v5040_v29  ;;  %v3101_v60 = vadd.f32 %v3070_v7, %v589_v16  ;;  %v494_v43 = vmul.f32 %v5042_v8, %v5042_v8  ;;  %v5047_v13 = vld [vmem:[#allocation34_spill] sm:$0xff]  ;;  %v5048_v16 = vld [vmem:[#allocation35_spill] sm:$0xff] }
  0xa9   :  { %5038 = vst [vmem:[#allocation29_spill] sm:$0xff] %v3094_v17  ;;  %v308_v39 = vadd.f32 %v300_v12, %v211_v56  ;;  %v591_v18 = vmul.f32 %v5043_v0, %v5043_v0  ;;  %835 = vrot.lane.b32.xlu1 %v3094_v17, %s1853_s0  ;;  %v537_v11 = vadd.f32 %v529_v2, %v440_v32  ;;  %v5046_v12 = vld [vmem:[#allocation24_spill] sm:$0xff]  ;;  %v5049_v37 = vld [vmem:[#allocation51_spill] sm:$0xff] }
  0xaa   :  { %5041 = vst [vmem:[#allocation30_spill] sm:$0xff] %v3101_v60  ;;  %v688_v40 = vmul.f32 %v5044_v34, %v5044_v34  ;;  %v248_v23 = vadd.f32 %v240_v58, %v149_v5  ;;  %v434_v54 = vmul.f32 %v2500_v49, %v5045_v19  ;;  %773 = vrot.lane.b32.xlu0 %v3101_v60, %s1853_s0  ;;  %v5050_v58 = vld [vmem:[#allocation52_spill] sm:$0xff]  ;;  %v5051_v19 = vld [vmem:[#allocation54_spill] sm:$0xff] }
  0xab   :  { %v405_v28 = vadd.f32 %v397_v50, %v308_v39  ;;  %v130_v42 = vmul.f32 %v5046_v12, %v5046_v12  ;;  %v205_v31 = vmul.f32 %v5047_v13, %v5047_v13  ;;  %v302_v2 = vmul.f32 %v5048_v16, %v5048_v16  ;;  %v5052_v12 = vld [vmem:[#allocation36_spill] sm:$0xff] }
  0xac   :  { %v634_v56 = vadd.f32 %v626_v25, %v537_v11  ;;  %v345_v32 = vadd.f32 %v337_v47, %v248_v23  ;;  %v531_v5 = vmul.f32 %v2510_v26, %v5049_v37  ;;  %v628_v49 = vmul.f32 %v2532_v57, %v5050_v58  ;;  %v5055_v47 = vld [vmem:[#allocation66_spill] sm:$0xff]  ;;  %v5056_v57 = vld [vmem:[#allocation37_spill] sm:$0xff] }
  0xad   :  { %v502_v29 = vadd.f32 %v494_v43, %v405_v28  ;;  %v725_v50 = vmul.f32 %v2543_v33, %v5051_v19  ;;  %v213_v39 = vadd.f32 %v205_v31, %v130_v42  ;;  %v399_v1 = vmul.f32 %v5052_v12, %v5052_v12  ;;  %v5057_v28 = vld [vmem:[#allocation68_spill] sm:$0xff]  ;;  %v5058_v42 = vld [vmem:[#allocation39_spill] sm:$0xff]  ;;  %v5062_v58 = vld [vmem:[#allocation42_spill] sm:$0xff] }
  0xae   :  { %v3129_v60 = vadd.f32 %v723_v21, %v634_v56  ;;  %v442_v17 = vadd.f32 %v434_v54, %v345_v32  ;;  %v132_v25 = vmul.f32 %v5054_v6, %v5054_v6  ;;  %v207_v26 = vmul.f32 %v5055_v47, %v5055_v47  ;;  %v5059_v6 = vld [vmem:[#allocation69_spill] sm:$0xff] }
  0xaf   :  { %v599_v11 = vadd.f32 %v591_v18, %v502_v29  ;;  %v310_v23 = vadd.f32 %v302_v2, %v213_v39  ;;  %v496_v43 = vmul.f32 %v5056_v57, %v5056_v57  ;;  %v304_v33 = vmul.f32 %v5057_v28, %v5057_v28  ;;  %v5061_v2 = vld [vmem:[#allocation55_spill] sm:$0xff] }
  0xb0   :  { %5053 = vst [vmem:[#allocation16_spill] sm:$0xff] %v3129_v60  ;;  %839 = vrot.lane.b32.xlu1 %v3129_v60, %s1853_s0  ;;  %v539_v21 = vadd.f32 %v531_v5, %v442_v17  ;;  %v593_v54 = vmul.f32 %v5058_v42, %v5058_v42  ;;  %v215_v31 = vadd.f32 %v207_v26, %v132_v25  ;;  %v5063_v60 = vld [vmem:[#allocation59_spill] sm:$0xff]  ;;  %v5064_v5 = vld [vmem:[#allocation60_spill] sm:$0xff] }
  0xb1   :  { %v401_v56 = vmul.f32 %v5059_v6, %v5059_v6  ;;  %v3145_v32 = vadd.f32 %v688_v40, %v599_v11  ;;  %v407_v18 = vadd.f32 %v399_v1, %v310_v23  ;;  %v498_v37 = vmul.f32 %v5061_v2, %v5061_v2  ;;  %v5065_v26 = vld [vmem:[#allocation40_spill] sm:$0xff]  ;;  %v5066_v11 = vld [vmem:[#allocation13_spill] sm:$0xff] }
  0xb2   :  { %v134_v29 = vmul.f32 %v5062_v58, %v5062_v58  ;;  %v636_v19 = vadd.f32 %v628_v49, %v539_v21  ;;  %v312_v39 = vadd.f32 %v304_v33, %v215_v31  ;;  %v209_v17 = vmul.f32 %v5063_v60, %v5063_v60  ;;  %v5069_v58 = vld [vmem:[#allocation71_spill] sm:$0xff] }
  0xb3   :  { %5060 = vst [vmem:[#allocation32_spill] sm:$0xff] %v3145_v32  ;;  %v306_v25 = vmul.f32 %v5064_v5, %v5064_v5  ;;  %785 = vrot.lane.b32.xlu0 %v3145_v32, %s1853_s0  ;;  %v504_v40 = vadd.f32 %v496_v43, %v407_v18  ;;  %v690_v1 = vmul.f32 %v5065_v26, %v5065_v26  ;;  %v5070_v18 = vld [vmem:[#allocation12_spill] sm:$0xff]  ;;  %v5076_v26 = vld [vmem:[#allocation78_spill] sm:$0xff] }
  0xb4   :  { %v595_v23 = vmul.f32 %v5066_v11, %v5066_v11  ;;  %v692_v49 = vmul.f32 %v5067_v24, %v5067_v24  ;;  %v3163_v33 = vadd.f32 %v725_v50, %v636_v19  ;;  %v409_v21 = vadd.f32 %v401_v56, %v312_v39 }
  0xb5   :  { %v217_v31 = vadd.f32 %v209_v17, %v134_v29  ;;  %v403_v15 = vmul.f32 %v5069_v58, %v5069_v58  ;;  %v601_v46 = vadd.f32 %v593_v54, %v504_v40  ;;  %v136_v43 = vmul.f32 %v3167_v63, %v3167_v63  ;;  %v5072_v29 = vld [vmem:[#allocation74_spill] sm:$0xff]  ;;  %v5073_v54 = vld [vmem:[#allocation75_spill] sm:$0xff]  ;;  %v5075_v40 = vld [vmem:[#allocation76_spill] sm:$0xff] }
  0xb6   :  { %5068 = vst [vmem:[#allocation28_spill] sm:$0xff] %v3163_v33  ;;  %v219_v32 = vmul.f32 %v5070_v18, %v5070_v18  ;;  %v316_v11 = vmul.f32 %v5071_v41, %v5071_v41  ;;  %843 = vrot.lane.b32.xlu1 %v3163_v33, %s1853_s0  ;;  %v506_v50 = vadd.f32 %v498_v37, %v409_v21  ;;  %v3187_v33 = vld [vmem:[#allocation2 + $0x18] sm:$0xff] }
  0xb7   :  { %v314_v56 = vadd.f32 %v306_v25, %v217_v31  ;;  %v500_v19 = vmul.f32 %v5072_v29, %v5072_v29  ;;  %v597_v39 = vmul.f32 %v5073_v54, %v5073_v54  ;;  %v3181_v17 = vadd.f32 %v690_v1, %v601_v46  ;;  %v5078_v21 = vld [vmem:[#allocation38_spill] sm:$0xff] }
  0xb8   :  { %v694_v24 = vmul.f32 %v5075_v40, %v5075_v40  ;;  %v227_v58 = vadd.f32 %v219_v32, %v136_v43  ;;  %v413_v2 = vmul.f32 %v5076_v26, %v5076_v26  ;;  %v603_v5 = vadd.f32 %v595_v23, %v506_v50  ;;  %v5077_v23 = vld [vmem:[#allocation14_spill] sm:$0xff] }
  0xb9   :  { %5074 = vst [vmem:[#allocation41_spill] sm:$0xff] %v3181_v17  ;;  %v411_v60 = vadd.f32 %v403_v15, %v314_v56  ;;  %v138_v37 = vmul.f32 %v3187_v33, %v3187_v33  ;;  %v221_v25 = vmul.f32 %v2847_v14, %v2847_v14  ;;  %789 = vrot.lane.b32.xlu0 %v3181_v17, %s1853_s0  ;;  %v3209_v17 = vld [vmem:[#allocation2 + $0x28] sm:$0xff] }
  0xba   :  { %v324_v46 = vadd.f32 %v316_v11, %v227_v58  ;;  %v510_v32 = vmul.f32 %v2813_v62, %v2813_v62  ;;  %v607_v1 = vmul.f32 %v2829_v9, %v2829_v9  ;;  %v318_v15 = vmul.f32 %v5077_v23, %v5077_v23  ;;  %855 = vrot.lane.b32.xlu1 %v5078_v21, %s1854_s1 }
  0xbb   :  { %v3203_v31 = vadd.f32 %v692_v49, %v603_v5  ;;  %v508_v43 = vadd.f32 %v500_v19, %v411_v60  ;;  %v229_v50 = vadd.f32 %v221_v25, %v138_v37  ;;  %v415_v11 = vmul.f32 %v2872_v45, %v2872_v45 }
  0xbc   :  { %v421_v58 = vadd.f32 %v413_v2, %v324_v46  ;;  %v704_v56 = vmul.f32 %v2837_v61, %v2837_v61  ;;  %v140_v40 = vmul.f32 %v3209_v17, %v3209_v17  ;;  %v223_v54 = vmul.f32 %v2929_v59, %v2929_v59 }
  0xbd   :  { %5079 = vst [vmem:[#allocation43_spill] sm:$0xff] %v3203_v31  ;;  %v605_v21 = vadd.f32 %v597_v39, %v508_v43  ;;  %v326_v5 = vadd.f32 %v318_v15, %v229_v50  ;;  %v512_v60 = vmul.f32 %v2884_v27, %v2884_v27  ;;  %v320_v49 = vmul.f32 %v2937_v38, %v2937_v38  ;;  %v5080_v39 = vld [vmem:[#allocation45_spill] sm:$0xff]  ;;  %v3231_v50 = vld [vmem:[#allocation2 + $0x38] sm:$0xff] }
  0xbe   :  { %793 = vrot.lane.b32.xlu0 %v3203_v31, %s1853_s0  ;;  %v518_v2 = vadd.f32 %v510_v32, %v421_v58  ;;  %v609_v19 = vmul.f32 %v2908_v55, %v2908_v55  ;;  %v231_v37 = vadd.f32 %v223_v54, %v140_v40  ;;  %v417_v25 = vmul.f32 %v2954_v51, %v2954_v51 }
  0xbf   :  { %859 = vrot.lane.b32.xlu1 %v5080_v39, %s1854_s1  ;;  %v3227_v46 = vadd.f32 %v694_v24, %v605_v21  ;;  %v423_v15 = vadd.f32 %v415_v11, %v326_v5  ;;  %v514_v43 = vmul.f32 %v2970_v48, %v2970_v48  ;;  %v142_v32 = vmul.f32 %v3231_v50, %v3231_v50 }
  0xc0   :  { %v615_v58 = vadd.f32 %v607_v1, %v518_v2  ;;  %v328_v31 = vadd.f32 %v320_v49, %v231_v37  ;;  %v225_v54 = vmul.f32 %v3005_v20, %v3005_v20  ;;  %v322_v40 = vmul.f32 %v3013_v22, %v3013_v22  ;;  %v5082_v2 = vld [vmem:[#allocation53_spill] sm:$0xff]  ;;  %v1791_v37 = vld [vmem:[#allocation5 + $0x8] sm:$0xff] }
  0xc1   :  { %5081 = vst [vmem:[#allocation44_spill] sm:$0xff] %v3227_v46  ;;  %v520_v39 = vadd.f32 %v512_v60, %v423_v15  ;;  %v706_v24 = vmul.f32 %v2921_v53, %v2921_v53  ;;  %v611_v21 = vmul.f32 %v2985_v10, %v2985_v10  ;;  %v419_v49 = vmul.f32 %v3030_v4, %v3030_v4 }
  0xc2   :  { %797 = vrot.lane.b32.xlu0 %v3227_v46, %s1853_s0  ;;  %v3245_v11 = vadd.f32 %v704_v56, %v615_v58  ;;  %v425_v1 = vadd.f32 %v417_v25, %v328_v31  ;;  %v233_v5 = vadd.f32 %v225_v54, %v142_v32  ;;  %v144_v15 = vmul.f32 %v1791_v37, %v3167_v63  ;;  %v3258_v25 = vpop.xlane.xlu1 %112 }
  0xc3   :  { %863 = vrot.lane.b32.xlu1 %v5082_v2, %s1854_s1  ;;  %v617_v60 = vadd.f32 %v609_v19, %v520_v39  ;;  %v235_v29 = vmul.f32 %v5070_v18, %v5034_v44  ;;  %v332_v46 = vmul.f32 %v5071_v41, %v5035_v52  ;;  %v516_v31 = vmul.f32 %v3044_v35, %v3044_v35 }
  0xc4   :  { %v522_v56 = vadd.f32 %v514_v43, %v425_v1  ;;  %v330_v58 = vadd.f32 %v322_v40, %v233_v5  ;;  %v708_v32 = vmul.f32 %v2993_v36, %v2993_v36  ;;  %v613_v19 = vmul.f32 %v3062_v30, %v3062_v30  ;;  %v5084_v43 = vld [vmem:[#allocation56_spill] sm:$0xff]  ;;  %v1792_v40 = vld [vmem:[#allocation5 + $0x18] sm:$0xff] }
  0xc5   :  { %v243_v63 = vadd.f32 %v235_v29, %v144_v15  ;;  %v429_v44 = vmul.f32 %v5076_v26, %v5037_v3  ;;  %v3268_v41 = vadd.f32 %v706_v24, %v617_v60  ;;  %v526_v39 = vmul.f32 %v2813_v62, %v5042_v8  ;;  %v1793_v60 = vld [vmem:[#allocation5 + $0x28] sm:$0xff] }
  0xc6   :  { %809 = vrot.lane.b32.xlu0 %v3245_v11, %s1853_s0  ;;  %v619_v52 = vadd.f32 %v611_v21, %v522_v56  ;;  %v427_v18 = vadd.f32 %v419_v49, %v330_v58  ;;  %v146_v29 = vmul.f32 %v1792_v40, %v3187_v33  ;;  %v237_v3 = vmul.f32 %v2847_v14, %v5047_v13  ;;  %v3279_v1 = vpop.permute.xlu1 %735 }
  0xc7   :  { %5083 = vst [vmem:[#allocation17_spill] sm:$0xff] %v3268_v41  ;;  %867 = vrot.lane.b32.xlu1 %v5084_v43, %s1854_s1  ;;  %v340_v54 = vadd.f32 %v332_v46, %v243_v63  ;;  %v334_v26 = vmul.f32 %v5077_v23, %v5048_v16  ;;  %5085 = vst [vmem:[#allocation19_spill] sm:$0xff] %v3279_v1  ;;  %v710_v21 = vmul.f32 %v3070_v7, %v3070_v7  ;;  %v5086_v16 = vld [vmem:[#allocation61_spill] sm:$0xff] }
  0xc8   :  { %v524_v24 = vadd.f32 %v516_v31, %v427_v18  ;;  %v245_v8 = vadd.f32 %v237_v3, %v146_v29  ;;  %v431_v46 = vmul.f32 %v2872_v45, %v5052_v12  ;;  %v3287_v33 = vadd.f32 %v708_v32, %v619_v52  ;;  %v5090_v31 = vld [vmem:[#allocation60_spill] sm:$0xff]  ;;  %v5091_v32 = vld [vmem:[#allocation55_spill] sm:$0xff]  ;;  %v5097_v29 = vld [vmem:[#allocation74_spill] sm:$0xff] }
  0xc9   :  { %v437_v62 = vadd.f32 %v429_v44, %v340_v54  ;;  %v623_v13 = vmul.f32 %v2829_v9, %v5043_v0  ;;  %v528_v49 = vmul.f32 %v2884_v27, %v5056_v57  ;;  %v148_v45 = vmul.f32 %v1793_v60, %v3209_v17  ;;  %v5094_v44 = vld [vmem:[#allocation71_spill] sm:$0xff] }
  0xca   :  { %813 = vrot.lane.b32.xlu0 %v3268_v41, %s1853_s0  ;;  %v621_v14 = vadd.f32 %v613_v19, %v524_v24  ;;  %v342_v5 = vadd.f32 %v334_v26, %v245_v8  ;;  %v239_v12 = vmul.f32 %v2929_v59, %v5055_v47  ;;  %v336_v37 = vmul.f32 %v2937_v38, %v5057_v28  ;;  %v3300_v15 = vpop.permute.xlu1 %739  ;;  %v1794_v38 = vld [vmem:[#allocation5 + $0x38] sm:$0xff]  ;;  %v5100_v8 = vld [vmem:[#allocation75_spill] sm:$0xff] }
  0xcb   :  { %879 = vrot.lane.b32.xlu1 %v5086_v16, %s1854_s1  ;;  %v534_v23 = vadd.f32 %v526_v39, %v437_v62  ;;  %5087 = vst [vmem:[#allocation20_spill] sm:$0xff] %v3300_v15  ;;  %v720_v0 = vmul.f32 %v2837_v61, %v5044_v34  ;;  %v625_v27 = vmul.f32 %v2908_v55, %v5058_v42  ;;  %v5088_v28 = vld [vmem:[#allocation62_spill] sm:$0xff]  ;;  %v5089_v61 = vld [vmem:[#allocation59_spill] sm:$0xff]  ;;  %v5095_v39 = vld [vmem:[#allocation13_spill] sm:$0xff] }
  0xcc   :  { %v3302_v9 = vadd.f32 %v710_v21, %v621_v14  ;;  %v439_v56 = vadd.f32 %v431_v46, %v342_v5  ;;  %v247_v17 = vadd.f32 %v239_v12, %v148_v45  ;;  %v433_v59 = vmul.f32 %v2954_v51, %v5059_v6  ;;  %v5093_v51 = vld [vmem:[#allocation40_spill] sm:$0xff]  ;;  %v5099_v62 = vld [vmem:[#allocation58_spill] sm:$0xff]  ;;  %v5107_v12 = vld [vmem:[#allocation67_spill] sm:$0xff] }
  0xcd   :  { %v631_v57 = vadd.f32 %v623_v13, %v534_v23  ;;  %v150_v47 = vmul.f32 %v1794_v38, %v3231_v50  ;;  %v241_v34 = vmul.f32 %v3005_v20, %v5089_v61  ;;  %v338_v55 = vmul.f32 %v3013_v22, %v5090_v31  ;;  %v5101_v14 = vld [vmem:[#allocation64_spill] sm:$0xff]  ;;  %v5115_v38 = vld [vmem:[#allocation73_spill] sm:$0xff] }
  0xce   :  { %817 = vrot.lane.b32.xlu0 %v3287_v33, %s1853_s0  ;;  %v536_v58 = vadd.f32 %v528_v49, %v439_v56  ;;  %v344_v42 = vadd.f32 %v336_v37, %v247_v17  ;;  %v530_v19 = vmul.f32 %v2970_v48, %v5091_v32  ;;  %v3321_v63 = vpop.permute.xlu1 %741  ;;  %v722_v6 = vmul.f32 %v2921_v53, %v5093_v51  ;;  %v5096_v48 = vld [vmem:[#allocation63_spill] sm:$0xff]  ;;  %v5103_v49 = vld [vmem:[#allocation76_spill] sm:$0xff] }
  0xcf   :  { %883 = vrot.lane.b32.xlu1 %v5088_v28, %s1854_s1  ;;  %5092 = vst [vmem:[#allocation46_spill] sm:$0xff] %v3321_v63  ;;  %v249_v50 = vadd.f32 %v241_v34, %v150_v47  ;;  %v435_v52 = vmul.f32 %v3030_v4, %v5094_v44  ;;  %v3329_v20 = vadd.f32 %v720_v0, %v631_v57  ;;  %v5109_v0 = vld [vmem:[#allocation31_spill] sm:$0xff]  ;;  %v5112_v57 = vld [vmem:[#allocation49_spill] sm:$0xff]  ;;  %v5113_v17 = vld [vmem:[#allocation72_spill] sm:$0xff] }
  0xd0   :  { %v633_v18 = vadd.f32 %v625_v27, %v536_v58  ;;  %v441_v22 = vadd.f32 %v433_v59, %v344_v42  ;;  %v627_v54 = vmul.f32 %v2985_v10, %v5095_v39  ;;  %v532_v53 = vmul.f32 %v3044_v35, %v5097_v29  ;;  %v5111_v27 = vld [vmem:[#allocation57_spill] sm:$0xff]  ;;  %v5116_v47 = vld [vmem:[#allocation79_spill] sm:$0xff]  ;;  %v97_v58 = vpop.xlane.xlu0 %96  ;;  %v5118_v34 = vld [vmem:[#allocation80_spill] sm:$0xff] }
  0xd1   :  { %v346_v40 = vadd.f32 %v338_v55, %v249_v50  ;;  %v724_v10 = vmul.f32 %v2993_v36, %v5099_v62  ;;  %v629_v46 = vmul.f32 %v3062_v30, %v5100_v8  ;;  %v726_v60 = vmul.f32 %v3070_v7, %v5103_v49  ;;  %v5104_v36 = vld [vmem:[#allocation65_spill] sm:$0xff]  ;;  %v5108_v7 = vld [vmem:[#allocation70_spill] sm:$0xff]  ;;  %v5122_v50 = vld [vmem:[#allocation15_spill] sm:$0xff] }
  0xd2   :  { %821 = vrot.lane.b32.xlu0 %v3302_v9, %s1853_s0  ;;  %v538_v3 = vadd.f32 %v530_v19, %v441_v22  ;;  %v3337_v26 = vpop.permute.xlu1 %743  ;;  %v3341_v24 = vadd.f32 %v722_v6, %v633_v18  ;;  %v98_v31 = vrot.slane %v97_v58, 4  ;;  %v5119_v55 = vld [vmem:[#allocation81_spill] sm:$0xff]  ;;  %v114_v42 = vrot.slane %v3258_v25, 4  ;;  %v5121_v19 = vld [vmem:[#allocation82_spill] sm:$0xff]  ;;  %v5130_v49 = vld [vmem:[#allocation16_spill] sm:$0xff] }
  0xd3   :  { %887 = vrot.lane.b32.xlu1 %v5096_v48, %s1854_s1  ;;  %5098 = vst [vmem:[#allocation21_spill] sm:$0xff] %v3337_v26  ;;  %v443_v4 = vadd.f32 %v435_v52, %v346_v40  ;;  %v5123_v18 = vld [vmem:[#allocation26_spill] sm:$0xff] }
  0xd4   :  { %v635_v21 = vadd.f32 %v627_v54, %v538_v3  ;;  %v99_v51 = vmax.f32 %v97_v58, %v98_v31  ;;  %v3400_v6 = vpop.permute.xlu0 %737  ;;  %v115_v44 = vmin.f32 %v3258_v25, %v114_v42  ;;  %v5124_v22 = vld [vmem:[#allocation18_spill] sm:$0xff]  ;;  %v5126_v3 = vld [vmem:[#allocation27_spill] sm:$0xff]  ;;  %v5127_v25 = vld [vmem:[#allocation29_spill] sm:$0xff] }
  0xd5   :  { %v540_v35 = vadd.f32 %v532_v53, %v443_v4 }
  0xd6   :  { %833 = vrot.lane.b32.xlu0 %v3329_v20, %s1853_s0  ;;  %v3349_v13 = vpop.permute.xlu1 %747  ;;  %v3353_v23 = vadd.f32 %v724_v10, %v635_v21  ;;  %v100_v54 = vrot.slane %v99_v51, 2  ;;  %v116_v29 = vrot.slane %v115_v44, 2 }
  0xd7   :  { %891 = vrot.lane.b32.xlu1 %v5101_v14, %s1854_s1  ;;  %5102 = vst [vmem:[#allocation47_spill] sm:$0xff] %v3349_v13  ;;  %v637_v5 = vadd.f32 %v629_v46, %v540_v35  ;;  %v5129_v46 = vld [vmem:[#allocation30_spill] sm:$0xff] }
  0xd8   :  { %v101_v21 = vmax.f32 %v99_v51, %v100_v54  ;;  %v117_v10 = vmin.f32 %v115_v44, %v116_v29  ;;  %v5132_v51 = vld [vmem:[#allocation32_spill] sm:$0xff] }
  0xd9   :  { %v3363_v30 = vadd.f32 %v726_v60, %v637_v5 }
  0xda   :  { %837 = vrot.lane.b32.xlu0 %v3341_v24, %s1853_s0  ;;  %v3359_v45 = vpop.permute.xlu1 %759  ;;  %v102_v60 = vrot.slane %v101_v21, 1  ;;  %v118_v31 = vrot.slane %v117_v10, 1 }
  0xdb   :  { %903 = vrot.lane.b32.xlu1 %v5104_v36, %s1854_s1  ;;  %5105 = vst [vmem:[#allocation48_spill] sm:$0xff] %v3359_v45  ;;  %5106 = vst [vmem:[#allocation22_spill] sm:$0xff] %v3363_v30 }
  0xdc   :  { %v103_v54 = vmax.f32 %v101_v21, %v102_v60  ;;  %v119_v29 = vmin.f32 %v117_v10, %v118_v31  ;;  %v5139_v21 = vld [vmem:[#allocation45_spill] sm:$0xff]  ;;  %v5141_v60 = vld [vmem:[#allocation44_spill] sm:$0xff] }
  0xde   :  { %841 = vrot.lane.b32.xlu0 %v3353_v23, %s1853_s0  ;;  %v3367_v37 = vpop.permute.xlu1 %763 }
  0xdf   :  { %907 = vrot.lane.b32.xlu1 %v5107_v12, %s1854_s1 }
  0xe2   :  { %845 = vrot.lane.b32.xlu0 %v3363_v30, %s1853_s0  ;;  %v3375_v56 = vpop.permute.xlu1 %767 }
  0xe3   :  { %911 = vrot.lane.b32.xlu1 %v5108_v7, %s1854_s1  ;;  %5110 = vst [vmem:[#allocation23_spill] sm:$0xff] %v3375_v56 }
  0xe6   :  { %857 = vrot.lane.b32.xlu0 %v5109_v0, %s1854_s1  ;;  %v3383_v59 = vpop.permute.xlu1 %771 }
  0xe7   :  { %915 = vrot.lane.b32.xlu1 %v5111_v27, %s1854_s1  ;;  %5114 = vst [vmem:[#allocation25_spill] sm:$0xff] %v3383_v59 }
  0xe8   :  { %v80_v39 = vpop.xlane.xlu0 %79 }
  0xe9   :  { %v81_v40 = vrot.slane %v80_v39, 4 }
  0xea   :  { %861 = vrot.lane.b32.xlu0 %v5112_v57, %s1854_s1  ;;  %v3389_v61 = vpop.permute.xlu1 %783 }
  0xeb   :  { %927 = vrot.lane.b32.xlu1 %v5113_v17, %s1854_s1  ;;  %5117 = vst [vmem:[#allocation50_spill] sm:$0xff] %v3389_v61  ;;  %v82_v4 = vadd.f32 %v81_v40, %v80_v39  ;;  %v5133_v39 = vld [vmem:[#allocation28_spill] sm:$0xff] }
  0xed   :  { %v83_v62 = vrot.slane %v82_v4, 2 }
  0xee   :  { %865 = vrot.lane.b32.xlu0 %v5115_v38, %s1854_s1  ;;  %v3396_v32 = vpop.permute.xlu1 %787 }
  0xef   :  { %931 = vrot.lane.b32.xlu1 %v5116_v47, %s1854_s1  ;;  %5120 = vst [vmem:[#allocation24_spill] sm:$0xff] %v3396_v32  ;;  %v3421_v35 = vpop.permute.xlu0 %745  ;;  %v84_v5 = vadd.f32 %v83_v62, %v82_v4  ;;  %v5135_v4 = vld [vmem:[#allocation41_spill] sm:$0xff]  ;;  %v5136_v62 = vld [vmem:[#allocation38_spill] sm:$0xff] }
  0xf1   :  { %v85_v58 = vrot.slane %v84_v5, 1 }
  0xf2   :  { %869 = vrot.lane.b32.xlu0 %v5118_v34, %s1854_s1  ;;  %v3405_v52 = vpop.permute.xlu1 %791 }
  0xf3   :  { %935 = vrot.lane.b32.xlu1 %v5119_v55, %s1854_s1  ;;  %v86_v44 = vadd.f32 %v85_v58, %v84_v5  ;;  %v5138_v5 = vld [vmem:[#allocation43_spill] sm:$0xff] }
  0xf5   :  { %1747 = vpush %v86_v44 }
  0xf6   :  { %881 = vrot.lane.b32.xlu0 %v5121_v19, %s1854_s1  ;;  %v3411_v53 = vpop.permute.xlu1 %795  ;;  %1749 = vpush %v103_v54 }
  0xf7   :  { %939 = vrot.lane.b32.xlu1 %v5122_v50, %s1854_s1  ;;  %5125 = vst [vmem:[#allocation34_spill] sm:$0xff] %v3411_v53  ;;  %1751 = vpush %v119_v29 }
  0xf9   :  { %v3431_v40 = vpop.permute.xlu0 %749 }
  0xfa   :  { %885 = vrot.lane.b32.xlu0 %v5123_v18, %s1854_s1  ;;  %v3417_v8 = vpop.permute.xlu1 %807  ;;  %5134 = vst [vmem:[#allocation52_spill] sm:$0xff] %v3431_v40 }
  0xfb   :  { %951 = vrot.lane.b32.xlu1 %v5124_v22, %s1854_s1  ;;  %5128 = vst [vmem:[#allocation35_spill] sm:$0xff] %v3417_v8 }
  0xfe   :  { %889 = vrot.lane.b32.xlu0 %v5126_v3, %s1854_s1  ;;  %v3425_v42 = vpop.permute.xlu1 %811 }
  0xff   :  { %955 = vrot.lane.b32.xlu1 %v5127_v25, %s1854_s1  ;;  %5131 = vst [vmem:[#allocation51_spill] sm:$0xff] %v3425_v42 }
 0x102   :  { %893 = vrot.lane.b32.xlu0 %v5129_v46, %s1854_s1  ;;  %v3437_v61 = vpop.permute.xlu1 %815  ;;  %v3441_v58 = vpop.permute.xlu0 %761 }
 0x103   :  { %959 = vrot.lane.b32.xlu1 %v5130_v49, %s1854_s1  ;;  %5137 = vst [vmem:[#allocation54_spill] sm:$0xff] %v3437_v61 }
 0x106   :  { %905 = vrot.lane.b32.xlu0 %v5132_v51, %s1854_s1 }
 0x107   :  { %963 = vrot.lane.b32.xlu1 %v5133_v39, %s1854_s1 }
 0x109   :  { %v3445_v10 = vpop.permute.xlu1 %819 }
 0x10a   :  { %909 = vrot.lane.b32.xlu0 %v5135_v4, %s1854_s1  ;;  %5140 = vst [vmem:[#allocation36_spill] sm:$0xff] %v3445_v10  ;;  %v3451_v31 = vpop.permute.xlu0 %765 }
 0x10b   :  { %975 = vrot.lane.b32.xlu1 %v5136_v62, %s1855_s21 }
 0x10e   :  { %913 = vrot.lane.b32.xlu0 %v5138_v5, %s1854_s1 }
 0x10f   :  { %979 = vrot.lane.b32.xlu1 %v5139_v21, %s1855_s21 }
 0x112   :  { %917 = vrot.lane.b32.xlu0 %v5141_v60, %s1854_s1  ;;  %v3457_v44 = vpop.permute.xlu1 %831 }
 0x113   :  { %983 = vrot.lane.b32.xlu1 %v5082_v2, %s1855_s21  ;;  %5142 = vst [vmem:[#allocation33_spill] sm:$0xff] %v3457_v44 }
 0x116   :  { %929 = vrot.lane.b32.xlu0 %v3245_v11, %s1854_s1  ;;  %v3461_v54 = vpop.permute.xlu0 %769 }
 0x117   :  { %987 = vrot.lane.b32.xlu1 %v5084_v43, %s1855_s21  ;;  %5143 = vst [vmem:[#allocation66_spill] sm:$0xff] %v3461_v54 }
 0x11a   :  { %933 = vrot.lane.b32.xlu0 %v3268_v41, %s1854_s1 }
 0x11b   :  { %999 = vrot.lane.b32.xlu1 %v5086_v16, %s1855_s21  ;;  %v3465_v29 = vpop.permute.xlu1 %835 }
 0x11c   :  { %5144 = vst [vmem:[#allocation37_spill] sm:$0xff] %v3465_v29  ;;  %v3471_v8 = vpop.permute.xlu0 %773 }
 0x11d   :  { %5145 = vst [vmem:[#allocation68_spill] sm:$0xff] %v3471_v8 }
 0x11e   :  { %937 = vrot.lane.b32.xlu0 %v3287_v33, %s1854_s1 }
 0x11f   :  { %1003 = vrot.lane.b32.xlu1 %v5088_v28, %s1855_s21 }
 0x122   :  { %941 = vrot.lane.b32.xlu0 %v3302_v9, %s1854_s1  ;;  %v3477_v44 = vpop.permute.xlu1 %839 }
 0x123   :  { %1025 = vrot.lane.b32.xlu1 %v5132_v51, %s1855_s21  ;;  %5146 = vst [vmem:[#allocation39_spill] sm:$0xff] %v3477_v44 }
 0x125   :  { %v3481_v29 = vpop.permute.xlu0 %785 }
 0x126   :  { %953 = vrot.lane.b32.xlu0 %v3329_v20, %s1854_s1  ;;  %s4227_s25 = spop %1747 }
 0x127   :  { %1049 = vrot.lane.b32.xlu1 %v3245_v11, %s1855_s21  ;;  %s4239_s26 = spop %1749  ;;  %s88_s10 = smul.f32 0.00012207031, %s4227_s25 }
 0x128   :  { %v3485_v1 = vpop.permute.xlu1 %843  ;;  %s1752_s27 = spop %1751 }
 0x129   :  { %5147 = vst [vmem:[#allocation69_spill] sm:$0xff] %v3485_v1  ;;  %s121_s28 = ssub.f32 %s4239_s26, %s1752_s27 }
 0x12a   :  { %957 = vrot.lane.b32.xlu0 %v3341_v24, %s1854_s1 }
 0x12b   :  { %1097 = vrot.lane.b32.xlu1 %v5109_v0, %s1856_s22  ;;  %v3491_v45 = vpop.permute.xlu0 %789  ;;  %s122_s30 = smax.f32 %s1859_s29, %s121_s28 }
 0x12c   :  { %5148 = vst [vmem:[#allocation42_spill] sm:$0xff] %v3491_v45  ;;  %v3493_v44 = vpop.permute.xlu1 %855  ;;  %s123_s3 = smul.f32 0.01, %s122_s30 }
 0x12d   :  { %5149 = vst [vmem:[#allocation12_spill] sm:$0xff] %v3493_v44  ;;  %s125_s4 = smul.f32 0.03, %s122_s30 }
 0x12e   :  { %961 = vrot.lane.b32.xlu0 %v3353_v23, %s1854_s1  ;;  %s124_s5 = smul.f32 %s123_s3, %s123_s3 }
 0x12f   :  { %1121 = vrot.lane.b32.xlu1 %v5121_v19, %s1856_s22  ;;  %s126_s6 = smul.f32 %s125_s4, %s125_s4 }
 0x130   :  { %v3499_v10 = vpop.permute.xlu0 %793 }
 0x131   :  { %v3501_v1 = vpop.permute.xlu1 %859 }
 0x132   :  { %5150 = vst [vmem:[#allocation77_spill] sm:$0xff] %v3501_v1  ;;  %965 = vrot.lane.b32.xlu0 %v3363_v30, %s1854_s1 }
 0x133   :  { %1027 = vrot.lane.b32.xlu1 %v5107_v12, %s1855_s21 }
 0x134   :  { %v3507_v8 = vpop.permute.xlu0 %797 }
 0x135   :  { %5151 = vst [vmem:[#allocation78_spill] sm:$0xff] %v3507_v8  ;;  %v3509_v40 = vpop.permute.xlu1 %863 }
 0x136   :  { %5152 = vst [vmem:[#allocation14_spill] sm:$0xff] %v3509_v40  ;;  %977 = vrot.lane.b32.xlu0 %v5109_v0, %s1855_s21 }
 0x137   :  { %1099 = vrot.lane.b32.xlu1 %v5139_v21, %s1856_s22 }
 0x138   :  { %v3515_v44 = vpop.permute.xlu0 %809 }
 0x139   :  { %v3517_v56 = vpop.permute.xlu1 %867 }
 0x13a   :  { %5153 = vst [vmem:[#allocation62_spill] sm:$0xff] %v3517_v56  ;;  %981 = vrot.lane.b32.xlu0 %v5112_v57, %s1855_s21 }
 0x13b   :  { %1143 = vrot.lane.b32.xlu1 %v5104_v36, %s1856_s22 }
 0x13c   :  { %v3523_v61 = vpop.permute.xlu0 %813 }
 0x13d   :  { %5154 = vst [vmem:[#allocation59_spill] sm:$0xff] %v3523_v61  ;;  %v3525_v8 = vpop.permute.xlu1 %879 }
 0x13e   :  { %5155 = vst [vmem:[#allocation60_spill] sm:$0xff] %v3525_v8  ;;  %985 = vrot.lane.b32.xlu0 %v5115_v38, %s1855_s21 }
 0x13f   :  { %1167 = vrot.lane.b32.xlu1 %v5113_v17, %s1856_s22 }
 0x140   :  { %v3531_v54 = vpop.permute.xlu0 %817 }
 0x141   :  { %5156 = vst [vmem:[#allocation55_spill] sm:$0xff] %v3531_v54  ;;  %v3533_v59 = vpop.permute.xlu1 %883 }
 0x142   :  { %989 = vrot.lane.b32.xlu0 %v5118_v34, %s1855_s21 }
 0x143   :  { %1215 = vrot.lane.b32.xlu1 %v5136_v62, %s1857_s23 }
 0x144   :  { %v3539_v61 = vpop.permute.xlu0 %821 }
 0x145   :  { %5157 = vst [vmem:[#allocation40_spill] sm:$0xff] %v3539_v61  ;;  %v3541_v8 = vpop.permute.xlu1 %887 }
 0x146   :  { %5158 = vst [vmem:[#allocation71_spill] sm:$0xff] %v3541_v8  ;;  %1001 = vrot.lane.b32.xlu0 %v5121_v19, %s1855_s21 }
 0x147   :  { %1239 = vrot.lane.b32.xlu1 %v5086_v16, %s1857_s23 }
 0x148   :  { %v3547_v54 = vpop.permute.xlu0 %833 }
 0x149   :  { %5159 = vst [vmem:[#allocation13_spill] sm:$0xff] %v3547_v54  ;;  %v3549_v56 = vpop.permute.xlu1 %891 }
 0x14a   :  { %5160 = vst [vmem:[#allocation74_spill] sm:$0xff] %v3549_v56  ;;  %1023 = vrot.lane.b32.xlu0 %v5104_v36, %s1855_s21 }
 0x14b   :  { %1007 = vrot.lane.b32.xlu1 %v5096_v48, %s1855_s21 }
 0x14c   :  { %v3555_v13 = vpop.permute.xlu0 %837 }
 0x14d   :  { %5161 = vst [vmem:[#allocation58_spill] sm:$0xff] %v3555_v13  ;;  %v3557_v61 = vpop.permute.xlu1 %903 }
 0x14e   :  { %5162 = vst [vmem:[#allocation75_spill] sm:$0xff] %v3557_v61  ;;  %1047 = vrot.lane.b32.xlu0 %v5113_v17, %s1855_s21 }
 0x14f   :  { %1053 = vrot.lane.b32.xlu1 %v3268_v41, %s1855_s21 }
 0x150   :  { %v3563_v8 = vpop.permute.xlu0 %841 }
 0x151   :  { %5163 = vst [vmem:[#allocation64_spill] sm:$0xff] %v3563_v8  ;;  %v3565_v54 = vpop.permute.xlu1 %907 }
 0x152   :  { %5164 = vst [vmem:[#allocation76_spill] sm:$0xff] %v3565_v54  ;;  %1095 = vrot.lane.b32.xlu0 %v5136_v62, %s1856_s22 }
 0x153   :  { %1125 = vrot.lane.b32.xlu1 %v5123_v18, %s1856_s22 }
 0x154   :  { %v3571_v56 = vpop.permute.xlu0 %845 }
 0x155   :  { %5165 = vst [vmem:[#allocation70_spill] sm:$0xff] %v3571_v56  ;;  %v3573_v13 = vpop.permute.xlu1 %911 }
 0x156   :  { %5166 = vst [vmem:[#allocation31_spill] sm:$0xff] %v3573_v13  ;;  %1119 = vrot.lane.b32.xlu0 %v5086_v16, %s1856_s22 }
 0x157   :  { %1171 = vrot.lane.b32.xlu1 %v5116_v47, %s1856_s22 }
 0x158   :  { %v3579_v61 = vpop.permute.xlu0 %857 }
 0x159   :  { %v3581_v8 = vpop.permute.xlu1 %915 }
 0x15a   :  { %5167 = vst [vmem:[#allocation57_spill] sm:$0xff] %v3581_v8  ;;  %1005 = vrot.lane.b32.xlu0 %v5123_v18, %s1855_s21 }
 0x15b   :  { %1243 = vrot.lane.b32.xlu1 %v5088_v28, %s1857_s23 }
 0x15c   :  { %v3587_v53 = vpop.permute.xlu0 %861 }
 0x15d   :  { %5168 = vst [vmem:[#allocation73_spill] sm:$0xff] %v3587_v53  ;;  %v3589_v56 = vpop.permute.xlu1 %927 }
 0x15e   :  { %5169 = vst [vmem:[#allocation80_spill] sm:$0xff] %v3589_v56  ;;  %1051 = vrot.lane.b32.xlu0 %v5116_v47, %s1855_s21 }
 0x15f   :  { %1265 = vrot.lane.b32.xlu1 %v5132_v51, %s1857_s23 }
 0x160   :  { %v3595_v54 = vpop.permute.xlu0 %865 }
 0x161   :  { %v3597_v32 = vpop.permute.xlu1 %931 }
 0x162   :  { %5170 = vst [vmem:[#allocation82_spill] sm:$0xff] %v3597_v32  ;;  %1123 = vrot.lane.b32.xlu0 %v5088_v28, %s1856_s22 }
 0x163   :  { %1289 = vrot.lane.b32.xlu1 %v3245_v11, %s1857_s23 }
 0x164   :  { %v3603_v8 = vpop.permute.xlu0 %869 }
 0x165   :  { %5171 = vst [vmem:[#allocation15_spill] sm:$0xff] %v3603_v8  ;;  %v3605_v30 = vpop.permute.xlu1 %935 }
 0x166   :  { %5172 = vst [vmem:[#allocation26_spill] sm:$0xff] %v3605_v30  ;;  %1145 = vrot.lane.b32.xlu0 %v5132_v51, %s1856_s22 }
 0x167   :  { %1337 = vrot.lane.b32.xlu1 %v5109_v0, %s1858_s24 }
 0x168   :  { %v3611_v56 = vpop.permute.xlu0 %881 }
 0x169   :  { %v3613_v53 = vpop.permute.xlu1 %939 }
 0x16a   :  { %5173 = vst [vmem:[#allocation18_spill] sm:$0xff] %v3613_v53  ;;  %1169 = vrot.lane.b32.xlu0 %v3245_v11, %s1856_s22 }
 0x16b   :  { %1361 = vrot.lane.b32.xlu1 %v5121_v19, %s1858_s24 }
 0x16c   :  { %v3619_v8 = vpop.permute.xlu0 %885 }
 0x16d   :  { %5174 = vst [vmem:[#allocation29_spill] sm:$0xff] %v3619_v8  ;;  %v3621_v30 = vpop.permute.xlu1 %951 }
 0x16e   :  { %5175 = vst [vmem:[#allocation30_spill] sm:$0xff] %v3621_v30  ;;  %1217 = vrot.lane.b32.xlu0 %v5109_v0, %s1857_s23 }
 0x16f   :  { %1031 = vrot.lane.b32.xlu1 %v5108_v7, %s1855_s21 }
 0x170   :  { %v3627_v63 = vpop.permute.xlu0 %889 }
 0x171   :  { %5176 = vst [vmem:[#allocation32_spill] sm:$0xff] %v3627_v63  ;;  %v3629_v32 = vpop.permute.xlu1 %955 }
 0x172   :  { %5177 = vst [vmem:[#allocation43_spill] sm:$0xff] %v3629_v32  ;;  %1241 = vrot.lane.b32.xlu0 %v5121_v19, %s1857_s23 }
 0x173   :  { %1103 = vrot.lane.b32.xlu1 %v5082_v2, %s1856_s22 }
 0x174   :  { %v3635_v53 = vpop.permute.xlu0 %893 }
 0x175   :  { %5178 = vst [vmem:[#allocation44_spill] sm:$0xff] %v3635_v53  ;;  %v3637_v1 = vpop.permute.xlu1 %959 }
 0x176   :  { %5179 = vst [vmem:[#allocation83_spill] sm:$0xff] %v3637_v1  ;;  %1029 = vrot.lane.b32.xlu0 %v5135_v4, %s1855_s21 }
 0x177   :  { %1149 = vrot.lane.b32.xlu1 %v5135_v4, %s1856_s22 }
 0x178   :  { %v3643_v30 = vpop.permute.xlu0 %905 }
 0x179   :  { %v3645_v63 = vpop.permute.xlu1 %963 }
 0x17a   :  { %5180 = vst [vmem:[#allocation84_spill] sm:$0xff] %v3645_v63  ;;  %1101 = vrot.lane.b32.xlu0 %v5112_v57, %s1856_s22 }
 0x17b   :  { %1221 = vrot.lane.b32.xlu1 %v5112_v57, %s1857_s23 }
 0x17c   :  { %v3651_v32 = vpop.permute.xlu0 %909 }
 0x17d   :  { %5181 = vst [vmem:[#allocation85_spill] sm:$0xff] %v3651_v32  ;;  %v3653_v53 = vpop.permute.xlu1 %975 }
 0x17e   :  { %5182 = vst [vmem:[#allocation86_spill] sm:$0xff] %v3653_v53  ;;  %1147 = vrot.lane.b32.xlu0 %v5107_v12, %s1856_s22 }
 0x17f   :  { %1267 = vrot.lane.b32.xlu1 %v5107_v12, %s1857_s23 }
 0x180   :  { %v3659_v1 = vpop.permute.xlu0 %913 }
 0x181   :  { %v3661_v49 = vpop.permute.xlu1 %979 }
 0x182   :  { %5183 = vst [vmem:[#allocation87_spill] sm:$0xff] %v3661_v49  ;;  %1219 = vrot.lane.b32.xlu0 %v5139_v21, %s1857_s23 }
 0x183   :  { %1339 = vrot.lane.b32.xlu1 %v5139_v21, %s1858_s24 }
 0x184   :  { %v3667_v63 = vpop.permute.xlu0 %917 }
 0x185   :  { %5184 = vst [vmem:[#allocation88_spill] sm:$0xff] %v3667_v63  ;;  %v3669_v32 = vpop.permute.xlu1 %983 }
 0x186   :  { %5185 = vst [vmem:[#allocation89_spill] sm:$0xff] %v3669_v32  ;;  %1263 = vrot.lane.b32.xlu0 %v5104_v36, %s1857_s23 }
 0x187   :  { %1383 = vrot.lane.b32.xlu1 %v5104_v36, %s1858_s24 }
 0x188   :  { %v3675_v53 = vpop.permute.xlu0 %929 }
 0x189   :  { %v3677_v40 = vpop.permute.xlu1 %987 }
 0x18a   :  { %5186 = vst [vmem:[#allocation90_spill] sm:$0xff] %v3677_v40  ;;  %1287 = vrot.lane.b32.xlu0 %v5113_v17, %s1857_s23 }
 0x18b   :  { %1407 = vrot.lane.b32.xlu1 %v5113_v17, %s1858_s24 }
 0x18c   :  { %v3683_v49 = vpop.permute.xlu0 %933 }
 0x18d   :  { %5187 = vst [vmem:[#allocation91_spill] sm:$0xff] %v3683_v49  ;;  %v3685_v63 = vpop.permute.xlu1 %999 }
 0x18e   :  { %5188 = vst [vmem:[#allocation92_spill] sm:$0xff] %v3685_v63  ;;  %1335 = vrot.lane.b32.xlu0 %v5136_v62, %s1858_s24 }
 0x18f   :  { %1011 = vrot.lane.b32.xlu1 %v5101_v14, %s1855_s21 }
 0x190   :  { %v3691_v36 = vpop.permute.xlu0 %937 }
 0x191   :  { %5189 = vst [vmem:[#allocation93_spill] sm:$0xff] %v3691_v36  ;;  %v3693_v32 = vpop.permute.xlu1 %1003 }
 0x192   :  { %5190 = vst [vmem:[#allocation94_spill] sm:$0xff] %v3693_v32  ;;  %1359 = vrot.lane.b32.xlu0 %v5086_v16, %s1858_s24 }
 0x193   :  { %1057 = vrot.lane.b32.xlu1 %v3287_v33, %s1855_s21 }
 0x194   :  { %v3699_v17 = vpop.permute.xlu0 %941 }
 0x195   :  { %5191 = vst [vmem:[#allocation95_spill] sm:$0xff] %v3699_v17  ;;  %v3701_v49 = vpop.permute.xlu1 %1025 }
 0x196   :  { %1009 = vrot.lane.b32.xlu0 %v5126_v3, %s1855_s21 }
 0x197   :  { %1129 = vrot.lane.b32.xlu1 %v5126_v3, %s1856_s22 }
 0x198   :  { %v3707_v63 = vpop.permute.xlu0 %953 }
 0x199   :  { %5192 = vst [vmem:[#allocation96_spill] sm:$0xff] %v3707_v63  ;;  %v3709_v62 = vpop.permute.xlu1 %1049 }
 0x19a   :  { %1055 = vrot.lane.b32.xlu0 %v5119_v55, %s1855_s21 }
 0x19b   :  { %1175 = vrot.lane.b32.xlu1 %v5119_v55, %s1856_s22 }
 0x19c   :  { %v3715_v16 = vpop.permute.xlu0 %957 }
 0x19d   :  { %5193 = vst [vmem:[#allocation97_spill] sm:$0xff] %v3715_v16  ;;  %v3717_v17 = vpop.permute.xlu1 %1097 }
 0x19e   :  { %1127 = vrot.lane.b32.xlu0 %v5096_v48, %s1856_s22 }
 0x19f   :  { %1247 = vrot.lane.b32.xlu1 %v5096_v48, %s1857_s23 }
 0x1a0   :  { %v3723_v36 = vpop.permute.xlu0 %961 }
 0x1a1   :  { %5194 = vst [vmem:[#allocation98_spill] sm:$0xff] %v3723_v36  ;;  %v3725_v63 = vpop.permute.xlu1 %1121 }
 0x1a2   :  { %1173 = vrot.lane.b32.xlu0 %v3268_v41, %s1856_s22 }
 0x1a3   :  { %1293 = vrot.lane.b32.xlu1 %v3268_v41, %s1857_s23 }
 0x1a4   :  { %v3731_v40 = vpop.permute.xlu0 %965 }
 0x1a5   :  { %5195 = vst [vmem:[#allocation99_spill] sm:$0xff] %v3731_v40  ;;  %v3733_v16 = vpop.permute.xlu1 %1027 }
 0x1a6   :  { %5196 = vst [vmem:[#allocation100_spill] sm:$0xff] %v3733_v16  ;;  %1245 = vrot.lane.b32.xlu0 %v5123_v18, %s1857_s23 }
 0x1a7   :  { %1365 = vrot.lane.b32.xlu1 %v5123_v18, %s1858_s24 }
 0x1a8   :  { %v3739_v45 = vpop.permute.xlu0 %977 }
 0x1a9   :  { %v3741_v36 = vpop.permute.xlu1 %1099 }
 0x1aa   :  { %5197 = vst [vmem:[#allocation101_spill] sm:$0xff] %v3741_v36  ;;  %1291 = vrot.lane.b32.xlu0 %v5116_v47, %s1857_s23 }
 0x1ab   :  { %1411 = vrot.lane.b32.xlu1 %v5116_v47, %s1858_s24 }
 0x1ac   :  { %v3747_v32 = vpop.permute.xlu0 %981 }
 0x1ad   :  { %5198 = vst [vmem:[#allocation102_spill] sm:$0xff] %v3747_v32  ;;  %v3749_v40 = vpop.permute.xlu1 %1143 }
 0x1ae   :  { %5199 = vst [vmem:[#allocation103_spill] sm:$0xff] %v3749_v40  ;;  %1363 = vrot.lane.b32.xlu0 %v5088_v28, %s1858_s24 }
 0x1af   :  { %1035 = vrot.lane.b32.xlu1 %v5111_v27, %s1855_s21 }
 0x1b0   :  { %v3755_v16 = vpop.permute.xlu0 %985 }
 0x1b1   :  { %v3757_v42 = vpop.permute.xlu1 %1167 }
 0x1b2   :  { %5200 = vst [vmem:[#allocation104_spill] sm:$0xff] %v3757_v42  ;;  %1385 = vrot.lane.b32.xlu0 %v5132_v51, %s1858_s24 }
 0x1b3   :  { %1107 = vrot.lane.b32.xlu1 %v5084_v43, %s1856_s22 }
 0x1b4   :  { %v3763_v36 = vpop.permute.xlu0 %989 }
 0x1b5   :  { %5201 = vst [vmem:[#allocation105_spill] sm:$0xff] %v3763_v36  ;;  %v3765_v32 = vpop.permute.xlu1 %1215 }
 0x1b6   :  { %5202 = vst [vmem:[#allocation106_spill] sm:$0xff] %v3765_v32  ;;  %1409 = vrot.lane.b32.xlu0 %v3245_v11, %s1858_s24 }
 0x1b7   :  { %1153 = vrot.lane.b32.xlu1 %v5138_v5, %s1856_s22 }
 0x1b8   :  { %v3771_v40 = vpop.permute.xlu0 %1001 }
 0x1b9   :  { %v3773_v47 = vpop.permute.xlu1 %1239 }
 0x1ba   :  { %5203 = vst [vmem:[#allocation107_spill] sm:$0xff] %v3773_v47  ;;  %1033 = vrot.lane.b32.xlu0 %v5138_v5, %s1855_s21 }
 0x1bb   :  { %1225 = vrot.lane.b32.xlu1 %v5115_v38, %s1857_s23 }
 0x1bc   :  { %v3779_v42 = vpop.permute.xlu0 %1023 }
 0x1bd   :  { %5204 = vst [vmem:[#allocation108_spill] sm:$0xff] %v3779_v42  ;;  %v3781_v36 = vpop.permute.xlu1 %1007 }
 0x1be   :  { %5205 = vst [vmem:[#allocation109_spill] sm:$0xff] %v3781_v36  ;;  %1105 = vrot.lane.b32.xlu0 %v5115_v38, %s1856_s22 }
 0x1bf   :  { %1271 = vrot.lane.b32.xlu1 %v5108_v7, %s1857_s23 }
 0x1c0   :  { %v3787_v32 = vpop.permute.xlu0 %1047 }
 0x1c1   :  { %5206 = vst [vmem:[#allocation110_spill] sm:$0xff] %v3787_v32  ;;  %v3789_v15 = vpop.permute.xlu1 %1053 }
 0x1c2   :  { %5207 = vst [vmem:[#allocation111_spill] sm:$0xff] %v3789_v15  ;;  %1151 = vrot.lane.b32.xlu0 %v5108_v7, %s1856_s22 }
 0x1c3   :  { %1343 = vrot.lane.b32.xlu1 %v5082_v2, %s1858_s24 }
 0x1c4   :  { %v3795_v47 = vpop.permute.xlu0 %1095 }
 0x1c5   :  { %5208 = vst [vmem:[#allocation112_spill] sm:$0xff] %v3795_v47  ;;  %v3797_v42 = vpop.permute.xlu1 %1125 }
 0x1c6   :  { %5209 = vst [vmem:[#allocation113_spill] sm:$0xff] %v3797_v42  ;;  %1223 = vrot.lane.b32.xlu0 %v5082_v2, %s1857_s23 }
 0x1c7   :  { %1389 = vrot.lane.b32.xlu1 %v5135_v4, %s1858_s24 }
 0x1c8   :  { %v3803_v36 = vpop.permute.xlu0 %1119 }
 0x1c9   :  { %5210 = vst [vmem:[#allocation114_spill] sm:$0xff] %v3803_v36  ;;  %v3805_v32 = vpop.permute.xlu1 %1171 }
 0x1ca   :  { %5211 = vst [vmem:[#allocation115_spill] sm:$0xff] %v3805_v32  ;;  %1269 = vrot.lane.b32.xlu0 %v5135_v4, %s1857_s23 }
 0x1cb   :  { %1037 = vrot.lane.b32.xlu1 %v5141_v60, %s1855_s21 }
 0x1cc   :  { %v3811_v15 = vpop.permute.xlu0 %1005 }
 0x1cd   :  { %5212 = vst [vmem:[#allocation116_spill] sm:$0xff] %v3811_v15  ;;  %v3813_v47 = vpop.permute.xlu1 %1243 }
 0x1ce   :  { %5213 = vst [vmem:[#allocation117_spill] sm:$0xff] %v3813_v47  ;;  %1341 = vrot.lane.b32.xlu0 %v5112_v57, %s1858_s24 }
 0x1cf   :  { %1109 = vrot.lane.b32.xlu1 %v5118_v34, %s1856_s22 }
 0x1d0   :  { %v3819_v42 = vpop.permute.xlu0 %1051 }
 0x1d1   :  { %5214 = vst [vmem:[#allocation118_spill] sm:$0xff] %v3819_v42  ;;  %v3821_v36 = vpop.permute.xlu1 %1265 }
 0x1d2   :  { %1387 = vrot.lane.b32.xlu0 %v5107_v12, %s1858_s24 }
 0x1d3   :  { %1155 = vrot.lane.b32.xlu1 %v5111_v27, %s1856_s22 }
 0x1d4   :  { %v3827_v32 = vpop.permute.xlu0 %1123 }
 0x1d5   :  { %5215 = vst [vmem:[#allocation119_spill] sm:$0xff] %v3827_v32  ;;  %v3829_v4 = vpop.permute.xlu1 %1289 }
 0x1d6   :  { %1013 = vrot.lane.b32.xlu0 %v5129_v46, %s1855_s21 }
 0x1d7   :  { %1227 = vrot.lane.b32.xlu1 %v5084_v43, %s1857_s23 }
 0x1d8   :  { %v3835_v47 = vpop.permute.xlu0 %1145 }
 0x1d9   :  { %v3837_v42 = vpop.permute.xlu1 %1337 }
 0x1da   :  { %1059 = vrot.lane.b32.xlu0 %v5122_v50, %s1855_s21 }
 0x1db   :  { %1273 = vrot.lane.b32.xlu1 %v5138_v5, %s1857_s23 }
 0x1dc   :  { %v3843_v12 = vpop.permute.xlu0 %1169 }
 0x1dd   :  { %v3845_v57 = vpop.permute.xlu1 %1361 }
 0x1de   :  { %1131 = vrot.lane.b32.xlu0 %v5101_v14, %s1856_s22 }
 0x1df   :  { %1345 = vrot.lane.b32.xlu1 %v5115_v38, %s1858_s24 }
 0x1e0   :  { %v3851_v32 = vpop.permute.xlu0 %1217 }
 0x1e1   :  { %v3853_v15 = vpop.permute.xlu1 %1031 }
 0x1e2   :  { %5216 = vst [vmem:[#allocation120_spill] sm:$0xff] %v3853_v15  ;;  %1177 = vrot.lane.b32.xlu0 %v3287_v33, %s1856_s22 }
 0x1e3   :  { %1391 = vrot.lane.b32.xlu1 %v5108_v7, %s1858_s24 }
 0x1e4   :  { %v3859_v21 = vpop.permute.xlu0 %1241 }
 0x1e5   :  { %v3861_v13 = vpop.permute.xlu1 %1103 }
 0x1e6   :  { %5217 = vst [vmem:[#allocation121_spill] sm:$0xff] %v3861_v13  ;;  %1249 = vrot.lane.b32.xlu0 %v5126_v3, %s1857_s23 }
 0x1e7   :  { %1071 = vrot.lane.b32.xlu1 %v5124_v22, %s1855_s21 }
 0x1e8   :  { %v3867_v26 = vpop.permute.xlu0 %1029 }
 0x1e9   :  { %5218 = vst [vmem:[#allocation122_spill] sm:$0xff] %v3867_v26  ;;  %v3869_v2 = vpop.permute.xlu1 %1149 }
 0x1ea   :  { %5219 = vst [vmem:[#allocation123_spill] sm:$0xff] %v3869_v2  ;;  %1295 = vrot.lane.b32.xlu0 %v5119_v55, %s1857_s23 }
 0x1eb   :  { %1157 = vrot.lane.b32.xlu1 %v5141_v60, %s1856_s22 }
 0x1ec   :  { %v3875_v15 = vpop.permute.xlu0 %1101 }
 0x1ed   :  { %5220 = vst [vmem:[#allocation124_spill] sm:$0xff] %v3875_v15  ;;  %v3877_v8 = vpop.permute.xlu1 %1221 }
 0x1ee   :  { %1367 = vrot.lane.b32.xlu0 %v5096_v48, %s1858_s24 }
 0x1ef   :  { %1229 = vrot.lane.b32.xlu1 %v5118_v34, %s1857_s23 }
 0x1f0   :  { %v3883_v13 = vpop.permute.xlu0 %1147 }
 0x1f1   :  { %5221 = vst [vmem:[#allocation125_spill] sm:$0xff] %v3883_v13  ;;  %v3885_v26 = vpop.permute.xlu1 %1267 }
 0x1f2   :  { %5222 = vst [vmem:[#allocation126_spill] sm:$0xff] %v3885_v26  ;;  %1413 = vrot.lane.b32.xlu0 %v3268_v41, %s1858_s24 }
 0x1f3   :  { %1275 = vrot.lane.b32.xlu1 %v5111_v27, %s1857_s23 }
 0x1f4   :  { %v3891_v2 = vpop.permute.xlu0 %1219 }
 0x1f5   :  { %v3893_v15 = vpop.permute.xlu1 %1339 }
 0x1f6   :  { %1061 = vrot.lane.b32.xlu0 %v3302_v9, %s1855_s21 }
 0x1f7   :  { %1347 = vrot.lane.b32.xlu1 %v5084_v43, %s1858_s24 }
 0x1f8   :  { %v3899_v48 = vpop.permute.xlu0 %1263 }
 0x1f9   :  { %5223 = vst [vmem:[#allocation127_spill] sm:$0xff] %v3899_v48  ;;  %v3901_v13 = vpop.permute.xlu1 %1383 }
 0x1fa   :  { %5224 = vst [vmem:[#allocation128_spill] sm:$0xff] %v3901_v13  ;;  %1133 = vrot.lane.b32.xlu0 %v5129_v46, %s1856_s22 }
 0x1fb   :  { %1393 = vrot.lane.b32.xlu1 %v5138_v5, %s1858_s24 }
 0x1fc   :  { %v3907_v41 = vpop.permute.xlu0 %1287 }
 0x1fd   :  { %5225 = vst [vmem:[#allocation129_spill] sm:$0xff] %v3907_v41  ;;  %v3909_v26 = vpop.permute.xlu1 %1407 }
 0x1fe   :  { %5226 = vst [vmem:[#allocation130_spill] sm:$0xff] %v3909_v26  ;;  %1179 = vrot.lane.b32.xlu0 %v5122_v50, %s1856_s22 }
 0x1ff   :  { %1075 = vrot.lane.b32.xlu1 %v5127_v25, %s1855_s21 }
 0x200   :  { %v3915_v43 = vpop.permute.xlu0 %1335 }
 0x201   :  { %5227 = vst [vmem:[#allocation131_spill] sm:$0xff] %v3915_v43  ;;  %v3917_v48 = vpop.permute.xlu1 %1011 }
 0x202   :  { %5228 = vst [vmem:[#allocation132_spill] sm:$0xff] %v3917_v48  ;;  %1251 = vrot.lane.b32.xlu0 %v5101_v14, %s1857_s23 }
 0x203   :  { %1193 = vrot.lane.b32.xlu1 %v3329_v20, %s1856_s22 }
 0x204   :  { %v3923_v13 = vpop.permute.xlu0 %1359 }
 0x205   :  { %5229 = vst [vmem:[#allocation133_spill] sm:$0xff] %v3923_v13  ;;  %v3925_v41 = vpop.permute.xlu1 %1057 }
 0x206   :  { %5230 = vst [vmem:[#allocation134_spill] sm:$0xff] %v3925_v41  ;;  %1297 = vrot.lane.b32.xlu0 %v3287_v33, %s1857_s23 }
 0x207   :  { %1301 = vrot.lane.b32.xlu1 %v3302_v9, %s1857_s23 }
 0x208   :  { %v3931_v26 = vpop.permute.xlu0 %1009 }
 0x209   :  { %5231 = vst [vmem:[#allocation135_spill] sm:$0xff] %v3931_v26  ;;  %v3933_v43 = vpop.permute.xlu1 %1129 }
 0x20a   :  { %5232 = vst [vmem:[#allocation136_spill] sm:$0xff] %v3933_v43  ;;  %1369 = vrot.lane.b32.xlu0 %v5126_v3, %s1858_s24  ;;  %v752_v43 = vadd.f32 %v3400_v6, %v5109_v0  ;;  %v800_v6 = vadd.f32 %v3481_v29, %v5132_v51 }
 0x20b   :  { %1373 = vrot.lane.b32.xlu1 %v5129_v46, %s1858_s24 }
 0x20c   :  { %v3939_v48 = vpop.permute.xlu0 %1055 }
 0x20d   :  { %5233 = vst [vmem:[#allocation137_spill] sm:$0xff] %v3939_v48  ;;  %v3941_v13 = vpop.permute.xlu1 %1175  ;;  %v776_v48 = vadd.f32 %v3441_v58, %v5121_v19 }
 0x20e   :  { %5234 = vst [vmem:[#allocation138_spill] sm:$0xff] %v3941_v13  ;;  %1415 = vrot.lane.b32.xlu0 %v5119_v55, %s1858_s24  ;;  %v872_v55 = vadd.f32 %v3579_v61, %v752_v43  ;;  %v920_v61 = vadd.f32 %v3643_v30, %v800_v6 }
 0x20f   :  { %1419 = vrot.lane.b32.xlu1 %v5122_v50, %s1858_s24 }
 0x210   :  { %v3947_v41 = vpop.permute.xlu0 %1127 }
 0x211   :  { %5235 = vst [vmem:[#allocation139_spill] sm:$0xff] %v3947_v41  ;;  %v3949_v26 = vpop.permute.xlu1 %1247  ;;  %v992_v41 = vadd.f32 %v3739_v45, %v872_v55  ;;  %v1040_v55 = vadd.f32 %v3701_v49, %v920_v61 }
 0x212   :  { %5236 = vst [vmem:[#allocation140_spill] sm:$0xff] %v3949_v26  ;;  %1073 = vrot.lane.b32.xlu0 %v3329_v20, %s1855_s21  ;;  %v896_v26 = vadd.f32 %v3611_v56, %v776_v48  ;;  %v824_v56 = vadd.f32 %v3515_v44, %v3245_v11 }
 0x213   :  { %1195 = vrot.lane.b32.xlu1 %v5127_v25, %s1856_s22  ;;  %v1112_v48 = vadd.f32 %v3717_v17, %v992_v41  ;;  %v1160_v30 = vadd.f32 %v3835_v47, %v1040_v55 }
 0x214   :  { %v3957_v13 = vpop.permute.xlu0 %1173  ;;  %v1016_v19 = vadd.f32 %v3771_v40, %v896_v26  ;;  %v944_v41 = vadd.f32 %v3675_v53, %v824_v56  ;;  %v756_v56 = vadd.f32 %v3421_v35, %v5115_v38 }
 0x215   :  { %v3962_v3 = vpop.permute.xlu1 %1293  ;;  %v1232_v26 = vadd.f32 %v3851_v32, %v1112_v48  ;;  %v1280_v58 = vadd.f32 %v3821_v36, %v1160_v30  ;;  %v803_v30 = vadd.f32 %v3405_v52, %v5108_v7  ;;  %v5238_v52 = vld [vmem:[#allocation53_spill] sm:$0xff] }
 0x216   :  { %1181 = vrot.lane.b32.xlu0 %v3302_v9, %s1856_s22  ;;  %v1136_v51 = vadd.f32 %v3725_v63, %v1016_v19  ;;  %v1064_v32 = vadd.f32 %v3709_v62, %v944_v41 }
 0x217   :  { %1313 = vrot.lane.b32.xlu1 %v3329_v20, %s1857_s23  ;;  %v1352_v63 = vadd.f32 %v3837_v42, %v1232_v26 }
 0x218   :  { %v3970_v0 = vpop.permute.xlu0 %1245  ;;  %v1256_v17 = vadd.f32 %v3859_v21, %v1136_v51  ;;  %v1184_v53 = vadd.f32 %v3843_v12, %v1064_v32  ;;  %v876_v51 = vadd.f32 %v3595_v54, %v756_v56 }
 0x219   :  { %v3975_v43 = vpop.permute.xlu1 %1365  ;;  %v4012_v44 = vmul.f32 0.020408163, %v1352_v63 }
 0x21a   :  { %1253 = vrot.lane.b32.xlu0 %v5129_v46, %s1857_s23  ;;  %v1376_v47 = vadd.f32 %v3845_v57, %v1256_v17  ;;  %v1304_v12 = vadd.f32 %v3829_v4, %v1184_v53  ;;  %v804_v57 = vadd.f32 %v3499_v10, %v5138_v5  ;;  %v778_v17 = vadd.f32 %v3451_v31, %v5123_v18  ;;  %v5240_v31 = vld [vmem:[#allocation31_spill] sm:$0xff] }
 0x21b   :  { %1421 = vrot.lane.b32.xlu1 %v3302_v9, %s1858_s24  ;;  %v4027_v19 = vmul.f32 %v4012_v44, %v4012_v44  ;;  %v996_v32 = vadd.f32 %v3755_v16, %v876_v51  ;;  %v5248_v51 = vld [vmem:[#allocation42_spill] sm:$0xff] }
 0x21c   :  { %v3983_v45 = vpop.permute.xlu0 %1291  ;;  %v4018_v42 = vmul.f32 0.020408163, %v1376_v47  ;;  %v924_v4 = vadd.f32 %v3659_v1, %v804_v57  ;;  %v777_v1 = vadd.f32 %v3367_v37, %v5088_v28  ;;  %v5237_v37 = vld [vmem:[#allocation29_spill] sm:$0xff] }
 0x21d   :  { %v3990_v40 = vpop.permute.xlu1 %1411  ;;  %v898_v47 = vadd.f32 %v5237_v37, %v778_v17 }
 0x21e   :  { %1299 = vrot.lane.b32.xlu0 %v5122_v50, %s1857_s23  ;;  %v4037_v26 = vmul.f32 %v4018_v42, %v4018_v42  ;;  %v897_v28 = vadd.f32 %v3533_v59, %v777_v1 }
 0x21f   :  { %1197 = vrot.lane.b32.xlu1 %v3341_v24, %s1856_s22 }
 0x220   :  { %v3999_v11 = vpop.permute.xlu0 %1363 }
 0x221   :  { %v4003_v49 = vpop.permute.xlu1 %1035 }
 0x222   :  { %1371 = vrot.lane.b32.xlu0 %v5101_v14, %s1858_s24 }
 0x223   :  { %1431 = vrot.lane.b32.xlu1 %v5124_v22, %s1858_s24 }
 0x224   :  { %v1386_v21 = vpop.permute.xlu0 %1385 }
 0x225   :  { %v1400_v62 = vadd.f32 %v1386_v21, %v1280_v58  ;;  %v4014_v29 = vpop.permute.xlu1 %1107  ;;  %v5239_v58 = vld [vmem:[#allocation21_spill] sm:$0xff]  ;;  %v923_v21 = vadd.f32 %v5240_v31, %v803_v30  ;;  %v5250_v30 = vld [vmem:[#allocation120_spill] sm:$0xff] }
 0x226   :  { %1417 = vrot.lane.b32.xlu0 %v3287_v33, %s1858_s24  ;;  %v755_v18 = vadd.f32 %v5239_v58, %v5238_v52  ;;  %v5255_v31 = vld [vmem:[#allocation49_spill] sm:$0xff] }
 0x227   :  { %v1472_v6 = vmul.f32 0.020408163, %v1400_v62  ;;  %1081 = vrot.lane.b32.xlu1 %v3353_v23, %s1855_s21  ;;  %v1043_v17 = vadd.f32 %v5250_v30, %v923_v21  ;;  %v5263_v30 = vld [vmem:[#allocation121_spill] sm:$0xff] }
 0x228   :  { %v1410_v36 = vpop.permute.xlu0 %1409 }
 0x229   :  { %v1424_v61 = vadd.f32 %v1410_v36, %v1304_v12  ;;  %v1154_v48 = vpop.permute.xlu1 %1153  ;;  %v1504_v55 = vsub.f32 %v1472_v6, %v4027_v19  ;;  %v5241_v12 = vld [vmem:[#allocation45_spill] sm:$0xff]  ;;  %v5242_v36 = vld [vmem:[#allocation20_spill] sm:$0xff] }
 0x22a   :  { %1191 = vrot.lane.b32.xlu0 %v5124_v22, %s1856_s22  ;;  %v753_v57 = vadd.f32 %v5242_v36, %v5241_v12  ;;  %v5256_v12 = vld [vmem:[#allocation46_spill] sm:$0xff] }
 0x22b   :  { %v1480_v5 = vmul.f32 0.020408163, %v1424_v61  ;;  %1317 = vrot.lane.b32.xlu1 %v3341_v24, %s1857_s23  ;;  %v1512_v63 = vmul.f32 1.0208334, %v1504_v55  ;;  %v5243_v61 = vld [vmem:[#allocation79_spill] sm:$0xff]  ;;  %v5246_v55 = vld [vmem:[#allocation116_spill] sm:$0xff]  ;;  %v754_v36 = vadd.f32 %v5256_v12, %v5255_v31 }
 0x22c   :  { %v1034_v10 = vpop.permute.xlu0 %1033  ;;  %v5268_v12 = vld [vmem:[#allocation67_spill] sm:$0xff] }
 0x22d   :  { %v1528_v38 = vsub.f32 %v1480_v5, %v4037_v26  ;;  %v1044_v35 = vadd.f32 %v1034_v10, %v924_v4  ;;  %v1226_v41 = vpop.permute.xlu1 %1225  ;;  %v5245_v4 = vld [vmem:[#allocation94_spill] sm:$0xff]  ;;  %v1018_v5 = vadd.f32 %v5246_v55, %v898_v47  ;;  %v5247_v10 = vld [vmem:[#allocation41_spill] sm:$0xff]  ;;  %v5254_v47 = vld [vmem:[#allocation119_spill] sm:$0xff] }
 0x22e   :  { %1277 = vrot.lane.b32.xlu0 %v5141_v60, %s1857_s23  ;;  %v1017_v59 = vadd.f32 %v5245_v4, %v897_v28  ;;  %v5253_v28 = vld [vmem:[#allocation82_spill] sm:$0xff] }
 0x22f   :  { %v1536_v54 = vmul.f32 1.0208334, %v1528_v38  ;;  %1083 = vrot.lane.b32.xlu1 %v5133_v39, %s1855_s21  ;;  %v4054_v53 = vadd.f32 %v1154_v48, %v1044_v35  ;;  %v5244_v48 = vld [vmem:[#allocation51_spill] sm:$0xff]  ;;  %v802_v38 = vadd.f32 %v5248_v51, %v5247_v10  ;;  %v5249_v35 = vld [vmem:[#allocation14_spill] sm:$0xff] }
 0x230   :  { %v1106_v7 = vpop.permute.xlu0 %1105  ;;  %v825_v56 = vadd.f32 %v5244_v48, %v5243_v61  ;;  %v875_v1 = vadd.f32 %v5249_v35, %v755_v18  ;;  %v1137_v52 = vadd.f32 %v5254_v47, %v1017_v59  ;;  %v5257_v61 = vld [vmem:[#allocation85_spill] sm:$0xff]  ;;  %v5259_v10 = vld [vmem:[#allocation87_spill] sm:$0xff] }
 0x231   :  { %v4061_v62 = vadd.f32 %v1536_v54, %v1512_v63  ;;  %v1116_v16 = vadd.f32 %v1106_v7, %v996_v32  ;;  %v1272_v6 = vpop.permute.xlu1 %1271  ;;  %v5251_v32 = vld [vmem:[#allocation16_spill] sm:$0xff]  ;;  %v5252_v54 = vld [vmem:[#allocation77_spill] sm:$0xff]  ;;  %v922_v48 = vadd.f32 %v5257_v61, %v802_v38  ;;  %v5265_v38 = vld [vmem:[#allocation22_spill] sm:$0xff] }
 0x232   :  { %1349 = vrot.lane.b32.xlu0 %v5118_v34, %s1858_s24  ;;  %v873_v37 = vadd.f32 %v5252_v54, %v753_v57  ;;  %v945_v7 = vadd.f32 %v5253_v28, %v825_v56  ;;  %v5258_v18 = vld [vmem:[#allocation89_spill] sm:$0xff]  ;;  %v5264_v28 = vld [vmem:[#allocation122_spill] sm:$0xff]  ;;  %v5269_v61 = vld [vmem:[#allocation24_spill] sm:$0xff] }
 0x233   :  { %1319 = vrot.lane.b32.xlu1 %v5251_v32, %s1857_s23  ;;  %v4077_v63 = vadd.f32 %v1226_v41, %v1116_v16  ;;  %v995_v4 = vadd.f32 %v5258_v18, %v875_v1  ;;  %v5260_v41 = vld [vmem:[#allocation118_spill] sm:$0xff]  ;;  %v5261_v35 = vld [vmem:[#allocation113_spill] sm:$0xff]  ;;  %v1042_v47 = vadd.f32 %v5264_v28, %v922_v48  ;;  %v801_v18 = vadd.f32 %v5269_v61, %v5268_v12 }
 0x234   :  { %v1152_v58 = vpop.permute.xlu0 %1151  ;;  %v993_v51 = vadd.f32 %v5259_v10, %v873_v37  ;;  %v1065_v16 = vadd.f32 %v5260_v41, %v945_v7  ;;  %v1138_v57 = vadd.f32 %v5261_v35, %v1018_v5  ;;  %v5262_v56 = vld [vmem:[#allocation73_spill] sm:$0xff]  ;;  %v5271_v35 = vld [vmem:[#allocation115_spill] sm:$0xff] }
 0x235   :  { %v1163_v21 = vadd.f32 %v1152_v58, %v1043_v17  ;;  %v1344_v55 = vpop.permute.xlu1 %1343  ;;  %v874_v59 = vadd.f32 %v5262_v56, %v754_v36  ;;  %v1115_v54 = vadd.f32 %v5263_v30, %v995_v4  ;;  %v5266_v17 = vld [vmem:[#allocation101_spill] sm:$0xff]  ;;  %v5270_v36 = vld [vmem:[#allocation102_spill] sm:$0xff] }
 0x236   :  { %1395 = vrot.lane.b32.xlu0 %v5111_v27, %s1858_s24  ;;  %v1113_v37 = vadd.f32 %v5266_v17, %v993_v51  ;;  %v1258_v7 = vadd.f32 %v3970_v0, %v1138_v57  ;;  %v5267_v58 = vld [vmem:[#allocation117_spill] sm:$0xff]  ;;  %v1185_v56 = vadd.f32 %v5271_v35, %v1065_v16  ;;  %v5272_v0 = vld [vmem:[#allocation76_spill] sm:$0xff] }
 0x237   :  { %1085 = vrot.lane.b32.xlu1 %v5265_v38, %s1855_s21  ;;  %v4096_v1 = vadd.f32 %v1272_v6, %v1163_v21  ;;  %v1257_v5 = vadd.f32 %v5267_v58, %v1137_v52  ;;  %v994_v10 = vadd.f32 %v5270_v36, %v874_v59  ;;  %v921_v21 = vadd.f32 %v5272_v0, %v801_v18  ;;  %v5273_v52 = vld [vmem:[#allocation123_spill] sm:$0xff]  ;;  %v5274_v57 = vld [vmem:[#allocation124_spill] sm:$0xff] }
 0x238   :  { %v1224_v31 = vpop.permute.xlu0 %1223  ;;  %v1233_v48 = vadd.f32 %v3891_v2, %v1113_v37  ;;  %v1162_v51 = vadd.f32 %v5273_v52, %v1042_v47  ;;  %v1378_v2 = vadd.f32 %v3975_v43, %v1258_v7  ;;  %v1305_v16 = vadd.f32 %v3983_v45, %v1185_v56  ;;  %v5277_v45 = vld [vmem:[#allocation34_spill] sm:$0xff]  ;;  %v5278_v18 = vld [vmem:[#allocation56_spill] sm:$0xff]  ;;  %v5279_v36 = vld [vmem:[#allocation47_spill] sm:$0xff] }
 0x239   :  { %v1235_v4 = vadd.f32 %v1224_v31, %v1115_v54  ;;  %v1390_v41 = vpop.permute.xlu1 %1389  ;;  %v1377_v6 = vadd.f32 %v3999_v11, %v1257_v5  ;;  %v1114_v30 = vadd.f32 %v5274_v57, %v994_v10  ;;  %v5275_v11 = vld [vmem:[#allocation100_spill] sm:$0xff]  ;;  %v5276_v5 = vld [vmem:[#allocation125_spill] sm:$0xff]  ;;  %v805_v7 = vadd.f32 %v5277_v45, %v5111_v27  ;;  %v5281_v27 = vld [vmem:[#allocation62_spill] sm:$0xff] }
 0x23a   :  { %1077 = vrot.lane.b32.xlu0 %v3341_v24, %s1855_s21  ;;  %v1041_v54 = vadd.f32 %v5275_v11, %v921_v21  ;;  %v1353_v58 = vadd.f32 %v3893_v15, %v1233_v48  ;;  %v1466_v12 = vmul.f32 0.020408163, %v1378_v2  ;;  %v1425_v61 = vadd.f32 %v3990_v40, %v1305_v16 }
 0x23b   :  { %v4112_v28 = vadd.f32 %v1344_v55, %v1235_v4  ;;  %1321 = vrot.lane.b32.xlu1 %v3353_v23, %s1857_s23  ;;  %v4122_v47 = vmul.f32 0.020408163, %v1377_v6  ;;  %v1234_v55 = vadd.f32 %v3877_v8, %v1114_v30  ;;  %v757_v10 = vadd.f32 %v5279_v36, %v5278_v18  ;;  %v5280_v8 = vld [vmem:[#allocation57_spill] sm:$0xff]  ;;  %v5282_v6 = vld [vmem:[#allocation126_spill] sm:$0xff] }
 0x23c   :  { %v1270_v59 = vpop.permute.xlu0 %1269  ;;  %v1161_v31 = vadd.f32 %v5276_v5, %v1041_v54  ;;  %v925_v35 = vadd.f32 %v5280_v8, %v805_v7  ;;  %v4138_v56 = vmul.f32 0.020408163, %v1353_v58  ;;  %v1481_v52 = vmul.f32 0.020408163, %v1425_v61  ;;  %v5284_v58 = vld [vmem:[#allocation90_spill] sm:$0xff] }
 0x23d   :  { %v1282_v17 = vadd.f32 %v1270_v59, %v1162_v51  ;;  %v4119_v37 = vpop.permute.xlu1 %1037  ;;  %v877_v40 = vadd.f32 %v5281_v27, %v757_v10  ;;  %v4153_v2 = vmul.f32 %v1466_v12, %v1466_v12 }
 0x23e   :  { %1311 = vrot.lane.b32.xlu0 %v5124_v22, %s1857_s23  ;;  %v1281_v0 = vadd.f32 %v5282_v6, %v1161_v31  ;;  %v1045_v51 = vadd.f32 %v4003_v49, %v925_v35  ;;  %v4162_v5 = vmul.f32 %v4138_v56, %v4138_v56  ;;  %v5287_v6 = vld [vmem:[#allocation74_spill] sm:$0xff] }
 0x23f   :  { %v1402_v43 = vadd.f32 %v1390_v41, %v1282_v17  ;;  %1205 = vrot.lane.b32.xlu1 %v5265_v38, %s1856_s22  ;;  %v4142_v41 = vmul.f32 %v4122_v47, %v4122_v47 }
 0x240   :  { %v1342_v15 = vpop.permute.xlu0 %1341 }
 0x241   :  { %v1354_v4 = vadd.f32 %v1342_v15, %v1234_v55  ;;  %v4135_v48 = vpop.permute.xlu1 %1109  ;;  %v4151_v57 = vmul.f32 0.020408163, %v1402_v43  ;;  %v997_v55 = vadd.f32 %v5284_v58, %v877_v40  ;;  %v1529_v49 = vsub.f32 %v1481_v52, %v4142_v41  ;;  %v5315_v43 = vld [vmem:[#allocation105_spill] sm:$0xff] }
 0x242   :  { %1397 = vrot.lane.b32.xlu0 %v5141_v60, %s1858_s24 }
 0x243   :  { %v1458_v21 = vmul.f32 0.020408163, %v1354_v4  ;;  %1441 = vrot.lane.b32.xlu1 %v3353_v23, %s1858_s24  ;;  %v1117_v15 = vadd.f32 %v4014_v29, %v997_v55  ;;  %v5286_v4 = vld [vmem:[#allocation25_spill] sm:$0xff]  ;;  %v1537_v35 = vmul.f32 1.0208334, %v1529_v49  ;;  %v5292_v49 = vld [vmem:[#allocation32_spill] sm:$0xff] }
 0x244   :  { %v1388_v30 = vpop.permute.xlu0 %1387  ;;  %v781_v8 = vadd.f32 %v5286_v4, %v5101_v14  ;;  %v5290_v14 = vld [vmem:[#allocation55_spill] sm:$0xff] }
 0x245   :  { %v4155_v16 = vmul.f32 %v1458_v21, %v1458_v21  ;;  %v1570_v59 = vmul.f32 2.0, %v1458_v21  ;;  %v1401_v11 = vadd.f32 %v1388_v30, %v1281_v0  ;;  %v1156_v54 = vpop.permute.xlu1 %1155  ;;  %v4157_v17 = vmul.f32 %v1466_v12, %v1458_v21  ;;  %v5289_v30 = vld [vmem:[#allocation66_spill] sm:$0xff] }
 0x246   :  { %1079 = vrot.lane.b32.xlu0 %v5251_v32, %s1855_s21  ;;  %v4167_v31 = vadd.f32 %v1156_v54, %v1045_v51  ;;  %v901_v0 = vadd.f32 %v5287_v6, %v781_v8  ;;  %v5288_v51 = vld [vmem:[#allocation27_spill] sm:$0xff]  ;;  %v5291_v54 = vld [vmem:[#allocation132_spill] sm:$0xff]  ;;  %v5294_v8 = vld [vmem:[#allocation81_spill] sm:$0xff] }
 0x247   :  { %5283 = vst [vmem:[#allocation29_spill] sm:$0xff] %v4157_v17  ;;  %v4171_v45 = vmul.f32 %v1570_v59, %v1466_v12  ;;  %v1473_v7 = vmul.f32 0.020408163, %v1401_v11  ;;  %v4175_v61 = vadd.f32 %v4153_v2, %v4155_v16  ;;  %1443 = vrot.lane.b32.xlu1 %v5133_v39, %s1858_s24  ;;  %v780_v59 = vadd.f32 %v5289_v30, %v5288_v51 }
 0x248   :  { %v4180_v18 = vpop.permute.xlu0 %1013  ;;  %v828_v11 = vadd.f32 %v5290_v14, %v3287_v33  ;;  %v1021_v58 = vadd.f32 %v5291_v54, %v901_v0  ;;  %v5296_v33 = vld [vmem:[#allocation134_spill] sm:$0xff]  ;;  %v5297_v0 = vld [vmem:[#allocation135_spill] sm:$0xff]  ;;  %v1459_v51 = vmul.f32 0.020408163, %v4112_v28 }
 0x249   :  { %5285 = vst [vmem:[#allocation53_spill] sm:$0xff] %v4171_v45  ;;  %v1505_v36 = vsub.f32 %v1473_v7, %v4162_v5  ;;  %v1228_v10 = vpop.permute.xlu1 %1227  ;;  %v900_v7 = vadd.f32 %v5292_v49, %v780_v59  ;;  %v5298_v59 = vld [vmem:[#allocation63_spill] sm:$0xff]  ;;  %v5300_v54 = vld [vmem:[#allocation26_spill] sm:$0xff] }
 0x24a   :  { %1315 = vrot.lane.b32.xlu0 %v5127_v25, %s1857_s23  ;;  %v4185_v12 = vadd.f32 %v1228_v10, %v1117_v15  ;;  %v5293_v15 = vld [vmem:[#allocation93_spill] sm:$0xff]  ;;  %v5299_v14 = vld [vmem:[#allocation23_spill] sm:$0xff] }
 0x24b   :  { %v1513_v27 = vmul.f32 1.0208334, %v1505_v36  ;;  %v948_v36 = vadd.f32 %v5293_v15, %v828_v11  ;;  %v779_v11 = vadd.f32 %v5299_v14, %v5298_v59  ;;  %v5301_v15 = vld [vmem:[#allocation71_spill] sm:$0xff] }
 0x24c   :  { %v4189_v40 = vpop.permute.xlu0 %1059  ;;  %v5306_v59 = vld [vmem:[#allocation59_spill] sm:$0xff] }
 0x24d   :  { %v4192_v29 = vadd.f32 %v1537_v35, %v1513_v27  ;;  %v1274_v21 = vpop.permute.xlu1 %1273  ;;  %v5295_v35 = vld [vmem:[#allocation54_spill] sm:$0xff]  ;;  %v1068_v6 = vadd.f32 %v5296_v33, %v948_v36  ;;  %v899_v36 = vadd.f32 %v5301_v15, %v779_v11 }
 0x24e   :  { %1433 = vrot.lane.b32.xlu0 %v3329_v20, %s1858_s24  ;;  %v4197_v52 = vadd.f32 %v1274_v21, %v4054_v53  ;;  %v827_v27 = vadd.f32 %v5295_v35, %v5294_v8  ;;  %v1020_v21 = vadd.f32 %v5297_v0, %v900_v7  ;;  %v5302_v7 = vld [vmem:[#allocation136_spill] sm:$0xff]  ;;  %v5304_v35 = vld [vmem:[#allocation78_spill] sm:$0xff] }
 0x24f   :  { %v806_v33 = vadd.f32 %v5304_v35, %v5141_v60  ;;  %v5312_v35 = vld [vmem:[#allocation139_spill] sm:$0xff] }
 0x250   :  { %v1132_v55 = vpop.permute.xlu0 %1131  ;;  %v1140_v28 = vadd.f32 %v5302_v7, %v1020_v21  ;;  %v5310_v7 = vld [vmem:[#allocation91_spill] sm:$0xff] }
 0x251   :  { %v4206_v10 = vadd.f32 %v1132_v55, %v1021_v58  ;;  %v1346_v4 = vpop.permute.xlu1 %1345  ;;  %v947_v58 = vadd.f32 %v5300_v54, %v827_v27 }
 0x252   :  { %1199 = vrot.lane.b32.xlu0 %v5251_v32, %s1856_s22  ;;  %v4211_v53 = vadd.f32 %v1346_v4, %v4077_v63  ;;  %v5303_v4 = vld [vmem:[#allocation137_spill] sm:$0xff] }
 0x253   :  { %v1067_v8 = vadd.f32 %v5303_v4, %v947_v58  ;;  %v5308_v58 = vld [vmem:[#allocation52_spill] sm:$0xff] }
 0x254   :  { %v1178_v30 = vpop.permute.xlu0 %1177  ;;  %v758_v60 = vadd.f32 %v5308_v58, %v5118_v34  ;;  %v5314_v58 = vld [vmem:[#allocation111_spill] sm:$0xff] }
 0x255   :  { %v4221_v55 = vadd.f32 %v1178_v30, %v1068_v6  ;;  %v1392_v49 = vpop.permute.xlu1 %1391  ;;  %v4235_v6 = vmul.f32 %v1459_v51, %v1459_v51  ;;  %v5305_v30 = vld [vmem:[#allocation17_spill] sm:$0xff] }
 0x256   :  { %1435 = vrot.lane.b32.xlu0 %v5127_v25, %s1858_s24  ;;  %v1403_v63 = vadd.f32 %v1392_v49, %v4096_v1  ;;  %v826_v14 = vadd.f32 %v5306_v59, %v5305_v30  ;;  %v5307_v1 = vld [vmem:[#allocation109_spill] sm:$0xff]  ;;  %v5309_v49 = vld [vmem:[#allocation88_spill] sm:$0xff]  ;;  %v5313_v30 = vld [vmem:[#allocation15_spill] sm:$0xff] }
 0x257   :  { %v1019_v11 = vadd.f32 %v5307_v1, %v899_v36  ;;  %v5311_v36 = vld [vmem:[#allocation138_spill] sm:$0xff]  ;;  %v878_v59 = vadd.f32 %v5313_v30, %v758_v60 }
 0x258   :  { %v4233_v27 = vmul.f32 0.020408163, %v1403_v63  ;;  %v1250_v0 = vpop.permute.xlu0 %1249  ;;  %v926_v63 = vadd.f32 %v5309_v49, %v806_v33  ;;  %v946_v4 = vadd.f32 %v5310_v7, %v826_v14 }
 0x259   :  { %v4242_v54 = vadd.f32 %v1250_v0, %v1140_v28  ;;  %v4244_v21 = vpop.permute.xlu1 %1071  ;;  %v1187_v28 = vadd.f32 %v5311_v36, %v1067_v8  ;;  %v1139_v0 = vadd.f32 %v5312_v35, %v1019_v11  ;;  %v998_v45 = vadd.f32 %v5315_v43, %v878_v59  ;;  %v5316_v8 = vld [vmem:[#allocation140_spill] sm:$0xff] }
 0x25a   :  { %1201 = vrot.lane.b32.xlu0 %v3353_v23, %s1856_s22  ;;  %v1046_v1 = vadd.f32 %v4119_v37, %v926_v63  ;;  %v1066_v33 = vadd.f32 %v5314_v58, %v946_v4 }
 0x25b   :  { %v1259_v11 = vadd.f32 %v5316_v8, %v1139_v0  ;;  %v1118_v37 = vadd.f32 %v4135_v48, %v998_v45  ;;  %v5320_v8 = vld [vmem:[#allocation44_spill] sm:$0xff] }
 0x25c   :  { %v1296_v34 = vpop.permute.xlu0 %1295  ;;  %v1186_v60 = vadd.f32 %v3957_v13, %v1066_v33 }
 0x25d   :  { %v4259_v49 = vadd.f32 %v1296_v34, %v1187_v28  ;;  %v1158_v15 = vpop.permute.xlu1 %1157 }
 0x25e   :  { %1437 = vrot.lane.b32.xlu0 %v3341_v24, %s1858_s24  ;;  %v4265_v14 = vadd.f32 %v1158_v15, %v1046_v1  ;;  %v1306_v36 = vadd.f32 %v3962_v3, %v1186_v60  ;;  %v1571_v15 = vmul.f32 2.0, %v1459_v51  ;;  %v5319_v3 = vld [vmem:[#allocation68_spill] sm:$0xff] }
 0x25f   :  { %v782_v1 = vadd.f32 %v5319_v3, %v5129_v46  ;;  %v5321_v46 = vld [vmem:[#allocation36_spill] sm:$0xff]  ;;  %v4309_v3 = vstv %s124_s5 }
 0x260   :  { %v1368_v63 = vpop.permute.xlu0 %1367 }
 0x261   :  { %v1379_v7 = vadd.f32 %v1368_v63, %v1259_v11  ;;  %v1230_v4 = vpop.permute.xlu1 %1229 }
 0x262   :  { %1203 = vrot.lane.b32.xlu0 %v5133_v39, %s1856_s22  ;;  %v4272_v43 = vadd.f32 %v1230_v4, %v1118_v37  ;;  %v829_v37 = vadd.f32 %v5321_v46, %v5122_v50 }
 0x263   :  { %v1467_v28 = vmul.f32 0.020408163, %v1379_v7  ;;  %v5322_v7 = vsub.f32 %v4151_v57, %v4155_v16  ;;  %v1620_v16 = vadd.f32 %v4175_v61, %v4309_v3 }
 0x264   :  { %v1414_v35 = vpop.permute.xlu0 %1413 }
 0x265   :  { %v4275_v0 = vmul.f32 %v1571_v15, %v1467_v28  ;;  %v1426_v13 = vadd.f32 %v1414_v35, %v1306_v36  ;;  %v1276_v48 = vpop.permute.xlu1 %1275  ;;  %v4277_v45 = vmul.f32 %v1467_v28, %v1467_v28  ;;  %v4279_v30 = vmul.f32 %v1467_v28, %v1459_v51  ;;  %v5323_v28 = vld [vmem:[#allocation18_spill] sm:$0xff] }
 0x266   :  { %1439 = vrot.lane.b32.xlu0 %v5251_v32, %s1858_s24  ;;  %v4284_v59 = vadd.f32 %v1276_v48, %v4167_v31  ;;  %v902_v51 = vadd.f32 %v5320_v8, %v782_v1  ;;  %v1514_v4 = vmul.f32 1.0208334, %v5322_v7  ;;  %v949_v35 = vadd.f32 %v5323_v28, %v829_v37 }
 0x267   :  { %5317 = vst [vmem:[#allocation21_spill] sm:$0xff] %v4275_v0  ;;  %5318 = vst [vmem:[#allocation31_spill] sm:$0xff] %v4279_v30  ;;  %v1482_v34 = vmul.f32 0.020408163, %v1426_v13  ;;  %v4290_v58 = vadd.f32 %v4277_v45, %v4235_v6  ;;  %v4311_v1 = vstv %s126_s6  ;;  %v5333_v0 = vld [vmem:[#allocation19_spill] sm:$0xff] }
 0x268   :  { %v1062_v33 = vpop.permute.xlu0 %1061  ;;  %v1022_v63 = vadd.f32 %v4180_v18, %v902_v51  ;;  %v1069_v57 = vadd.f32 %v4189_v40, %v949_v35 }
 0x269   :  { %v1530_v11 = vsub.f32 %v1482_v34, %v4153_v2  ;;  %v1348_v60 = vpop.permute.xlu1 %1347  ;;  %v1460_v2 = vmul.f32 0.020408163, %v4211_v53 }
 0x26a   :  { %1323 = vrot.lane.b32.xlu0 %v5133_v39, %s1857_s23  ;;  %v4297_v31 = vadd.f32 %v1348_v60, %v4185_v12 }
 0x26b   :  { %v1538_v36 = vmul.f32 1.0208334, %v1530_v11  ;;  %v4322_v34 = vmul.f32 %v1460_v2, %v1460_v2  ;;  %v1572_v28 = vmul.f32 2.0, %v1460_v2 }
 0x26c   :  { %v1134_v15 = vpop.permute.xlu0 %1133 }
 0x26d   :  { %v1628_v13 = vadd.f32 %v1538_v36, %v1514_v4  ;;  %v4307_v48 = vadd.f32 %v1134_v15, %v1022_v63  ;;  %v1394_v12 = vpop.permute.xlu1 %1393 }
 0x26e   :  { %1325 = vrot.lane.b32.xlu0 %v5265_v38, %s1857_s23  ;;  %v1404_v50 = vadd.f32 %v1394_v12, %v4197_v52  ;;  %v5332_v52 = vld [vmem:[#allocation38_spill] sm:$0xff] }
 0x26f   :  { %v1636_v18 = vadd.f32 %v1628_v13, %v4311_v1  ;;  %v751_v30 = vadd.f32 %v5333_v0, %v5332_v52  ;;  %v1621_v0 = vadd.f32 %v4290_v58, %v4309_v3  ;;  %v5346_v58 = vld [vmem:[#allocation112_spill] sm:$0xff] }
 0x270   :  { %v4320_v53 = vmul.f32 0.020408163, %v1404_v50  ;;  %v1180_v8 = vpop.permute.xlu0 %1179 }
 0x271   :  { %v4324_v51 = vmul.f32 %v1636_v18, %v1620_v16  ;;  %v1189_v11 = vadd.f32 %v1180_v8, %v1069_v57  ;;  %v4326_v60 = vpop.permute.xlu1 %1075 }
 0x272   :  { %1445 = vrot.lane.b32.xlu0 %v5265_v38, %s1858_s24 }
 0x273   :  { %5324 = vst [vmem:[#allocation45_spill] sm:$0xff] %v4324_v51  ;;  %v5338_v51 = vld [vmem:[#allocation92_spill] sm:$0xff] }
 0x274   :  { %v1252_v40 = vpop.permute.xlu0 %1251 }
 0x275   :  { %v4333_v61 = vadd.f32 %v1252_v40, %v4206_v10  ;;  %v4335_v46 = vpop.permute.xlu1 %1193 }
 0x278   :  { %v1298_v37 = vpop.permute.xlu0 %1297 }
 0x279   :  { %v4338_v63 = vadd.f32 %v1298_v37, %v4221_v55  ;;  %v1302_v7 = vpop.permute.xlu1 %1301  ;;  %v5327_v55 = vld [vmem:[#allocation40_spill] sm:$0xff]  ;;  %v5328_v37 = vld [vmem:[#allocation95_spill] sm:$0xff] }
 0x27a   :  { %v830_v18 = vadd.f32 %v5327_v55, %v3302_v9 }
 0x27c   :  { %v1370_v4 = vpop.permute.xlu0 %1369 }
 0x27d   :  { %v1380_v36 = vadd.f32 %v1370_v4, %v4242_v54  ;;  %v1374_v15 = vpop.permute.xlu1 %1373  ;;  %v950_v4 = vadd.f32 %v5328_v37, %v830_v18 }
 0x27f   :  { %v1468_v35 = vmul.f32 0.020408163, %v1380_v36 }
 0x280   :  { %v1416_v13 = vpop.permute.xlu0 %1415 }
 0x281   :  { %v4341_v12 = vmul.f32 %v1572_v28, %v1468_v35  ;;  %v1427_v50 = vadd.f32 %v1416_v13, %v4259_v49  ;;  %v1420_v10 = vpop.permute.xlu1 %1419  ;;  %v4344_v57 = vmul.f32 %v1468_v35, %v1468_v35  ;;  %v4346_v16 = vmul.f32 %v1468_v35, %v1460_v2  ;;  %v5329_v28 = vld [vmem:[#allocation61_spill] sm:$0xff]  ;;  %v5330_v13 = vld [vmem:[#allocation48_spill] sm:$0xff] }
 0x282   :  { %v775_v2 = vadd.f32 %v5330_v13, %v5329_v28  ;;  %v5331_v35 = vsub.f32 %v4233_v27, %v4235_v6  ;;  %v5337_v28 = vld [vmem:[#allocation12_spill] sm:$0xff]  ;;  %v5339_v6 = vld [vmem:[#allocation65_spill] sm:$0xff] }
 0x283   :  { %5325 = vst [vmem:[#allocation20_spill] sm:$0xff] %v4341_v12  ;;  %5326 = vst [vmem:[#allocation79_spill] sm:$0xff] %v4346_v16  ;;  %v1483_v8 = vmul.f32 0.020408163, %v1427_v50  ;;  %v4352_v54 = vadd.f32 %v4344_v57, %v4322_v34  ;;  %v1070_v50 = vadd.f32 %v1062_v33, %v950_v4  ;;  %v5334_v12 = vld [vmem:[#allocation60_spill] sm:$0xff]  ;;  %v5336_v16 = vld [vmem:[#allocation35_spill] sm:$0xff]  ;;  %v871_v13 = vadd.f32 %v5337_v28, %v751_v30 }
 0x284   :  { %v4354_v40 = vpop.permute.xlu0 %1073  ;;  %v1515_v9 = vmul.f32 1.0208334, %v5331_v35  ;;  %v895_v38 = vadd.f32 %v5334_v12, %v775_v2  ;;  %v5340_v33 = vld [vmem:[#allocation50_spill] sm:$0xff]  ;;  %v5341_v12 = vld [vmem:[#allocation80_spill] sm:$0xff] }
 0x285   :  { %v1531_v36 = vsub.f32 %v1483_v8, %v4277_v45  ;;  %v4358_v49 = vpop.permute.xlu1 %1195  ;;  %v5335_v8 = vld [vmem:[#allocation72_spill] sm:$0xff]  ;;  %v799_v4 = vadd.f32 %v5340_v33, %v5339_v6  ;;  %v5343_v35 = vld [vmem:[#allocation114_spill] sm:$0xff] }
 0x286   :  { %v823_v39 = vadd.f32 %v5336_v16, %v5335_v8  ;;  %v1015_v27 = vadd.f32 %v5338_v51, %v895_v38  ;;  %v5344_v51 = vld [vmem:[#allocation75_spill] sm:$0xff]  ;;  %v5345_v28 = vld [vmem:[#allocation110_spill] sm:$0xff] }
 0x287   :  { %v1539_v55 = vmul.f32 1.0208334, %v1531_v36  ;;  %v919_v8 = vadd.f32 %v5344_v51, %v799_v4 }
 0x288   :  { %v1182_v17 = vpop.permute.xlu0 %1181  ;;  %v943_v36 = vadd.f32 %v5341_v12, %v823_v39  ;;  %v5347_v39 = vld [vmem:[#allocation108_spill] sm:$0xff] }
 0x289   :  { %v1629_v18 = vadd.f32 %v1539_v55, %v1515_v9  ;;  %v1190_v37 = vadd.f32 %v1182_v17, %v1070_v50  ;;  %v4368_v45 = vpop.permute.xlu1 %1313  ;;  %v5342_v17 = vld [vmem:[#allocation86_spill] sm:$0xff]  ;;  %v1135_v9 = vadd.f32 %v5343_v35, %v1015_v27  ;;  %v1039_v12 = vadd.f32 %v5347_v39, %v919_v8 }
 0x28a   :  { %v991_v2 = vadd.f32 %v5342_v17, %v871_v13  ;;  %v1063_v6 = vadd.f32 %v5345_v28, %v943_v36  ;;  %v5348_v13 = vld [vmem:[#allocation107_spill] sm:$0xff] }
 0x28b   :  { %v1637_v52 = vadd.f32 %v1629_v18, %v4311_v1  ;;  %v1310_v16 = vadd.f32 %v1302_v7, %v1190_v37  ;;  %v1255_v17 = vadd.f32 %v5348_v13, %v1135_v9  ;;  %v5356_v13 = vld [vmem:[#allocation130_spill] sm:$0xff] }
 0x28c   :  { %v1254_v50 = vpop.permute.xlu0 %1253  ;;  %v1111_v33 = vadd.f32 %v5346_v58, %v991_v2  ;;  %v1461_v2 = vmul.f32 0.020408163, %v4297_v31  ;;  %v5355_v58 = vld [vmem:[#allocation127_spill] sm:$0xff] }
 0x28d   :  { %v4382_v55 = vmul.f32 %v1637_v52, %v1621_v0  ;;  %v1262_v38 = vadd.f32 %v1254_v50, %v4307_v48  ;;  %v1422_v30 = vpop.permute.xlu1 %1421  ;;  %v5349_v48 = vld [vmem:[#allocation104_spill] sm:$0xff]  ;;  %v5350_v52 = vld [vmem:[#allocation106_spill] sm:$0xff]  ;;  %v5351_v50 = vld [vmem:[#allocation133_spill] sm:$0xff] }
 0x28e   :  { %v1430_v18 = vadd.f32 %v1422_v30, %v1310_v16  ;;  %v1183_v0 = vadd.f32 %v5349_v48, %v1063_v6  ;;  %v1231_v4 = vadd.f32 %v5350_v52, %v1111_v33  ;;  %v1375_v36 = vadd.f32 %v5351_v50, %v1255_v17  ;;  %v5352_v16 = vld [vmem:[#allocation103_spill] sm:$0xff] }
 0x28f   :  { %v1382_v32 = vadd.f32 %v1374_v15, %v1262_v38  ;;  %v1159_v9 = vadd.f32 %v5352_v16, %v1039_v12  ;;  %v5353_v38 = vld [vmem:[#allocation129_spill] sm:$0xff]  ;;  %v5354_v30 = vld [vmem:[#allocation131_spill] sm:$0xff] }
 0x290   :  { %v1300_v27 = vpop.permute.xlu0 %1299  ;;  %v4392_v7 = vmul.f32 0.020408163, %v1430_v18  ;;  %v1351_v51 = vadd.f32 %v5354_v30, %v1231_v4  ;;  %v4409_v31 = vmul.f32 0.020408163, %v1375_v36  ;;  %v1573_v18 = vmul.f32 2.0, %v1461_v2 }
 0x291   :  { %v4390_v35 = vmul.f32 0.020408163, %v1382_v32  ;;  %v1309_v37 = vadd.f32 %v1300_v27, %v1189_v11  ;;  %v1303_v32 = vadd.f32 %v5353_v38, %v1183_v0  ;;  %v1279_v33 = vadd.f32 %v5355_v58, %v1159_v9  ;;  %v4422_v16 = vpop.permute.xlu1 %1197 }
 0x292   :  { %v4412_v12 = vmul.f32 0.020408163, %v1351_v51  ;;  %v1501_v0 = vmul.f32 %v1461_v2, %v1461_v2  ;;  %v1519_v36 = vmul.f32 %v4409_v31, %v4409_v31 }
 0x293   :  { %v4400_v15 = vmul.f32 %v4390_v35, %v4390_v35  ;;  %v1429_v8 = vadd.f32 %v1420_v10, %v1309_v37  ;;  %v1423_v17 = vadd.f32 %v5356_v13, %v1303_v32 }
 0x294   :  { %v1372_v11 = vpop.permute.xlu0 %1371  ;;  %v1495_v51 = vmul.f32 %v4412_v12, %v4412_v12 }
 0x295   :  { %v1534_v28 = vsub.f32 %v4392_v7, %v4400_v15  ;;  %v1381_v6 = vadd.f32 %v1372_v11, %v4333_v61  ;;  %v1485_v27 = vmul.f32 0.020408163, %v1429_v8  ;;  %v5357_v61 = vld [vmem:[#allocation128_spill] sm:$0xff]  ;;  %v1479_v30 = vmul.f32 0.020408163, %v1423_v17 }
 0x296   :  { %v1399_v50 = vadd.f32 %v5357_v61, %v1279_v33  ;;  %v1622_v17 = vadd.f32 %v4352_v54, %v4309_v3 }
 0x297   :  { %v1469_v39 = vmul.f32 0.020408163, %v1381_v6  ;;  %v5358_v6 = vsub.f32 %v4320_v53, %v4322_v34 }
 0x298   :  { %v1418_v48 = vpop.permute.xlu0 %1417 }
 0x299   :  { %v1525_v10 = vmul.f32 %v1469_v39, %v1469_v39  ;;  %v4414_v37 = vmul.f32 %v1573_v18, %v1469_v39  ;;  %v1428_v52 = vadd.f32 %v1418_v48, %v4338_v63  ;;  %v4417_v4 = vmul.f32 %v1469_v39, %v1461_v2  ;;  %v1432_v39 = vpop.permute.xlu1 %1431 }
 0x29a   :  { %v1471_v63 = vmul.f32 0.020408163, %v1399_v50  ;;  %v1527_v2 = vsub.f32 %v1479_v30, %v1519_v36  ;;  %v1516_v58 = vmul.f32 1.0208334, %v5358_v6  ;;  %v5359_v30 = vld [vmem:[#allocation33_spill] sm:$0xff] }
 0x29b   :  { %v1533_v9 = vsub.f32 %v1485_v27, %v1525_v10  ;;  %v1484_v38 = vmul.f32 0.020408163, %v1428_v52  ;;  %v1615_v32 = vadd.f32 %v1525_v10, %v1501_v0 }
 0x29c   :  { %v1192_v8 = vpop.permute.xlu0 %1191  ;;  %v1503_v18 = vsub.f32 %v1471_v63, %v1495_v51  ;;  %v1535_v48 = vmul.f32 1.0208334, %v1527_v2  ;;  %v1609_v63 = vadd.f32 %v1519_v36, %v1495_v51 }
 0x29d   :  { %v1532_v11 = vsub.f32 %v1484_v38, %v4344_v57  ;;  %v4436_v53 = vpop.permute.xlu1 %1081 }
 0x29e   :  { %v1511_v52 = vmul.f32 1.0208334, %v1503_v18 }
 0x29f   :  { %v1540_v33 = vmul.f32 1.0208334, %v1532_v11  ;;  %v847_v11 = vadd.f32 %v5359_v30, %v5124_v22  ;;  %v1617_v22 = vadd.f32 %v1609_v63, %v4309_v3  ;;  %v1623_v63 = vadd.f32 %v1615_v32, %v4309_v3 }
 0x2a0   :  { %v1278_v13 = vpop.permute.xlu0 %1277  ;;  %v1625_v38 = vadd.f32 %v1535_v48, %v1511_v52  ;;  %v1567_v32 = vmul.f32 2.0, %v4412_v12 }
 0x2a1   :  { %v1630_v27 = vadd.f32 %v1540_v33, %v1516_v58  ;;  %v4451_v36 = vpop.permute.xlu1 %1317 }
 0x2a2   :  { %v1633_v18 = vadd.f32 %v1625_v38, %v4311_v1  ;;  %v1541_v38 = vmul.f32 1.0208334, %v1533_v9  ;;  %v1543_v9 = vmul.f32 %v4409_v31, %v4412_v12 }
 0x2a3   :  { %v1638_v10 = vadd.f32 %v1630_v27, %v4311_v1  ;;  %v5360_v27 = vld [vmem:[#allocation30_spill] sm:$0xff] }
 0x2a4   :  { %v1350_v61 = vpop.permute.xlu0 %1349 }
 0x2a5   :  { %v4433_v57 = vmul.f32 %v1638_v10, %v1622_v17  ;;  %v1358_v50 = vadd.f32 %v1350_v61, %v4272_v43  ;;  %v967_v43 = vadd.f32 %v5360_v27, %v847_v11  ;;  %v1649_v61 = vmul.f32 %v1633_v18, %v1617_v22 }
 0x2a6   :  { %v1610_v22 = vadd.f32 %v4037_v26, %v4027_v19  ;;  %v1542_v26 = vmul.f32 1.0208334, %v1534_v28 }
 0x2a7   :  { %v1462_v34 = vmul.f32 0.020408163, %v1358_v50  ;;  %1769 = vrcp.f32 %v1649_v61 }
 0x2a8   :  { %v1396_v2 = vpop.permute.xlu0 %1395  ;;  %v1618_v19 = vadd.f32 %v1610_v22, %v4309_v3 }
 0x2a9   :  { %v1574_v6 = vmul.f32 2.0, %v1462_v34  ;;  %v1405_v54 = vadd.f32 %v1396_v2, %v4284_v59  ;;  %v1502_v58 = vmul.f32 %v1462_v34, %v1462_v34  ;;  %v4442_v33 = vmul.f32 %v4390_v35, %v1462_v34  ;;  %v4456_v2 = vpop.permute.xlu1 %1083 }
 0x2aa   :  { %v1087_v59 = vadd.f32 %v4244_v21, %v967_v43  ;;  %v5361_v21 = vld [vmem:[#allocation13_spill] sm:$0xff] }
 0x2ab   :  { %v4447_v48 = vmul.f32 %v1574_v6, %v4390_v35  ;;  %v1477_v17 = vmul.f32 0.020408163, %v1405_v54  ;;  %v1616_v10 = vadd.f32 %v4400_v15, %v1502_v58  ;;  %v1286_v6 = vadd.f32 %v1278_v13, %v4265_v14  ;;  %v5362_v14 = vld [vmem:[#allocation96_spill] sm:$0xff] }
 0x2ac   :  { %v4453_v51 = vpop.permute.xlu0 %1077  ;;  %v1207_v50 = vadd.f32 %v1192_v8, %v1087_v59 }
 0x2ad   :  { %v1509_v52 = vsub.f32 %v1477_v17, %v1501_v0  ;;  %v848_v0 = vadd.f32 %v5361_v21, %v3329_v20  ;;  %v1634_v20 = vadd.f32 %v4061_v62, %v4311_v1 }
 0x2af   :  { %v1517_v34 = vmul.f32 1.0208334, %v1509_v52  ;;  %v968_v13 = vadd.f32 %v5362_v14, %v848_v0  ;;  %v4473_v52 = vpop.permute.xlu1 %1319  ;;  %v1624_v0 = vadd.f32 %v1616_v10, %v4309_v3 }
 0x2b0   :  { %v1312_v30 = vpop.permute.xlu0 %1311 }
 0x2b1   :  { %v1631_v11 = vadd.f32 %v1541_v38, %v1517_v34  ;;  %v1327_v35 = vadd.f32 %v1312_v30, %v1207_v50  ;;  %v1575_v50 = vmul.f32 %v1567_v32, %v4409_v31  ;;  %v1088_v38 = vadd.f32 %v4354_v40, %v968_v13  ;;  %v5363_v40 = vld [vmem:[#allocation37_spill] sm:$0xff] }
 0x2b2   :  { %v1544_v13 = vmul.f32 %v4018_v42, %v4012_v44 }
 0x2b3   :  { %v1639_v54 = vadd.f32 %v1631_v11, %v4311_v1  ;;  %v1447_v27 = vadd.f32 %v1432_v39, %v1327_v35  ;;  %v1650_v35 = vmul.f32 %v1634_v20, %v1618_v19  ;;  %v4490_v21 = vpop.permute.xlu1 %1085 }
 0x2b4   :  { %v1398_v18 = vpop.permute.xlu0 %1397  ;;  %v1770_v7 = vpop.eup %1769 }
 0x2b5   :  { %v4465_v8 = vmul.f32 %v1639_v54, %v1623_v63  ;;  %v1487_v43 = vmul.f32 0.020408163, %v1447_v27  ;;  %v1406_v17 = vadd.f32 %v1398_v18, %v1286_v6  ;;  %v1584_v6 = vadd.f32 %v4309_v3, %v1575_v50 }
 0x2b6   :  { %v1208_v63 = vadd.f32 %v4335_v46, %v1088_v38  ;;  %v1611_v27 = vadd.f32 %v4142_v41, %v4162_v5  ;;  %v5364_v46 = vld [vmem:[#allocation43_spill] sm:$0xff]  ;;  %1771 = vrcp.f32 %v1650_v35  ;;  %v5365_v5 = vld [vmem:[#allocation58_spill] sm:$0xff] }
 0x2b7   :  { %v1551_v59 = vsub.f32 %v1487_v43, %v1543_v9  ;;  %v1478_v39 = vmul.f32 0.020408163, %v1406_v17  ;;  %v850_v14 = vadd.f32 %v5365_v5, %v3341_v24  ;;  %v5367_v24 = vld [vmem:[#allocation64_spill] sm:$0xff]  ;;  %v5368_v35 = vld [vmem:[#allocation98_spill] sm:$0xff] }
 0x2b8   :  { %v4475_v61 = vpop.permute.xlu0 %1079  ;;  %v1328_v15 = vadd.f32 %v4368_v45, %v1208_v63  ;;  %v1619_v45 = vadd.f32 %v1611_v27, %v4309_v3  ;;  %v852_v19 = vadd.f32 %v5367_v24, %v3353_v23  ;;  %v5369_v63 = vlaneseq }
 0x2b9   :  { %v1559_v34 = vmul.f32 1.0208334, %v1551_v59  ;;  %v1510_v30 = vsub.f32 %v1478_v39, %v1502_v58  ;;  %v849_v58 = vadd.f32 %v5363_v40, %v5127_v25  ;;  %v1635_v25 = vadd.f32 %v4192_v29, %v4311_v1  ;;  %v1322_v39 = vpop.permute.xlu1 %1321  ;;  %v5366_v29 = vld [vmem:[#allocation97_spill] sm:$0xff] }
 0x2ba   :  { %v1568_v59 = vmul.f32 2.0, %v4012_v44  ;;  %v970_v50 = vadd.f32 %v5366_v29, %v850_v14  ;;  %v1545_v23 = vmul.f32 %v4122_v47, %v4138_v56 }
 0x2bb   :  { %v1592_v12 = vmul.f32 2.0, %v1559_v34  ;;  %v1518_v11 = vmul.f32 1.0208334, %v1510_v30  ;;  %v969_v9 = vadd.f32 %v5364_v46, %v849_v58  ;;  %v1651_v38 = vmul.f32 %v1635_v25, %v1619_v45 }
 0x2bc   :  { %v1316_v62 = vpop.permute.xlu0 %1315 }
 0x2bd   :  { %v1601_v31 = vadd.f32 %v4311_v1, %v1592_v12  ;;  %v1632_v54 = vadd.f32 %v1542_v26, %v1518_v11  ;;  %v1089_v10 = vadd.f32 %v4326_v60, %v969_v9  ;;  %v1576_v26 = vmul.f32 %v1568_v59, %v4018_v42 }
 0x2be   :  { %v1090_v60 = vadd.f32 %v4453_v51, %v970_v50  ;;  %1773 = vrcp.f32 %v1651_v38 }
 0x2bf   :  { %v1641_v28 = vmul.f32 %v1601_v31, %v1584_v6  ;;  %v1640_v18 = vadd.f32 %v1632_v54, %v4311_v1  ;;  %v1209_v34 = vadd.f32 %v4358_v49, %v1089_v10  ;;  %v972_v6 = vadd.f32 %v5368_v35, %v852_v19  ;;  %v4517_v49 = vpop.permute.xlu1 %1205 }
 0x2c0   :  { %v1434_v43 = vpop.permute.xlu0 %1433  ;;  %v4515_v31 = vand.u32 127, %v5369_v63  ;;  %v1585_v58 = vadd.f32 %v4309_v3, %v1576_v26  ;;  %v1210_v51 = vadd.f32 %v4422_v16, %v1090_v60  ;;  %v5373_v16 = vld [vmem:[#allocation45_spill] sm:$0xff]  ;;  %v5374_v26 = vld [vmem:[#allocation28_spill] sm:$0xff] }
 0x2c1   :  { %v1658_v17 = vmul.f32 %v1770_v7, %v1641_v28  ;;  %v4498_v22 = vmul.f32 %v1640_v18, %v1624_v0  ;;  %v1448_v41 = vadd.f32 %v1434_v43, %v1328_v15  ;;  %v1329_v12 = vadd.f32 %v1316_v62, %v1209_v34  ;;  %v5370_v7 = vld [vmem:[#allocation16_spill] sm:$0xff]  ;;  %v5371_v15 = vld [vmem:[#allocation39_spill] sm:$0xff] }
 0x2c2   :  { %v1092_v42 = vadd.f32 %v4436_v53, %v972_v6  ;;  %v851_v28 = vadd.f32 %v5371_v15, %v5370_v7  ;;  %v1569_v0 = vmul.f32 2.0, %v4138_v56  ;;  %vm1690_vm6 = vcmp.lt.s32.totalorder %v4515_v31, 122  ;;  %v5377_v6 = vld [vmem:[#allocation29_spill] sm:$0xff] }
 0x2c3   :  { %v1488_v32 = vmul.f32 0.020408163, %v1448_v41  ;;  %v1772_v46 = vpop.eup %1771  ;;  %v5372_v41 = vld [vmem:[#allocation83_spill] sm:$0xff]  ;;  %1775 = vrcp.f32 %v5373_v16  ;;  %v1442_v14 = vpop.permute.xlu1 %1441  ;;  %v1699_v59 = vsel %vm1690_vm6, %v1658_v17, 0.0 }
 0x2c4   :  { %v1200_v20 = vpop.permute.xlu0 %1199  ;;  %v971_v5 = vadd.f32 %v5372_v41, %v851_v28  ;;  %v1577_v53 = vmul.f32 %v1569_v0, %v4122_v47  ;;  %1777 = vrcp.f32 %v4433_v57  ;;  %v5379_v0 = vld [vmem:[#allocation22_spill] sm:$0xff] }
 0x2c5   :  { %v1552_v30 = vsub.f32 %v1488_v32, %v1544_v13  ;;  %v1330_v32 = vadd.f32 %v4451_v36, %v1210_v51  ;;  %1779 = vrcp.f32 %v4382_v55 }
 0x2c6   :  { %v1091_v56 = vadd.f32 %v4475_v61, %v971_v5  ;;  %v5375_v61 = vld [vmem:[#allocation69_spill] sm:$0xff]  ;;  %1781 = vrcp.f32 %v4465_v8 }
 0x2c7   :  { %v1560_v11 = vmul.f32 1.0208334, %v1552_v30  ;;  %v1586_v30 = vadd.f32 %v4309_v3, %v1577_v53  ;;  %v853_v60 = vadd.f32 %v5375_v61, %v5374_v26  ;;  %1783 = vrcp.f32 %v4498_v22 }
 0x2c8   :  { %v1436_v44 = vpop.permute.xlu0 %1435 }
 0x2c9   :  { %v1593_v54 = vmul.f32 2.0, %v1560_v11  ;;  %v1449_v40 = vadd.f32 %v1436_v44, %v1329_v12  ;;  %v5376_v11 = vld [vmem:[#allocation79_spill] sm:$0xff] }
 0x2cb   :  { %v1602_v62 = vadd.f32 %v4311_v1, %v1593_v54  ;;  %v1489_v27 = vmul.f32 0.020408163, %v1449_v40  ;;  %v1774_v63 = vpop.eup %1773  ;;  %v5378_v54 = vld [vmem:[#allocation84_spill] sm:$0xff] }
 0x2cc   :  { %v1202_v18 = vpop.permute.xlu0 %1201  ;;  %v973_v40 = vadd.f32 %v5378_v54, %v853_v60 }
 0x2cd   :  { %v1642_v9 = vmul.f32 %v1602_v62, %v1585_v58  ;;  %v1553_v43 = vsub.f32 %v1489_v27, %v1545_v23  ;;  %v1212_v25 = vadd.f32 %v1202_v18, %v1092_v42  ;;  %v5380_v18 = vld [vmem:[#allocation70_spill] sm:$0xff] }
 0x2ce   :  { %v1093_v51 = vadd.f32 %v4456_v2, %v973_v40 }
 0x2cf   :  { %v1660_v45 = vmul.f32 %v1772_v46, %v1642_v9  ;;  %v1561_v10 = vmul.f32 1.0208334, %v1553_v43  ;;  %v1332_v13 = vadd.f32 %v1322_v39, %v1212_v25  ;;  %v1211_v39 = vadd.f32 %v1200_v20, %v1091_v56  ;;  %v5381_v9 = vld [vmem:[#allocation53_spill] sm:$0xff]  ;;  %v5382_v25 = vld [vmem:[#allocation20_spill] sm:$0xff] }
 0x2d0   :  { %v1438_v29 = vpop.permute.xlu0 %1437  ;;  %v854_v46 = vadd.f32 %v5380_v18, %v5379_v0  ;;  %v1587_v43 = vadd.f32 %v4309_v3, %v5381_v9  ;;  %v1776_v55 = vpop.eup %1775 }
 0x2d1   :  { %v1700_v50 = vsel %vm1690_vm6, %v1660_v45, 0.0  ;;  %v1594_v47 = vmul.f32 2.0, %v1561_v10  ;;  %v1452_v38 = vadd.f32 %v1442_v14, %v1332_v13  ;;  %v1450_v34 = vadd.f32 %v1438_v29, %v1330_v32  ;;  %v5383_v14 = vld [vmem:[#allocation99_spill] sm:$0xff]  ;;  %v1444_v13 = vpop.permute.xlu1 %1443  ;;  %v1778_v32 = vpop.eup %1777 }
 0x2d2   :  { %v1707_v24 = vadd.f32 %v1700_v50, %v1699_v59  ;;  %v1331_v20 = vadd.f32 %v4473_v52, %v1211_v39  ;;  %v1589_v52 = vadd.f32 %v4309_v3, %v5382_v25  ;;  %v974_v45 = vadd.f32 %v5383_v14, %v854_v46  ;;  %v5384_v29 = vld [vmem:[#allocation31_spill] sm:$0xff] }
 0x2d3   :  { %v1603_v36 = vadd.f32 %v4311_v1, %v1594_v47  ;;  %v1492_v19 = vmul.f32 0.020408163, %v1452_v38  ;;  %v1490_v57 = vmul.f32 0.020408163, %v1450_v34 }
 0x2d4   :  { %v1204_v12 = vpop.permute.xlu0 %1203  ;;  %v1094_v38 = vadd.f32 %v4490_v21, %v974_v45 }
 0x2d5   :  { %v1643_v17 = vmul.f32 %v1603_v36, %v1586_v30  ;;  %v1556_v35 = vsub.f32 %v1492_v19, %v5376_v11  ;;  %v1554_v44 = vsub.f32 %v1490_v57, %v5377_v6  ;;  %v1213_v53 = vadd.f32 %v1204_v12, %v1093_v51  ;;  %v5385_v12 = vld [vmem:[#allocation21_spill] sm:$0xff]  ;;  %v1780_v6 = vpop.eup %1779 }
 0x2d6   :  { %v1214_v19 = vadd.f32 %v4517_v49, %v1094_v38 }
 0x2d7   :  { %v1662_v58 = vmul.f32 %v1774_v63, %v1643_v17  ;;  %v1564_v23 = vmul.f32 1.0208334, %v1556_v35  ;;  %v1562_v42 = vmul.f32 1.0208334, %v1554_v44  ;;  %v1588_v17 = vadd.f32 %v4309_v3, %v5385_v12 }
 0x2d8   :  { %v1440_v62 = vpop.permute.xlu0 %1439 }
 0x2d9   :  { %v1701_v27 = vsel %vm1690_vm6, %v1662_v58, 0.0  ;;  %v1597_v7 = vmul.f32 2.0, %v1564_v23  ;;  %v1595_v15 = vmul.f32 2.0, %v1562_v42  ;;  %v1451_v28 = vadd.f32 %v1440_v62, %v1331_v20  ;;  %v1782_v62 = vpop.eup %1781 }
 0x2da   :  { %v1708_v41 = vadd.f32 %v1707_v24, %v1701_v27  ;;  %v1590_v23 = vadd.f32 %v4309_v3, %v4414_v37  ;;  %v1591_v37 = vadd.f32 %v4309_v3, %v4447_v48 }
 0x2db   :  { %v1606_v2 = vadd.f32 %v4311_v1, %v1597_v7  ;;  %v1604_v5 = vadd.f32 %v4311_v1, %v1595_v15  ;;  %v1491_v16 = vmul.f32 0.020408163, %v1451_v28  ;;  %v5386_v7 = vld [vmem:[#allocation11_spill] sm:$0xff] }
 0x2dc   :  { %v1324_v10 = vpop.permute.xlu0 %1323  ;;  %v1679_v15 = vadd.s32 56, %v5386_v7 }
 0x2dd   :  { %v1646_v56 = vmul.f32 %v1606_v2, %v1589_v52  ;;  %v1644_v59 = vmul.f32 %v1604_v5, %v1587_v43  ;;  %v1555_v50 = vsub.f32 %v1491_v16, %v5384_v29  ;;  %v1333_v47 = vadd.f32 %v1324_v10, %v1213_v53  ;;  %v1784_v52 = vpop.eup %1783 }
 0x2de   :  { %vm1689_vm7 = vcmp.lt.s32.totalorder %v1679_v15, 58 }
 0x2df   :  { %v1668_v34 = vmul.f32 %v1778_v32, %v1646_v56  ;;  %v1664_v30 = vmul.f32 %v1776_v55, %v1644_v59  ;;  %v1563_v24 = vmul.f32 1.0208334, %v1555_v50  ;;  %v1453_v39 = vadd.f32 %v1444_v13, %v1333_v47  ;;  %vm1698_vm8 = vmand %vm1689_vm7, %vm1690_vm6 }
 0x2e0   :  { %v1326_v36 = vpop.permute.xlu0 %1325 }
 0x2e1   :  { %v1702_v57 = vsel %vm1690_vm6, %v1664_v30, 0.0  ;;  %v1596_v26 = vmul.f32 2.0, %v1563_v24  ;;  %v1493_v61 = vmul.f32 0.020408163, %v1453_v39  ;;  %v1334_v11 = vadd.f32 %v1326_v36, %v1214_v19 }
 0x2e2   :  { %v1709_v60 = vadd.f32 %v1708_v41, %v1702_v57  ;;  %v1704_v28 = vsel %vm1690_vm6, %v1668_v34, 0.0 }
 0x2e3   :  { %v1605_v8 = vadd.f32 %v4311_v1, %v1596_v26  ;;  %v1557_v21 = vsub.f32 %v1493_v61, %v4417_v4 }
 0x2e4   :  { %v1446_v35 = vpop.permute.xlu0 %1445 }
 0x2e5   :  { %v1645_v44 = vmul.f32 %v1605_v8, %v1588_v17  ;;  %v1565_v49 = vmul.f32 1.0208334, %v1557_v21  ;;  %v1454_v63 = vadd.f32 %v1446_v35, %v1334_v11 }
 0x2e7   :  { %v1666_v54 = vmul.f32 %v1780_v6, %v1645_v44  ;;  %v1598_v40 = vmul.f32 2.0, %v1565_v49  ;;  %v1494_v58 = vmul.f32 0.020408163, %v1454_v63 }
 0x2e9   :  { %v1607_v42 = vadd.f32 %v4311_v1, %v1598_v40  ;;  %v1558_v20 = vsub.f32 %v1494_v58, %v4442_v33  ;;  %v1703_v4 = vsel %vm1690_vm6, %v1666_v54, 0.0 }
 0x2ea   :  { %v1710_v51 = vadd.f32 %v1709_v60, %v1703_v4 }
 0x2eb   :  { %v1647_v27 = vmul.f32 %v1607_v42, %v1590_v23  ;;  %v1566_v22 = vmul.f32 1.0208334, %v1558_v20 }
 0x2ec   :  { %v1711_v0 = vadd.f32 %v1710_v51, %v1704_v28 }
 0x2ed   :  { %v1599_v18 = vmul.f32 2.0, %v1566_v22  ;;  %v1670_v46 = vmul.f32 %v1782_v62, %v1647_v27 }
 0x2ef   :  { %v1608_v33 = vadd.f32 %v4311_v1, %v1599_v18  ;;  %v1705_v9 = vsel %vm1690_vm6, %v1670_v46, 0.0 }
 0x2f0   :  { %v1712_v43 = vadd.f32 %v1711_v0, %v1705_v9 }
 0x2f1   :  { %v1648_v25 = vmul.f32 %v1608_v33, %v1591_v37 }
 0x2f3   :  { %v1672_v41 = vmul.f32 %v1784_v52, %v1648_v25 }
 0x2f5   :  { %v1706_v55 = vsel %vm1698_vm8, %v1672_v41, 0.0 }
 0x2f6   :  { %v1713_v2 = vadd.f32 %v1712_v43, %v1706_v55 }
 0x2f8   :  { %1714 = vadd.xlane.f32.xlu1 %v1713_v2 }
 0x381   :  { %v1715_v5 = vpop.xlane.xlu1 %1714 }
 0x382   :  { %v1716_v53 = vrot.slane %v1715_v5, 4 }
 0x384   :  { %v1717_v3 = vadd.f32 %v1716_v53, %v1715_v5 }
 0x386   :  { %v1718_v48 = vrot.slane %v1717_v3, 2 }
 0x388   :  { %v1719_v1 = vadd.f32 %v1718_v48, %v1717_v3 }
 0x38a   :  { %v1720_v16 = vrot.slane %v1719_v1, 1 }
 0x38c   :  { %v1721_v14 = vadd.f32 %v1720_v16, %v1719_v1 }
 0x38e   :  { %1753 = vpush %v1721_v14 }
 0x3bf   :  { %s1754_s7 = spop %1753 }
 0x3c0   :  { %s1723_s8 = smul.f32 0.00014132279, %s1754_s7 }
 0x3c2   :  { %s1724_s9 = ssub.f32 1.0, %s1723_s8 }
 0x3c4   :  { %v1725_v45 = vstv %s1724_s9 }
 0x3c5   :  { %v1726_v10 = vmul.f32 1.442695, %v1725_v45 }
 0x3c7   :  { %1785 = vpow2.f32 %v1726_v10 }
 0x3d4   :  { %v1786_v31 = vpop.eup %1785 }
 0x3d5   :  { %1755 = vpush %v1786_v31 }
 0x406   :  { %s1756_s11 = spop %1755 }
 0x407   :  { %s1729_s12 = smul.f32 %s1756_s11, %s88_s10 }
 0x409   :  { %1731 = sst [smem:[#allocation7]] %s1729_s12 }
 0x40a   :  { %1739 = dma.smem_to_hbm %s1860_s13, 16, %s4593_s2, [#allocation4]  }
 0x40b   :  { %1847 = dma.done.wait [#allocation4], 16  }
 0x40c   :  { %1848 = vsyncadd [#allocation4], 4294967280 }
 0x40d   :  { %1743 = sfence }
 0x40e   :  { %1744 = vsyncpa [#allocation3], 1 }
 0x40f   :  { %1745 = vsyncpa [#allocation6], 1 }
 0x410   :  { %1746 = vsyncpa [#allocation4], 1 }

</bundles_post_ra>
